<compile_context>
chip_gen: v6e
topology: v6e:2x2x1
jax: 0.10.0
libtpu: 0.0.40
codegen_flags: <defaults>
</compile_context>

<pallas_src>
import jax
import jax.numpy as jnp
from jax.experimental import pallas as pl
from jax.experimental.pallas import tpu as pltpu


# ----------------------------------------------------------------------------
# Kernels
# ----------------------------------------------------------------------------
def _make_single_kernel(precision):
    """Whole-problem-in-VMEM fast path (no grid)."""

    def kernel(c_param_ref, z_ref, c_out_ref, out_ref):
        n = c_param_ref.shape[0]
        row = jax.lax.broadcasted_iota(jnp.int32, (n, n), 0)
        col = jax.lax.broadcasted_iota(jnp.int32, (n, n), 1)
        zero = jnp.zeros((), dtype=c_param_ref.dtype)
        c = jnp.where(row == col, zero, c_param_ref[...])
        c_out_ref[...] = c
        out_ref[...] = jnp.dot(
            c, z_ref[...],
            preferred_element_type=jnp.float32,
            precision=precision,
        ).astype(out_ref.dtype)

    return kernel


def _make_tiled_kernel(tm, tk, z_resident, precision):
    """One (i, k) grid step.

    i : row-tile of C / output        ("parallel")
    k : reduction tile over n         ("arbitrary"; acc scratch is k-resident)

    If `z_resident`, z_ref holds the full (n_pad, d_pad) array and the tk rows
    for this k step are sliced in VMEM; otherwise z_ref is the (tk, d) block.
    """

    def kernel(c_param_ref, z_ref, c_out_ref, out_ref, acc_ref):
        i = pl.program_id(0)
        k = pl.program_id(1)
        row0 = i * tm
        col0 = k * tk

        @pl.when(k == 0)
        def _():
            acc_ref[...] = jnp.zeros_like(acc_ref)

        if z_resident:
            start = pl.multiple_of(k * tk, 128)
            z_rows = z_ref[pl.ds(start, tk), :]
        else:
            z_rows = z_ref[...]

        def step(c_tile):
            # Store the C tile once and feed the same value to the MXU
            # (no VMEM store -> load round trip).
            c_out_ref[...] = c_tile
            acc_ref[...] += jnp.dot(
                c_tile, z_rows,
                preferred_element_type=jnp.float32,
                precision=precision,
            )

        intersects_diag = jnp.logical_and(row0 < col0 + tk, col0 < row0 + tm)

        @pl.when(intersects_diag)
        def _():
            row = jax.lax.broadcasted_iota(jnp.int32, (tm, tk), 0) + row0
            col = jax.lax.broadcasted_iota(jnp.int32, (tm, tk), 1) + col0
            zero = jnp.zeros((), dtype=c_out_ref.dtype)
            step(jnp.where(row == col, zero, c_param_ref[...]))

        @pl.when(jnp.logical_not(intersects_diag))
        def _():
            step(c_param_ref[...])

        @pl.when(k == pl.num_programs(1) - 1)
        def _():
            out_ref[...] = acc_ref[...].astype(out_ref.dtype)

    return kernel


# ----------------------------------------------------------------------------
# Chip-aware configuration
# ----------------------------------------------------------------------------
def _chip_config():
    try:
        vmem_bytes = int(pltpu.get_tpu_info().vmem_capacity_bytes)
    except Exception:
        vmem_bytes = None

    if vmem_bytes is not None and vmem_bytes >= (100 << 20):
        # v5e / v6e: 128 MiB VMEM, single TensorCore.
        return dict(
            tile_prefs=(2048, 1024, 512, 256, 128),
            vmem_budget=88 << 20,
            vmem_cap=110 << 20,
            prefer_two_row_blocks=False,   # one big row tile on single-TC chips
            small_path_bytes=4 << 20,
            buffered_c=None,
        )
    if vmem_bytes is not None:
        # v7x: 64 MiB VMEM, 2 TensorCores.
        return dict(
            tile_prefs=(512, 256, 128),
            vmem_budget=36 << 20,
            vmem_cap=48 << 20,
            prefer_two_row_blocks=True,    # keep both TCs busy
            small_path_bytes=1 << 20,      # route mid-size shapes to tiled path
            buffered_c=3,                  # deeper buffering on the n^2 C stream
        )
    # Unknown chip: conservative (v7x-safe) defaults, no Buffered override.
    return dict(
        tile_prefs=(512, 256, 128),
        vmem_budget=36 << 20,
        vmem_cap=48 << 20,
        prefer_two_row_blocks=True,
        small_path_bytes=1 << 20,
        buffered_c=None,
    )


def _round_up(x, m):
    return ((x + m - 1) // m) * m


def _pick_parallel_tile(n, prefs, prefer_two_blocks):
    if prefer_two_blocks:
        for t in prefs:
            if t <= n and n % t == 0 and n // t >= 2:
                return t
    for t in prefs:
        if t <= n and n % t == 0:
            return t
    return n


def _pick_reduction_tile(n, prefs):
    for t in prefs:
        if t <= n and n % t == 0:
            return t
    return n


def _pad2d(x, rows, cols):
    r, c = x.shape
    if r == rows and c == cols:
        return x
    return jnp.pad(x, ((0, rows - r), (0, cols - c)))


# ----------------------------------------------------------------------------
# Wrapper
# ----------------------------------------------------------------------------
def self_expr_forward(c_param, z, *, tm=None, tk=None, small_path_bytes=None):
    """Returns (C, C @ Z) exactly like SelfExpr.forward."""
    n, n2 = c_param.shape
    assert n == n2, "C_ must be square"
    nz, d = z.shape
    assert nz == n

    cfg = _chip_config()
    if small_path_bytes is None:
        small_path_bytes = cfg["small_path_bytes"]

    # Lane / tile padding: ragged n and sub-128 d are padded with zeros so all
    # blocks are (8,128)-aligned and lane-dense; results are sliced back.
    n_pad = _round_up(n, 128)
    d_pad = _round_up(d, 128)
    c_in = _pad2d(c_param, n_pad, n_pad)
    z_in = _pad2d(z, n_pad, d_pad)

    c_item = c_in.dtype.itemsize
    z_item = z_in.dtype.itemsize

    # Explicit MXU precision: true f32 accuracy for f32 operands (HBM-bound
    # kernel, so the extra passes are hidden); native path for bf16 operands.
    precision = (
        jax.lax.Precision.HIGHEST
        if (c_in.dtype == jnp.float32 and z_in.dtype == jnp.float32)
        else None
    )

    out_shapes = (
        jax.ShapeDtypeStruct((n_pad, n_pad), c_in.dtype),  # C (zero diagonal)
        jax.ShapeDtypeStruct((n_pad, d_pad), z_in.dtype),  # C @ Z
    )

    # ---- fast path: whole problem fits in VMEM, single step, no grid -------
    total_bytes = 2 * n_pad * n_pad * c_item + 2 * n_pad * d_pad * z_item
    if total_bytes <= small_path_bytes:
        c_out, out = pl.pallas_call(
            _make_single_kernel(precision),
            out_shape=out_shapes,
            compiler_params=pltpu.CompilerParams(vmem_limit_bytes=32 << 20),
        )(c_in, z_in)
    else:
        # ---- tiled path -----------------------------------------------------
        prefs = cfg["tile_prefs"]
        tm = _pick_parallel_tile(n_pad, prefs, cfg["prefer_two_row_blocks"]) \
            if tm is None else tm
        tk = _pick_reduction_tile(n_pad, prefs) if tk is None else tk
        assert n_pad % tm == 0 and n_pad % tk == 0, "tiles must divide padded n"

        # Keep Z fully VMEM-resident when it is small relative to the budget.
        z_res = (2 * n_pad * d_pad * z_item) <= (cfg["vmem_budget"] // 3)

        c_bufs = cfg["buffered_c"] if cfg["buffered_c"] else 2

        def buf_bytes(tm_, tk_, z_res_):
            c_in_b = c_bufs * tm_ * tk_ * c_item          # C_ in (2- or 3-deep)
            c_out_b = 2 * tm_ * tk_ * c_item              # C out
            z_b = (2 * n_pad * d_pad * z_item) if z_res_ \
                else (2 * tk_ * d_pad * z_item)           # Z in
            out_b = 2 * tm_ * d_pad * z_item              # output block
            acc_b = tm_ * d_pad * 4                       # f32 scratch acc
            return c_in_b + c_out_b + z_b + out_b + acc_b

        # Shrink tiles (keeping divisibility) until the footprint fits.
        while buf_bytes(tm, tk, z_res) > cfg["vmem_budget"]:
            if tk > 128 and n_pad % (tk // 2) == 0:
                tk //= 2
            elif tm > 128 and n_pad % (tm // 2) == 0:
                tm //= 2
            elif z_res:
                z_res = False
            else:
                break
        # TODO(synk): tile d (reintroduce a j grid axis) if Z/out rows with
        # full d ever exceed the VMEM budget even at 128-wide C tiles.
        assert buf_bytes(tm, tk, z_res) <= cfg["vmem_cap"], \
            "d too large for full-d blocks"

        vmem_limit = int(min(cfg["vmem_cap"],
                             max(32 << 20, buf_bytes(tm, tk, z_res) + (8 << 20))))

        grid = (n_pad // tm, n_pad // tk)

        # Deeper pipelining on the dominant n^2 C_ stream (v7x only).
        c_spec_kwargs = {}
        if cfg["buffered_c"] and grid[0] * grid[1] >= cfg["buffered_c"]:
            c_spec_kwargs = dict(pipeline_mode=pl.Buffered(cfg["buffered_c"]))
        c_in_spec = pl.BlockSpec((tm, tk), lambda i, k: (i, k), **c_spec_kwargs)

        if z_res:
            z_spec = pl.BlockSpec((n_pad, d_pad), lambda i, k: (0, 0))
        else:
            z_spec = pl.BlockSpec((tk, d_pad), lambda i, k: (k, 0))

        c_out, out = pl.pallas_call(
            _make_tiled_kernel(tm, tk, z_res, precision),
            out_shape=out_shapes,
            grid_spec=pltpu.PrefetchScalarGridSpec(
                num_scalar_prefetch=0,
                grid=grid,
                in_specs=[c_in_spec, z_spec],
                out_specs=[
                    pl.BlockSpec((tm, tk), lambda i, k: (i, k)),   # C tile
                    pl.BlockSpec((tm, d_pad), lambda i, k: (i, 0)),  # output
                ],
                scratch_shapes=[pltpu.VMEM((tm, d_pad), jnp.float32)],
            ),
            compiler_params=pltpu.CompilerParams(
                dimension_semantics=("parallel", "arbitrary"),
                vmem_limit_bytes=vmem_limit,
            ),
        )(c_in, z_in)

    if (n_pad, d_pad) != (n, d):
        c_out = c_out[:n, :n]
        out = out[:n, :d]
    return c_out, out


# ----------------------------------------------------------------------------
# Test
# ----------------------------------------------------------------------------
def _check(c_param, z, c_out, out):
    c_ref = c_param - jnp.diag(jnp.diagonal(c_param))
    out_ref = c_ref @ z
    assert jnp.allclose(c_out, c_ref, atol=1e-6), "C mismatch"
    assert jnp.allclose(out, out_ref, atol=1e-4, rtol=1e-4), "output mismatch"


if __name__ == "__main__":
    key = jax.random.PRNGKey(0)
    k_c, k_z, k_c2, k_z2, k_c3, k_z3 = jax.random.split(key, 6)

    # --- small shape (n nodes, d-dim Z): exercises the single-step fast path
    n, d = 256, 128
    c_param = jax.random.uniform(k_c, (n, n), jnp.float32, 0.0, 0.01)
    z = jax.random.normal(k_z, (n, d), jnp.float32)
    c_out, out = self_expr_forward(c_param, z)
    jax.block_until_ready((c_out, out))
    _check(c_param, z, c_out, out)

    # --- force the tiled (grid) path: grid = (2, 4), exercises the resident-Z
    #     slicing, the f32 accumulator init/finalize, and diagonal-skip blocks.
    n2, d2 = 512, 128
    c_param2 = jax.random.uniform(k_c2, (n2, n2), jnp.float32, 0.0, 0.01)
    z2 = jax.random.normal(k_z2, (n2, d2), jnp.float32)
    c_out2, out2 = self_expr_forward(
        c_param2, z2, tm=256, tk=128, small_path_bytes=0
    )
    jax.block_until_ready((c_out2, out2))
    _check(c_param2, z2, c_out2, out2)

    # --- ragged n and sub-128 d: exercises the lane/tile padding + slice-back
    #     on the tiled path.
    n3, d3 = 200, 64
    c_param3 = jax.random.uniform(k_c3, (n3, n3), jnp.float32, 0.0, 0.01)
    z3 = jax.random.normal(k_z3, (n3, d3), jnp.float32)
    c_out3, out3 = self_expr_forward(c_param3, z3, small_path_bytes=0)
    jax.block_until_ready((c_out3, out3))
    _check(c_param3, z3, c_out3, out3)

    print("KERNEL_OK")
</pallas_src>

<mosaic_0001>
module attributes {stable_mosaic.version = 11 : i64} {
  func.func @kernel(%arg0: memref<256x256xf32, #tpu.memory_space<vmem>>, %arg1: memref<256x128xf32, #tpu.memory_space<vmem>>, %arg2: memref<256x256xf32, #tpu.memory_space<vmem>>, %arg3: memref<256x128xf32, #tpu.memory_space<vmem>>) attributes {dimension_semantics = [], scalar_prefetch = 0 : i64, scratch_operands = 0 : i64, tpu.core_type = #tpu.core_type<tc>} {
    %0 = tpu.iota {dimensions = array<i32: 0>} : vector<256x256xi32>
    %1 = tpu.iota {dimensions = array<i32: 1>} : vector<256x256xi32>
    %2 = arith.cmpi eq, %0, %1 : vector<256x256xi32>
    %c0 = arith.constant 0 : index
    %c0_0 = arith.constant 0 : index
    %3 = vector.load %arg0[%c0, %c0_0] : memref<256x256xf32, #tpu.memory_space<vmem>>, vector<256x256xf32>
    %cst = arith.constant 0.000000e+00 : f32
    %4 = vector.broadcast %cst : f32 to vector<256x256xf32>
    %5 = arith.select %2, %4, %3 : vector<256x256xi1>, vector<256x256xf32>
    %c0_1 = arith.constant 0 : index
    %c0_2 = arith.constant 0 : index
    %6 = vector.load %arg2[%c0_1, %c0_2] : memref<256x256xf32, #tpu.memory_space<vmem>>, vector<256x256xf32>
    tpu.vector_store %arg2[%c0_1, %c0_2], %5 {strides = array<i32>} : memref<256x256xf32, #tpu.memory_space<vmem>>, vector<256x256xf32>,
    %c0_3 = arith.constant 0 : index
    %c0_4 = arith.constant 0 : index
    %7 = vector.load %arg1[%c0_3, %c0_4] : memref<256x128xf32, #tpu.memory_space<vmem>>, vector<256x128xf32>
    %cst_5 = arith.constant dense<0.000000e+00> : vector<256x128xf32>
    %8 = tpu.matmul %5, %7, %cst_5 {dimension_numbers = #tpu.dot_dimension_numbers<[1], [0], [0], [1], [0, 0, 1, 1], [], []>, precision = #tpu.contract_precision<fp32>} : vector<256x256xf32>, vector<256x128xf32>, vector<256x128xf32> -> vector<256x128xf32>
    %c0_6 = arith.constant 0 : index
    %c0_7 = arith.constant 0 : index
    %9 = vector.load %arg3[%c0_6, %c0_7] : memref<256x128xf32, #tpu.memory_space<vmem>>, vector<256x128xf32>
    tpu.vector_store %arg3[%c0_6, %c0_7], %8 {strides = array<i32>} : memref<256x128xf32, #tpu.memory_space<vmem>>, vector<256x128xf32>,
    return
  }
}

</mosaic_0001>

<bundles_post_ra>
// kernel: tpu_custom_call.1
= control target key start
LH: loop header
LB: loop body
LE: loop exit
PB: predicated region body
PF: predicated region fallthrough
CT: control target
= control target key end

     0   :  { %9 = vsyncpa [#allocation3], 0  ;;  %s5433_s0 = inlined_call_operand.hbm [shape: f32[256,256], index: 0, kind: input, shape index: {}]   ;;  %s5434_s1 = inlined_call_operand.hbm [shape: f32[256,128], index: 1, kind: input, shape index: {}]   ;;  %s5435_s2 = inlined_call_operand.hbm [shape: f32[256,256], index: 2, kind: output, shape index: {0}]   ;;  %s5436_s3 = inlined_call_operand.hbm [shape: f32[256,128], index: 3, kind: output, shape index: {1}]  }
   0x1   :  { %10 = vsyncpa [#allocation6], 0 }
   0x2   :  { %11 = vsyncpa [#allocation4], 0 }
   0x3   :  { %12 = vsyncpa [#allocation9], 0  ;;  %s3147_s12 = smov [#allocation2]  }
   0x4   :  { %s18_s13 = sshll.u32 %s3147_s12, 4  ;;  %s19_s13 = int_to_ptr.vmem [resolvable:$true] %s18_s13 }
   0x5   :  { %s3067_s14 = scalar_lea.vmem %s19_s13, 8192  ;;  %p3072_p1 = scmp.lt.s32.totalorder %s19_s13, %s19_s13 }
   0x6   :  { %p3068_p0 = scmp.ne.s32.totalorder %s19_s13, %s3067_s14  ;;  %p3073_p2 = scmp.lt.s32.totalorder %s3067_s14, %s3067_s14 }
   0x8   :  { %p3074_p3 = por %p3073_p2, %p3072_p1 }
   0xa   :  { %p3075_p4 = pnand %p3074_p3, %p3068_p0 }
   0xc   :  { %3078 = shalt.err (!%p3075_p4)
}
   0xd   :  { %s3148_s15 = smov 256   ;;  %s3149_s16 = smov 16  }
   0xe   :  { %24 = dma.hbm_to_vmem [thread:$0]  %s5433_s0, 8192, %s19_s13, [#allocation3], %s3148_s15, %s3148_s15, %s3149_s16  }
   0xf   :  { %s3150_s19 = smov [#allocation5]  }
  0x10   :  { %s30_s20 = sshll.u32 %s3150_s19, 4  ;;  %s31_s20 = int_to_ptr.vmem [resolvable:$true] %s30_s20 }
  0x11   :  { %s3087_s21 = scalar_lea.vmem %s31_s20, 4096  ;;  %p3092_p6 = scmp.lt.s32.totalorder %s31_s20, %s31_s20 }
  0x12   :  { %p3088_p5 = scmp.ne.s32.totalorder %s31_s20, %s3087_s21  ;;  %p3093_p7 = scmp.lt.s32.totalorder %s3087_s21, %s3087_s21 }
  0x14   :  { %p3094_p8 = por %p3093_p7, %p3092_p6 }
  0x16   :  { %p3095_p9 = pnand %p3094_p8, %p3088_p5 }
  0x18   :  { %3098 = shalt.err (!%p3095_p9)
}
  0x19   :  { %s3151_s22 = smov 128   ;;  %s3152_s23 = smov 8  }
  0x1a   :  { %36 = dma.hbm_to_vmem [thread:$0]  %s5434_s1, 4096, %s31_s20, [#allocation6], %s3151_s22, %s3151_s22, %s3152_s23  }
  0x1b   :  { %3139 = dma.done.wait [#allocation3], 8192  }
  0x1c   :  { %3140 = vsyncadd [#allocation3], 4294959104 }
  0x1d   :  { %3141 = dma.done.wait [#allocation6], 4096  }
  0x1e   :  { %3142 = vsyncadd [#allocation6], 4294963200  ;;  %v5448_v0 = vmov 0.0   ;;  %v350_v1 = vld [vmem:[#allocation5 + $0x78] sm:$0xff]  ;;  %v349_v2 = vld [vmem:[#allocation5 + $0x70] sm:$0xff]  ;;  %s3154_s0 = smov [#allocation7]  }
  0x1f   :  { %367 = vmatprep.subr.mxu0 %v5448_v0  ;;  %944 = vmatprep.subr.mxu1 %v5448_v0  ;;  %v348_v3 = vld [vmem:[#allocation5 + $0x68] sm:$0xff]  ;;  %v3190_v4 = vand.u32 4294901760, %v350_v1  ;;  %v3192_v5 = vand.u32 4294901760, %v349_v2  ;;  %v347_v7 = vld [vmem:[#allocation5 + $0x60] sm:$0xff]  ;;  %v346_v8 = vld [vmem:[#allocation5 + $0x58] sm:$0xff]  ;;  %s3002_s1 = sshll.u32 %s3154_s0, 4  ;;  %s3003_s1 = int_to_ptr.vmem [resolvable:$true] %s3002_s1 }
  0x20   :  { %v3194_v6 = vand.u32 4294901760, %v348_v3  ;;  %v345_v9 = vld [vmem:[#allocation5 + $0x50] sm:$0xff]  ;;  %v3196_v10 = vand.u32 4294901760, %v347_v7  ;;  %v3198_v11 = vand.u32 4294901760, %v346_v8  ;;  %v344_v13 = vld [vmem:[#allocation5 + $0x48] sm:$0xff]  ;;  %v343_v14 = vld [vmem:[#allocation5 + $0x40] sm:$0xff]  ;;  %p3104_p11 = scmp.lt.s32.totalorder %s3003_s1, %s3003_s1 }
  0x21   :  { %v3200_v12 = vand.u32 4294901760, %v345_v9  ;;  %369 = vmatpush1.msra.mxu0 %v3190_v4  ;;  %v3204_v15 = vsub.f32 %v350_v1, %v3190_v4  ;;  %v3207_v16 = vsub.f32 %v349_v2, %v3192_v5  ;;  %v3209_v17 = vand.u32 4294901760, %v344_v13  ;;  %v342_v19 = vld [vmem:[#allocation5 + $0x38] sm:$0xff]  ;;  %v341_v26 = vld [vmem:[#allocation5 + $0x30] sm:$0xff]  ;;  %v340_v36 = vld [vmem:[#allocation5 + $0x28] sm:$0xff]  ;;  %s3099_s26 = scalar_lea.vmem %s3003_s1, 8192 }
  0x22   :  { %5780 = vst [vmem:[#allocation14_spill] sm:$0xff] %v3196_v10  ;;  %5781 = vst [vmem:[#allocation15_spill] sm:$0xff] %v3198_v11  ;;  %v3212_v18 = vsub.f32 %v348_v3, %v3194_v6  ;;  %370 = vmatprep.subr.mxu0 %v5448_v0  ;;  %v3216_v20 = vsub.f32 %v347_v7, %v3196_v10  ;;  %v3219_v21 = vsub.f32 %v346_v8, %v3198_v11  ;;  %v339_v41 = vld [vmem:[#allocation5 + $0x20] sm:$0xff]  ;;  %v3272_v48 = vld [vmem:[#allocation2 + $0x8] sm:$0xff]  ;;  %p3100_p10 = scmp.ne.s32.totalorder %s3003_s1, %s3099_s26  ;;  %p3105_p12 = scmp.lt.s32.totalorder %s3099_s26, %s3099_s26 }
  0x23   :  { %5782 = vst [vmem:[#allocation16_spill] sm:$0xff] %v3200_v12  ;;  %5783 = vst [vmem:[#allocation17_spill] sm:$0xff] %v3209_v17  ;;  %372 = vmatpush1.msra.mxu0 %v3192_v5  ;;  %v5447_v22 = vand.u32 4294901760, %v3204_v15  ;;  %v5445_v23 = vand.u32 4294901760, %v3207_v16  ;;  %v3225_v25 = vand.u32 4294901760, %v343_v14  ;;  %v3229_v28 = vand.u32 4294901760, %v342_v19 }
  0x24   :  { %5784 = vst [vmem:[#allocation18_spill] sm:$0xff] %v3219_v21  ;;  %v5444_v24 = vand.u32 4294901760, %v3212_v18  ;;  %373 = vmatprep.subr.mxu0 %v5448_v0  ;;  %v5442_v27 = vand.u32 4294901760, %v3216_v20  ;;  %v5441_v29 = vand.u32 4294901760, %v3219_v21  ;;  %v3233_v30 = vsub.f32 %v345_v9, %v3200_v12  ;;  %v338_v50 = vld [vmem:[#allocation5 + $0x18] sm:$0xff]  ;;  %272 = vst [vmem:[#allocation7 + $0x8] sm:$0xff] %v3272_v48  ;;  %p3106_p13 = por %p3105_p12, %p3104_p11 }
  0x25   :  { %5785 = vst [vmem:[#allocation19_spill] sm:$0xff] %v3225_v25  ;;  %5786 = vst [vmem:[#allocation20_spill] sm:$0xff] %v3229_v28  ;;  %375 = vmatpush1.msra.mxu0 %v3194_v6  ;;  %v948_v31 = vsub.f32 %v3204_v15, %v5447_v22  ;;  %v955_v32 = vsub.f32 %v3207_v16, %v5445_v23  ;;  %v3246_v34 = vsub.f32 %v344_v13, %v3209_v17  ;;  %v3279_v51 = vld [vmem:[#allocation2 + $0x18] sm:$0xff]  ;;  %v3281_v52 = vld [vmem:[#allocation2 + $0x28] sm:$0xff] }
  0x26   :  { %5787 = vst [vmem:[#allocation21_spill] sm:$0xff] %v3233_v30  ;;  %v962_v33 = vsub.f32 %v3212_v18, %v5444_v24  ;;  %376 = vmatprep.subr.mxu0 %v5448_v0  ;;  %v3249_v35 = vand.u32 4294901760, %v341_v26  ;;  %v969_v39 = vsub.f32 %v3216_v20, %v5442_v27  ;;  %v5440_v40 = vand.u32 4294901760, %v3233_v30  ;;  %v3288_v56 = vld [vmem:[#allocation5 + $0x10] sm:$0xff]  ;;  %274 = vst [vmem:[#allocation7 + $0x18] sm:$0xff] %v3279_v51  ;;  %v3295_v58 = vld [vmem:[#allocation2 + $0x38] sm:$0xff]  ;;  %p3107_p0 = pnand %p3106_p13, %p3100_p10 }
  0x27   :  { %5788 = vst [vmem:[#allocation22_spill] sm:$0xff] %v3246_v34  ;;  %378 = vmatpush1.msra.mxu0 %v3196_v10  ;;  %v949_v37 = vand.u32 4294901760, %v948_v31  ;;  %v956_v38 = vand.u32 4294901760, %v955_v32  ;;  %v3260_v42 = vsub.f32 %v3219_v21, %v5441_v29  ;;  %v3263_v43 = vsub.f32 %v343_v14, %v3225_v25  ;;  %276 = vst [vmem:[#allocation7 + $0x28] sm:$0xff] %v3281_v52  ;;  %v3301_v60 = vld [vmem:[#allocation2 + $0x48] sm:$0xff]  ;;  %v3303_v61 = vld [vmem:[#allocation2 + $0x58] sm:$0xff] }
  0x28   :  { %5789 = vst [vmem:[#allocation23_spill] sm:$0xff] %v3249_v35  ;;  %379 = vmatprep.subr.mxu0 %v5448_v0  ;;  %v963_v44 = vand.u32 4294901760, %v962_v33  ;;  %v3266_v45 = vand.u32 4294901760, %v340_v36  ;;  %v5439_v46 = vand.u32 4294901760, %v3246_v34  ;;  %v3270_v47 = vsub.f32 %v342_v19, %v3229_v28  ;;  %278 = vst [vmem:[#allocation7 + $0x38] sm:$0xff] %v3295_v58  ;;  %v3312_v2 = vld [vmem:[#allocation5 + $0x8] sm:$0xff] }
  0x29   :  { %5790 = vst [vmem:[#allocation24_spill] sm:$0xff] %v3263_v43  ;;  %381 = vmatpush1.msra.mxu0 %v3198_v11  ;;  %950 = vmatpush1.msra.mxu1 %v949_v37  ;;  %v3276_v49 = vand.u32 4294901760, %v339_v41  ;;  %v970_v53 = vand.u32 4294901760, %v969_v39  ;;  %v983_v54 = vsub.f32 %v3233_v30, %v5440_v40  ;;  %v5438_v55 = vand.u32 4294901760, %v3263_v43  ;;  %280 = vst [vmem:[#allocation7 + $0x48] sm:$0xff] %v3301_v60  ;;  %v3319_v7 = vld [vmem:[#allocation2 + $0x68] sm:$0xff] }
  0x2a   :  { %5791 = vst [vmem:[#allocation25_spill] sm:$0xff] %v3266_v45  ;;  %5792 = vst [vmem:[#allocation26_spill] sm:$0xff] %v3270_v47  ;;  %382 = vmatprep.subr.mxu0 %v5448_v0  ;;  %951 = vmatprep.subr.mxu1 %v5448_v0  ;;  %v3291_v57 = vsub.f32 %v341_v26, %v3249_v35  ;;  %v977_v59 = vand.u32 4294901760, %v3260_v42  ;;  %v990_v62 = vsub.f32 %v3246_v34, %v5439_v46  ;;  %v3327_v9 = vld [vmem:[#allocation2 + $0x78] sm:$0xff]  ;;  %v3329_v13 = vld [vmem:[#allocation2 + $0x88] sm:$0xff] }
  0x2b   :  { %5793 = vst [vmem:[#allocation27_spill] sm:$0xff] %v3276_v49  ;;  %384 = vmatpush1.msra.mxu0 %v3200_v12  ;;  %957 = vmatpush1.msra.mxu1 %v956_v38  ;;  %v3309_v63 = vand.u32 4294901760, %v338_v50  ;;  %v5437_v1 = vand.u32 4294901760, %v3270_v47  ;;  %v3315_v3 = vsub.f32 %v340_v36, %v3266_v45  ;;  %282 = vst [vmem:[#allocation7 + $0x58] sm:$0xff] %v3303_v61  ;;  %v3324_v8 = vand.u32 4294901760, %v3288_v56  ;;  %v3336_v31 = vld [vmem:[#allocation5] sm:$0xff] }
  0x2c   :  { %5794 = vst [vmem:[#allocation28_spill] sm:$0xff] %v3291_v57  ;;  %385 = vmatprep.subr.mxu0 %v5448_v0  ;;  %958 = vmatprep.subr.mxu1 %v5448_v0  ;;  %284 = vst [vmem:[#allocation7 + $0x68] sm:$0xff] %v3319_v7  ;;  %v984_v14 = vand.u32 4294901760, %v983_v54  ;;  %v997_v19 = vsub.f32 %v3263_v43, %v5438_v55  ;;  %v5443_v26 = vand.u32 4294901760, %v3291_v57  ;;  %v3343_v33 = vld [vmem:[#allocation2 + $0x98] sm:$0xff]  ;;  %v3348_v36 = vand.u32 4294901760, %v3312_v2 }
  0x2d   :  { %387 = vmatpush1.msra.mxu0 %v3209_v17  ;;  %964 = vmatpush1.msra.mxu1 %v963_v44  ;;  %5795 = vst [vmem:[#allocation29_spill] sm:$0xff] %v3309_v63  ;;  %5796 = vst [vmem:[#allocation30_spill] sm:$0xff] %v3315_v3  ;;  %v3339_v32 = vsub.f32 %v339_v41, %v3276_v49  ;;  %v3351_v37 = vld [vmem:[#allocation2 + $0xa8] sm:$0xff]  ;;  %v3353_v38 = vld [vmem:[#allocation2 + $0xb8] sm:$0xff]  ;;  %v991_v39 = vand.u32 4294901760, %v990_v62  ;;  %v1004_v41 = vsub.f32 %v3270_v47, %v5437_v1 }
  0x2e   :  { %388 = vmatprep.subr.mxu0 %v5448_v0  ;;  %965 = vmatprep.subr.mxu1 %v5448_v0  ;;  %5797 = vst [vmem:[#allocation31_spill] sm:$0xff] %v3324_v8  ;;  %286 = vst [vmem:[#allocation7 + $0x78] sm:$0xff] %v3327_v9  ;;  %v5446_v42 = vand.u32 4294901760, %v3315_v3  ;;  %v3360_v44 = vld [vmem:[#allocation5 + $0xf8] sm:$0xff]  ;;  %v3367_v54 = vld [vmem:[#allocation2 + $0xc8] sm:$0xff]  ;;  %v3379_v55 = vsub.f32 %v3291_v57, %v5443_v26  ;;  %v3386_v29 = vsub.f32 %v3288_v56, %v3324_v8 }
  0x2f   :  { %390 = vmatpush1.msra.mxu0 %v3225_v25  ;;  %971 = vmatpush1.msra.mxu1 %v970_v53  ;;  %5798 = vst [vmem:[#allocation32_spill] sm:$0xff] %v3339_v32  ;;  %288 = vst [vmem:[#allocation7 + $0x88] sm:$0xff] %v3329_v13  ;;  %v3363_v53 = vsub.f32 %v338_v50, %v3309_v63  ;;  %v170_v62 = vld [vmem:[#allocation2 + $0xd8] sm:$0xff]  ;;  %v172_v1 = vld [vmem:[#allocation2 + $0xe8] sm:$0xff]  ;;  %v998_v50 = vand.u32 4294901760, %v997_v19  ;;  %v5452_v46 = vand.u32 4294901760, %v3339_v32 }
  0x30   :  { %391 = vmatprep.subr.mxu0 %v5448_v0  ;;  %972 = vmatprep.subr.mxu1 %v5448_v0  ;;  %5799 = vst [vmem:[#allocation33_spill] sm:$0xff] %v3348_v36  ;;  %290 = vst [vmem:[#allocation7 + $0x98] sm:$0xff] %v3343_v33  ;;  %v3382_v40 = vld [vmem:[#allocation5 + $0xf0] sm:$0xff]  ;;  %v174_v27 = vld [vmem:[#allocation2 + $0xf8] sm:$0xff]  ;;  %v1005_v26 = vand.u32 4294901760, %v1004_v41  ;;  %v1018_v56 = vsub.f32 %v3315_v3, %v5446_v42  ;;  %v3402_v24 = vsub.f32 %v3312_v2, %v3348_v36  ;;  %v43_v41 = vlaneseq }
  0x31   :  { %393 = vmatpush1.msra.mxu0 %v3229_v28  ;;  %978 = vmatpush1.msra.mxu1 %v977_v59  ;;  %5800 = vst [vmem:[#allocation34_spill] sm:$0xff] %v3363_v53  ;;  %292 = vst [vmem:[#allocation7 + $0xa8] sm:$0xff] %v3351_v37  ;;  %v3372_v59 = vand.u32 4294901760, %v3336_v31  ;;  %v175_v19 = vld [vmem:[#allocation2 + $0x100] sm:$0xff]  ;;  %v177_v23 = vld [vmem:[#allocation2 + $0x110] sm:$0xff]  ;;  %v1012_v2 = vand.u32 4294901760, %v3379_v55 }
  0x32   :  { %294 = vst [vmem:[#allocation7 + $0xb8] sm:$0xff] %v3353_v38  ;;  %5801 = vst [vmem:[#allocation35_spill] sm:$0xff] %v3367_v54  ;;  %394 = vmatprep.subr.mxu0 %v5448_v0  ;;  %979 = vmatprep.subr.mxu1 %v5448_v0  ;;  %v181_v42 = vld [vmem:[#allocation2 + $0x130] sm:$0xff]  ;;  %v199_v17 = vld [vmem:[#allocation2 + $0x1c0] sm:$0xff] }
  0x33   :  { %5802 = vst [vmem:[#allocation36_spill] sm:$0xff] %v3372_v59  ;;  %296 = vst [vmem:[#allocation7 + $0xc8] sm:$0xff] %v3367_v54  ;;  %396 = vmatpush1.msra.mxu0 %v3249_v35  ;;  %985 = vmatpush1.msra.mxu1 %v984_v14  ;;  %v3391_v14 = vand.u32 4294901760, %v3360_v44  ;;  %v189_v3 = vld [vmem:[#allocation2 + $0x170] sm:$0xff] }
  0x34   :  { %5803 = vst [vmem:[#allocation37_spill] sm:$0xff] %v3386_v29  ;;  %298 = vst [vmem:[#allocation7 + $0xd8] sm:$0xff] %v170_v62  ;;  %397 = vmatprep.subr.mxu0 %v5448_v0  ;;  %986 = vmatprep.subr.mxu1 %v5448_v0  ;;  %v3398_v62 = vld [vmem:[#allocation5 + $0xe8] sm:$0xff]  ;;  %v353_v11 = vld [vmem:[#allocation5 + $0x90] sm:$0xff] }
  0x35   :  { %300 = vst [vmem:[#allocation7 + $0xe8] sm:$0xff] %v172_v1  ;;  %5804 = vst [vmem:[#allocation38_spill] sm:$0xff] %v3391_v14  ;;  %399 = vmatpush1.msra.mxu0 %v3266_v45  ;;  %992 = vmatpush1.msra.mxu1 %v991_v39  ;;  %v3407_v39 = vand.u32 4294901760, %v3382_v40  ;;  %v363_v1 = vld [vmem:[#allocation5 + $0xe0] sm:$0xff]  ;;  %v5808_v45 = vmov 0.0   ;;  %v3422_v55 = vand.u32 4294901760, %v3398_v62 }
  0x36   :  { %302 = vst [vmem:[#allocation7 + $0xf8] sm:$0xff] %v174_v27  ;;  %5805 = vst [vmem:[#allocation39_spill] sm:$0xff] %v3402_v24  ;;  %v179_v27 = vld [vmem:[#allocation2 + $0x120] sm:$0xff]  ;;  %400 = vmatprep.subr.mxu0 %v5448_v0  ;;  %993 = vmatprep.subr.mxu1 %v5448_v0  ;;  %v3417_v0 = vsub.f32 %v3336_v31, %v3372_v59  ;;  %v5810_v31 = vand.u32 4294901760, %v3363_v53  ;;  %v153_v54 = vld [vmem:[#allocation2 + $0x50] sm:$0xff] }
  0x37   :  { %303 = vst [vmem:[#allocation7 + $0x100] sm:$0xff] %v175_v19  ;;  %5806 = vst [vmem:[#allocation40_spill] sm:$0xff] %v3407_v39  ;;  %402 = vmatpush1.msra.mxu0 %v3276_v49  ;;  %999 = vmatpush1.msra.mxu1 %v998_v50  ;;  %v1025_v19 = vsub.f32 %v3339_v32, %v5452_v46  ;;  %v187_v50 = vld [vmem:[#allocation2 + $0x160] sm:$0xff]  ;;  %v1019_v46 = vand.u32 4294901760, %v1018_v56  ;;  %v362_v49 = vld [vmem:[#allocation5 + $0xd8] sm:$0xff]  ;;  %v3431_v32 = vsub.f32 %v3360_v44, %v3391_v14 }
  0x38   :  { %305 = vst [vmem:[#allocation7 + $0x110] sm:$0xff] %v177_v23  ;;  %307 = vst [vmem:[#allocation7 + $0x120] sm:$0xff] %v179_v27  ;;  %v183_v23 = vld [vmem:[#allocation2 + $0x140] sm:$0xff]  ;;  %v185_v27 = vld [vmem:[#allocation2 + $0x150] sm:$0xff]  ;;  %403 = vmatprep.subr.mxu0 %v5808_v45  ;;  %1000 = vmatprep.subr.mxu1 %v5808_v45  ;;  %v3437_v56 = vshrl.u32 %v43_v41, 7  ;;  %v3448_v35 = vsub.f32 %v3382_v40, %v3407_v39  ;;  %v3461_v40 = vsub.f32 %v3398_v62, %v3422_v55 }
  0x39   :  { %5807 = vst [vmem:[#allocation41_spill] sm:$0xff] %v3417_v0  ;;  %309 = vst [vmem:[#allocation7 + $0x130] sm:$0xff] %v181_v42  ;;  %405 = vmatpush1.msra.mxu0 %v3309_v63  ;;  %1006 = vmatpush1.msra.mxu1 %v1005_v26  ;;  %v1032_v42 = vsub.f32 %v3363_v53, %v5810_v31  ;;  %v3435_v26 = vand.u32 4294901760, %v363_v1  ;;  %v193_v31 = vld [vmem:[#allocation2 + $0x190] sm:$0xff]  ;;  %v1026_v44 = vand.u32 4294901760, %v1025_v19  ;;  %v5816_v19 = vand.u32 4294901760, %v3402_v24 }
  0x3a   :  { %5809 = vst [vmem:[#allocation42_spill] sm:$0xff] %v3422_v55  ;;  %311 = vst [vmem:[#allocation7 + $0x140] sm:$0xff] %v183_v23  ;;  %v191_v23 = vld [vmem:[#allocation2 + $0x180] sm:$0xff]  ;;  %406 = vmatprep.subr.mxu0 %v5808_v45  ;;  %1007 = vmatprep.subr.mxu1 %v5808_v45  ;;  %v361_v53 = vld [vmem:[#allocation5 + $0xd0] sm:$0xff]  ;;  %v3541_v25 = vadd.s32 56, %v3437_v56 }
  0x3b   :  { %313 = vst [vmem:[#allocation7 + $0x150] sm:$0xff] %v185_v27  ;;  %5811 = vst [vmem:[#allocation43_spill] sm:$0xff] %v3431_v32  ;;  %v3439_v27 = vand.u32 127, %v43_v41  ;;  %408 = vmatpush1.msra.mxu0 %v3324_v8  ;;  %1013 = vmatpush1.msra.mxu1 %v1012_v2  ;;  %v360_v41 = vld [vmem:[#allocation5 + $0xc8] sm:$0xff]  ;;  %v1033_v2 = vand.u32 4294901760, %v1032_v42  ;;  %v3468_v63 = vsub.f32 %v363_v1, %v3435_v26  ;;  %v45_v42 = vadd.s32 8, %v3437_v56 }
  0x3c   :  { %315 = vst [vmem:[#allocation7 + $0x160] sm:$0xff] %v187_v50  ;;  %5812 = vst [vmem:[#allocation44_spill] sm:$0xff] %v3435_v26  ;;  %v5813_v50 = vand.u32 4294901760, %v3386_v29  ;;  %409 = vmatprep.subr.mxu0 %v5808_v45  ;;  %1014 = vmatprep.subr.mxu1 %v5808_v45  ;;  %v3478_v8 = vand.u32 4294901760, %v360_v41  ;;  %v359_v1 = vld [vmem:[#allocation5 + $0xc0] sm:$0xff] }
  0x3d   :  { %317 = vst [vmem:[#allocation7 + $0x170] sm:$0xff] %v189_v3  ;;  %319 = vst [vmem:[#allocation7 + $0x180] sm:$0xff] %v191_v23  ;;  %v3452_v3 = vand.u32 4294901760, %v362_v49  ;;  %411 = vmatpush1.msra.mxu0 %v3348_v36  ;;  %1020 = vmatpush1.msra.mxu1 %v1019_v46  ;;  %v1046_v23 = vsub.f32 %v3402_v24, %v5816_v19  ;;  %vm79_vm0 = vcmp.eq.s32.totalorder %v3437_v56, %v3439_v27  ;;  %v143_v46 = vld [vmem:[#allocation2] sm:$0xff] }
  0x3e   :  { %v1039_v22 = vsub.f32 %v3386_v29, %v5813_v50  ;;  %5814 = vst [vmem:[#allocation45_spill] sm:$0xff] %v3448_v35  ;;  %321 = vst [vmem:[#allocation7 + $0x190] sm:$0xff] %v193_v31  ;;  %412 = vmatprep.subr.mxu0 %v5808_v45  ;;  %1021 = vmatprep.subr.mxu1 %v5808_v45  ;;  %v3465_v31 = vand.u32 4294901760, %v361_v53  ;;  %v195_v19 = vld [vmem:[#allocation2 + $0x1a0] sm:$0xff]  ;;  %v5820_v50 = vand.u32 4294901760, %v3417_v0  ;;  %v358_v29 = vld [vmem:[#allocation5 + $0xb8] sm:$0xff] }
  0x3f   :  { %5815 = vst [vmem:[#allocation46_spill] sm:$0xff] %v3452_v3  ;;  %5817 = vst [vmem:[#allocation47_spill] sm:$0xff] %v3461_v40  ;;  %414 = vmatpush1.msra.mxu0 %v3372_v59  ;;  %1027 = vmatpush1.msra.mxu1 %v1026_v44  ;;  %v3483_v57 = vsub.f32 %v362_v49, %v3452_v3  ;;  %v3489_v44 = vadd.s32 24, %v3437_v56  ;;  %v5823_v24 = vand.u32 4294901760, %v3431_v32  ;;  %v3502_v28 = vsel %vm79_vm0, 0.0, %v143_v46 }
  0x40   :  { %5818 = vst [vmem:[#allocation48_spill] sm:$0xff] %v3465_v31  ;;  %5819 = vst [vmem:[#allocation49_spill] sm:$0xff] %v3468_v63  ;;  %v1040_v62 = vand.u32 4294901760, %v1039_v22  ;;  %v1053_v36 = vsub.f32 %v3417_v0, %v5820_v50  ;;  %415 = vmatprep.subr.mxu0 %v5808_v45  ;;  %1028 = vmatprep.subr.mxu1 %v5808_v45  ;;  %v3486_v22 = vadd.s32 16, %v3437_v56  ;;  %v3492_v50 = vadd.s32 32, %v3437_v56  ;;  %v357_v0 = vld [vmem:[#allocation5 + $0xb0] sm:$0xff] }
  0x41   :  { %5821 = vst [vmem:[#allocation50_spill] sm:$0xff] %v3478_v8  ;;  %323 = vst [vmem:[#allocation7 + $0x1a0] sm:$0xff] %v195_v19  ;;  %417 = vmatpush2.msra.mxu0 %v3391_v14  ;;  %1034 = vmatpush1.msra.mxu1 %v1033_v2  ;;  %v1047_v19 = vand.u32 4294901760, %v1046_v23  ;;  %v1060_v59 = vsub.f32 %v3431_v32, %v5823_v24  ;;  %v3506_v47 = vand.u32 4294901760, %v359_v1  ;;  %v197_v24 = vld [vmem:[#allocation2 + $0x1b0] sm:$0xff]  ;;  %v5826_v49 = vand.u32 4294901760, %v3448_v35 }
  0x42   :  { %5822 = vst [vmem:[#allocation51_spill] sm:$0xff] %v3483_v57  ;;  %418 = vmatprep.subr.mxu0 %v5808_v45  ;;  %1035 = vmatprep.subr.mxu1 %v5808_v45  ;;  %v3510_v23 = vsub.f32 %v361_v53, %v3465_v31  ;;  %271 = vst [vmem:[#allocation7] sm:$0xff] %v3502_v28  ;;  %vm81_vm1 = vcmp.eq.s32.totalorder %v45_v42, %v3439_v27  ;;  %v1054_v46 = vand.u32 4294901760, %v1053_v36  ;;  %v145_v53 = vld [vmem:[#allocation2 + $0x10] sm:$0xff]  ;;  %v356_v36 = vld [vmem:[#allocation5 + $0xa8] sm:$0xff] }
  0x43   :  { %5824 = vst [vmem:[#allocation52_spill] sm:$0xff] %v3506_v47  ;;  %420 = vmatpush2.msra.mxu0 %v3407_v39  ;;  %1041 = vmatpush1.msra.mxu1 %v1040_v62  ;;  %v1067_v14 = vsub.f32 %v3448_v35, %v5826_v49  ;;  %v3518_v32 = vand.u32 4294901760, %v358_v29  ;;  %v3521_v2 = vsub.f32 %v360_v41, %v3478_v8  ;;  %325 = vst [vmem:[#allocation7 + $0x1b0] sm:$0xff] %v197_v24 }
  0x44   :  { %5825 = vst [vmem:[#allocation53_spill] sm:$0xff] %v3510_v23  ;;  %421 = vmatprep.subr.mxu0 %v5808_v45  ;;  %1042 = vmatprep.subr.mxu1 %v5808_v45  ;;  %v3526_v39 = vand.u32 4294901760, %v357_v0  ;;  %v3529_v62 = vadd.s32 40, %v3437_v56  ;;  %v3532_v49 = vadd.s32 48, %v3437_v56  ;;  %v1061_v41 = vand.u32 4294901760, %v1060_v59  ;;  %327 = vst [vmem:[#allocation7 + $0x1c0] sm:$0xff] %v199_v17 }
  0x45   :  { %5827 = vst [vmem:[#allocation54_spill] sm:$0xff] %v3518_v32  ;;  %5828 = vst [vmem:[#allocation55_spill] sm:$0xff] %v3521_v2  ;;  %423 = vmatpush2.msra.mxu0 %v3422_v55  ;;  %1048 = vmatpush1.msra.mxu1 %v1047_v19  ;;  %v5830_v24 = vand.u32 4294901760, %v3461_v40  ;;  %vm83_vm2 = vcmp.eq.s32.totalorder %v3486_v22, %v3439_v27  ;;  %v5831_v43 = vand.u32 4294901760, %v3468_v63  ;;  %v5517_v59 = vand.u32 4294901760, %v3510_v23  ;;  %v355_v19 = vld [vmem:[#allocation5 + $0xa0] sm:$0xff] }
  0x46   :  { %5829 = vst [vmem:[#allocation56_spill] sm:$0xff] %v3526_v39  ;;  %424 = vmatprep.subr.mxu0 %v5808_v45  ;;  %1049 = vmatprep.subr.mxu1 %v5808_v45  ;;  %v1068_v34 = vand.u32 4294901760, %v1067_v14  ;;  %v3559_v12 = vand.u32 4294901760, %v356_v36  ;;  %v5834_v42 = vand.u32 4294901760, %v3483_v57  ;;  %v3574_v14 = vsub.f32 %v357_v0, %v3526_v39 }
  0x47   :  { %v1074_v35 = vsub.f32 %v3461_v40, %v5830_v24  ;;  %v3548_v55 = vsub.f32 %v3468_v63, %v5831_v43  ;;  %v3552_v24 = vsub.f32 %v359_v1, %v3506_v47  ;;  %v3556_v40 = vsel %vm81_vm1, 0.0, %v145_v53  ;;  %426 = vmatpush2.msra.mxu0 %v3435_v26  ;;  %1055 = vmatpush1.msra.mxu1 %v1054_v46  ;;  %v147_v46 = vld [vmem:[#allocation2 + $0x20] sm:$0xff]  ;;  %v354_v43 = vld [vmem:[#allocation5 + $0x98] sm:$0xff] }
  0x48   :  { %v3563_v63 = vsub.f32 %v358_v29, %v3518_v32  ;;  %273 = vst [vmem:[#allocation7 + $0x10] sm:$0xff] %v3556_v40  ;;  %427 = vmatprep.subr.mxu0 %v5808_v45  ;;  %1056 = vmatprep.subr.mxu1 %v5808_v45  ;;  %v3571_v1 = vsub.f32 %v3483_v57, %v5834_v42  ;;  %5835 = vst [vmem:[#allocation59_spill] sm:$0xff] %v3574_v14  ;;  %v3579_v29 = vadd.s32 64, %v3437_v56  ;;  %v201_v57 = vld [vmem:[#allocation2 + $0x1d0] sm:$0xff] }
  0x49   :  { %5832 = vst [vmem:[#allocation57_spill] sm:$0xff] %v3552_v24  ;;  %vm85_vm3 = vcmp.eq.s32.totalorder %v3489_v44, %v3439_v27  ;;  %429 = vmatpush2.msra.mxu0 %v3452_v3  ;;  %1062 = vmatpush2.msra.mxu1 %v1061_v41  ;;  %v1075_v17 = vand.u32 4294901760, %v1074_v35  ;;  %v3582_v53 = vand.u32 4294901760, %v355_v19  ;;  %v3585_v42 = vand.u32 4294901760, %v3272_v48  ;;  %v149_v3 = vld [vmem:[#allocation2 + $0x30] sm:$0xff]  ;;  %329 = vst [vmem:[#allocation7 + $0x1d0] sm:$0xff] %v201_v57 }
  0x4a   :  { %5833 = vst [vmem:[#allocation58_spill] sm:$0xff] %v3563_v63  ;;  %vm87_vm4 = vcmp.eq.s32.totalorder %v3492_v50, %v3439_v27  ;;  %430 = vmatprep.subr.mxu0 %v5808_v45  ;;  %1063 = vmatprep.subr.mxu1 %v5808_v45  ;;  %v1082_v0 = vand.u32 4294901760, %v3548_v55  ;;  %v3595_v41 = vsub.f32 %v3510_v23, %v5517_v59  ;;  %v5837_v26 = vand.u32 4294901760, %v3521_v2 }
  0x4b   :  { %5836 = vst [vmem:[#allocation60_spill] sm:$0xff] %v3585_v42  ;;  %vm89_vm5 = vcmp.eq.s32.totalorder %v3529_v62, %v3439_v27  ;;  %432 = vmatpush2.msra.mxu0 %v3465_v31  ;;  %1069 = vmatpush2.msra.mxu1 %v1068_v34  ;;  %v3608_v59 = vsub.f32 %v356_v36, %v3559_v12  ;;  %v3613_v35 = vsel %vm83_vm2, 0.0, %v147_v46  ;;  %v1089_v34 = vand.u32 4294901760, %v3571_v1  ;;  %v151_v36 = vld [vmem:[#allocation2 + $0x40] sm:$0xff] }
  0x4c   :  { %v3604_v30 = vsub.f32 %v3521_v2, %v5837_v26  ;;  %vm91_vm6 = vcmp.eq.s32.totalorder %v3532_v49, %v3439_v27  ;;  %433 = vmatprep.subr.mxu0 %v5808_v45  ;;  %1070 = vmatprep.subr.mxu1 %v5808_v45  ;;  %v3620_v26 = vand.u32 4294901760, %v354_v43  ;;  %v3624_v55 = vand.u32 4294901760, %v3502_v28  ;;  %275 = vst [vmem:[#allocation7 + $0x20] sm:$0xff] %v3613_v35  ;;  %v351_v31 = vld [vmem:[#allocation5 + $0x80] sm:$0xff] }
  0x4d   :  { %5838 = vst [vmem:[#allocation61_spill] sm:$0xff] %v3608_v59  ;;  %435 = vmatpush2.msra.mxu0 %v3478_v8  ;;  %1076 = vmatpush2.msra.mxu1 %v1075_v17  ;;  %v3630_v57 = vsub.f32 %v3272_v48, %v3585_v42  ;;  %v3633_v22 = vsub.f32 %v355_v19, %v3582_v53  ;;  %v3636_v1 = vand.u32 4294901760, %v3279_v51  ;;  %v3641_v46 = vsel %vm85_vm3, 0.0, %v149_v3  ;;  %v203_v3 = vld [vmem:[#allocation2 + $0x1e0] sm:$0xff] }
  0x4e   :  { %5839 = vst [vmem:[#allocation62_spill] sm:$0xff] %v3620_v26  ;;  %5840 = vst [vmem:[#allocation63_spill] sm:$0xff] %v3624_v55  ;;  %436 = vmatprep.subr.mxu0 %v5808_v45  ;;  %1077 = vmatprep.subr.mxu1 %v5808_v45  ;;  %v1096_v17 = vand.u32 4294901760, %v3595_v41  ;;  %v5843_v48 = vand.u32 4294901760, %v3552_v24  ;;  %v3651_v8 = vand.u32 4294901760, %v353_v11  ;;  %vm93_vm7 = vcmp.eq.s32.totalorder %v3541_v25, %v3439_v27 }
  0x4f   :  { %5841 = vst [vmem:[#allocation64_spill] sm:$0xff] %v3630_v57  ;;  %5842 = vst [vmem:[#allocation65_spill] sm:$0xff] %v3636_v1  ;;  %438 = vmatpush2.msra.mxu0 %v3506_v47  ;;  %1083 = vmatpush2.msra.mxu1 %v1082_v0  ;;  %v1103_v44 = vand.u32 4294901760, %v3604_v30  ;;  %v5845_v41 = vand.u32 4294901760, %v3563_v63  ;;  %v3665_v23 = vand.u32 4294901760, %v3556_v40  ;;  %v5847_v30 = vand.u32 4294901760, %v3574_v14 }
  0x50   :  { %v3649_v19 = vsub.f32 %v3552_v24, %v5843_v48  ;;  %5844 = vst [vmem:[#allocation66_spill] sm:$0xff] %v3651_v8  ;;  %277 = vst [vmem:[#allocation7 + $0x30] sm:$0xff] %v3641_v46  ;;  %v352_v48 = vld [vmem:[#allocation5 + $0x88] sm:$0xff]  ;;  %439 = vmatprep.subr.mxu0 %v5808_v45  ;;  %1084 = vmatprep.subr.mxu1 %v5808_v45  ;;  %v3679_v24 = vsub.f32 %v354_v43, %v3620_v26  ;;  %v3696_v43 = vand.u32 4294901760, %v3281_v52 }
  0x51   :  { %v3661_v2 = vsub.f32 %v3563_v63, %v5845_v41  ;;  %5846 = vst [vmem:[#allocation67_spill] sm:$0xff] %v3665_v23  ;;  %331 = vst [vmem:[#allocation7 + $0x1e0] sm:$0xff] %v203_v3  ;;  %v3672_v0 = vsub.f32 %v3574_v14, %v5847_v30  ;;  %v3676_v41 = vsub.f32 %v3502_v28, %v3624_v55  ;;  %v3684_v3 = vsel %vm87_vm4, 0.0, %v151_v36  ;;  %v205_v14 = vld [vmem:[#allocation2 + $0x1f0] sm:$0xff] }
  0x52   :  { %5849 = vst [vmem:[#allocation69_spill] sm:$0xff] %v3679_v24  ;;  %vm95_vm8 = vcmp.eq.s32.totalorder %v3579_v29, %v3439_v27  ;;  %441 = vmatpush2.msra.mxu0 %v3518_v32  ;;  %1090 = vmatpush2.msra.mxu1 %v1089_v34  ;;  %v3693_v28 = vsub.f32 %v3279_v51, %v3636_v1  ;;  %5851 = vst [vmem:[#allocation71_spill] sm:$0xff] %v3696_v43  ;;  %v1110_v50 = vand.u32 4294901760, %v3649_v19 }
  0x53   :  { %5848 = vst [vmem:[#allocation68_spill] sm:$0xff] %v3676_v41  ;;  %279 = vst [vmem:[#allocation7 + $0x40] sm:$0xff] %v3684_v3  ;;  %442 = vmatprep.subr.mxu0 %v5808_v45  ;;  %1091 = vmatprep.subr.mxu1 %v5808_v45  ;;  %v3702_v34 = vand.u32 4294901760, %v352_v48  ;;  %v3704_v36 = vand.u32 4294901760, %v351_v31  ;;  %v3709_v51 = vsel %vm89_vm5, 0.0, %v153_v54  ;;  %v5853_v30 = vand.u32 4294901760, %v3608_v59 }
  0x54   :  { %5850 = vst [vmem:[#allocation70_spill] sm:$0xff] %v3693_v28  ;;  %444 = vmatpush2.msra.mxu0 %v3526_v39  ;;  %1097 = vmatpush2.msra.mxu1 %v1096_v17  ;;  %v3718_v19 = vsub.f32 %v353_v11, %v3651_v8  ;;  %v3722_v63 = vsub.f32 %v3556_v40, %v3665_v23  ;;  %v3725_v62 = vand.u32 4294901760, %v3613_v35  ;;  %281 = vst [vmem:[#allocation7 + $0x50] sm:$0xff] %v3709_v51  ;;  %v155_v54 = vld [vmem:[#allocation2 + $0x60] sm:$0xff]  ;;  %v157_v40 = vld [vmem:[#allocation2 + $0x70] sm:$0xff] }
  0x55   :  { %5852 = vst [vmem:[#allocation72_spill] sm:$0xff] %v3702_v34  ;;  %v3715_v32 = vsub.f32 %v3608_v59, %v5853_v30  ;;  %333 = vst [vmem:[#allocation7 + $0x1f0] sm:$0xff] %v205_v14  ;;  %445 = vmatprep.subr.mxu0 %v5808_v45  ;;  %1098 = vmatprep.subr.mxu1 %v5808_v45  ;;  %v1117_v17 = vand.u32 4294901760, %v3661_v2  ;;  %v1124_v11 = vand.u32 4294901760, %v3672_v0  ;;  %v5857_v59 = vand.u32 4294901760, %v3630_v57  ;;  %v159_v30 = vld [vmem:[#allocation2 + $0x80] sm:$0xff] }
  0x56   :  { %5854 = vst [vmem:[#allocation73_spill] sm:$0xff] %v3718_v19  ;;  %5855 = vst [vmem:[#allocation74_spill] sm:$0xff] %v3722_v63  ;;  %447 = vmatpush2.msra.mxu0 %v3559_v12  ;;  %1104 = vmatpush2.msra.mxu1 %v1103_v44  ;;  %v5858_v14 = vand.u32 4294901760, %v3633_v22  ;;  %v3748_v0 = vsub.f32 %v3281_v52, %v3696_v43  ;;  %v3753_v44 = vsub.f32 %v352_v48, %v3702_v34 }
  0x57   :  { %5856 = vst [vmem:[#allocation75_spill] sm:$0xff] %v3725_v62  ;;  %v3738_v39 = vsub.f32 %v3630_v57, %v5857_v59  ;;  %448 = vmatprep.subr.mxu0 %v5808_v45  ;;  %1105 = vmatprep.subr.mxu1 %v5808_v45  ;;  %v3756_v59 = vsub.f32 %v351_v31, %v3704_v36  ;;  %v3764_v2 = vsel %vm91_vm6, 0.0, %v155_v54  ;;  %v1131_v52 = vand.u32 4294901760, %v3715_v32 }
  0x58   :  { %v3743_v47 = vsub.f32 %v3633_v22, %v5858_v14  ;;  %5859 = vst [vmem:[#allocation76_spill] sm:$0xff] %v3748_v0  ;;  %v3759_v14 = vand.u32 4294901760, %v3295_v58  ;;  %450 = vmatpush2.msra.mxu0 %v3582_v53  ;;  %1111 = vmatpush2.msra.mxu1 %v1110_v50  ;;  %v3772_v31 = vsub.f32 %v3613_v35, %v3725_v62  ;;  %283 = vst [vmem:[#allocation7 + $0x60] sm:$0xff] %v3764_v2 }
  0x59   :  { %451 = vmatprep.subr.mxu0 %v5808_v45  ;;  %1112 = vmatprep.subr.mxu1 %v5808_v45  ;;  %v5861_v49 = vand.u32 4294901760, %v3676_v41  ;;  %v5862_v32 = vand.u32 4294901760, %v3679_v24  ;;  %v3786_v48 = vand.u32 4294901760, %v3641_v46  ;;  %v3791_v35 = vsel %vm93_vm7, 0.0, %v157_v40 }
  0x5a   :  { %5860 = vst [vmem:[#allocation77_spill] sm:$0xff] %v3759_v14  ;;  %453 = vmatpush2.msra.mxu0 %v3620_v26  ;;  %1118 = vmatpush2.msra.mxu1 %v1117_v17  ;;  %v1138_v57 = vand.u32 4294901760, %v3743_v47  ;;  %285 = vst [vmem:[#allocation7 + $0x70] sm:$0xff] %v3791_v35  ;;  %v467_v25 = vand.u32 4294901760, %v3738_v39  ;;  %v5562_v17 = vand.u32 4294901760, %v3753_v44  ;;  %v3810_v40 = vsub.f32 %v3295_v58, %v3759_v14 }
  0x5b   :  { %v472_v50 = vsub.f32 %v3676_v41, %v5861_v49  ;;  %v3783_v54 = vsub.f32 %v3679_v24, %v5862_v32  ;;  %5863 = vst [vmem:[#allocation78_spill] sm:$0xff] %v3786_v48  ;;  %v5864_v49 = vand.u32 4294901760, %v3693_v28  ;;  %v3800_v24 = vand.u32 4294901760, %v3301_v60  ;;  %454 = vmatprep.subr.mxu0 %v5808_v45  ;;  %1119 = vmatprep.subr.mxu1 %v5808_v45 }
  0x5c   :  { %456 = vmatpush2.msra.mxu0 %v3651_v8  ;;  %1125 = vmatpush2.msra.mxu1 %v1124_v11  ;;  %v3823_v47 = vsel %vm95_vm8, 0.0, %v159_v30  ;;  %v5869_v30 = vand.u32 4294901760, %v3748_v0  ;;  %v5873_v8 = vand.u32 4294901760, %v3772_v31 }
  0x5d   :  { %v481_v41 = vsub.f32 %v3693_v28, %v5864_v49  ;;  %5865 = vst [vmem:[#allocation79_spill] sm:$0xff] %v3800_v24  ;;  %v5866_v49 = vand.u32 4294901760, %v3718_v19  ;;  %v5867_v28 = vand.u32 4294901760, %v3722_v63  ;;  %457 = vmatprep.subr.mxu0 %v5808_v45  ;;  %1126 = vmatprep.subr.mxu1 %v5808_v45  ;;  %v473_v58 = vand.u32 4294901760, %v472_v50  ;;  %287 = vst [vmem:[#allocation7 + $0x80] sm:$0xff] %v3823_v47 }
  0x5e   :  { %v1145_v11 = vand.u32 4294901760, %v3783_v54  ;;  %459 = vmatpush2.msra.mxu0 %v3702_v34  ;;  %1132 = vmatpush2.msra.mxu1 %v1131_v52  ;;  %v496_v39 = vsub.f32 %v3748_v0, %v5869_v30  ;;  %v3842_v50 = vsub.f32 %v3301_v60, %v3800_v24  ;;  %v161_v54 = vld [vmem:[#allocation2 + $0x90] sm:$0xff]  ;;  %v1158_v52 = vsub.f32 %v3753_v44, %v5562_v17 }
  0x5f   :  { %v1151_v32 = vsub.f32 %v3718_v19, %v5866_v49  ;;  %v487_v26 = vsub.f32 %v3722_v63, %v5867_v28  ;;  %v3830_v49 = vsub.f32 %v3641_v46, %v3786_v48  ;;  %v3833_v28 = vand.u32 4294901760, %v3684_v3  ;;  %460 = vmatprep.subr.mxu0 %v5808_v45  ;;  %1133 = vmatprep.subr.mxu1 %v5808_v45 }
  0x60   :  { %v482_v29 = vand.u32 4294901760, %v481_v41  ;;  %5870 = vst [vmem:[#allocation81_spill] sm:$0xff] %v3842_v50  ;;  %v53_v46 = vadd.s32 72, %v3437_v56  ;;  %v5871_v41 = vand.u32 4294901760, %v3756_v59  ;;  %v3855_v60 = vand.u32 4294901760, %v3303_v61  ;;  %462 = vmatpush2.msra.mxu0 %v3704_v36  ;;  %468 = vmatprep.mubr.f32.mxu0 %v467_v25 }
  0x61   :  { %5868 = vst [vmem:[#allocation80_spill] sm:$0xff] %v3833_v28  ;;  %v1152_v0 = vand.u32 4294901760, %v1151_v32  ;;  %v488_v34 = vand.u32 4294901760, %v487_v26  ;;  %v502_v19 = vsub.f32 %v3772_v31, %v5873_v8  ;;  %1139 = vmatpush2.msra.mxu1 %v1138_v57  ;;  %474 = vmatmul.mubr.f32.vlgmr.msra.gmra.mxu0 %v473_v58  ;;  %v3865_v17 = vsub.f32 %v3684_v3, %v3833_v28  ;;  %v163_v3 = vld [vmem:[#allocation2 + $0xa0] sm:$0xff] }
  0x62   :  { %v1165_v63 = vsub.f32 %v3756_v59, %v5871_v41  ;;  %5872 = vst [vmem:[#allocation82_spill] sm:$0xff] %v3855_v60  ;;  %vm97_vm9 = vcmp.eq.s32.totalorder %v53_v46, %v3439_v27  ;;  %v3868_v30 = vand.u32 4294901760, %v3709_v51  ;;  %1140 = vmatprep.subr.mxu1 %v5808_v45  ;;  %483 = vmatprep.mubr.f32.mxu0 %v482_v29  ;;  %v497_v26 = vand.u32 4294901760, %v496_v39 }
  0x63   :  { %v3870_v25 = vsel %vm97_vm9, 0.0, %v161_v54  ;;  %v3875_v57 = vand.u32 4294901760, %v3319_v7  ;;  %v54_v32 = vadd.s32 80, %v3437_v56  ;;  %1146 = vmatpush2.msra.mxu1 %v1145_v11  ;;  %v1159_v58 = vand.u32 4294901760, %v1158_v52  ;;  %1393 = vmatprep.subr.mxu0 %v5808_v45  ;;  %v165_v11 = vld [vmem:[#allocation2 + $0xb0] sm:$0xff] }
  0x64   :  { %5874 = vst [vmem:[#allocation83_spill] sm:$0xff] %v3868_v30  ;;  %289 = vst [vmem:[#allocation7 + $0x90] sm:$0xff] %v3870_v25  ;;  %v1166_v46 = vand.u32 4294901760, %v1165_v63  ;;  %v5876_v54 = vand.u32 4294901760, %v3810_v40  ;;  %v3885_v39 = vsub.f32 %v3303_v61, %v3855_v60  ;;  %1147 = vmatprep.subr.mxu1 %v5808_v45  ;;  %1169 = vmatprep.mubr.f32.mxu1 %v3585_v42  ;;  %v503_v8 = vand.u32 4294901760, %v502_v19 }
  0x65   :  { %5875 = vst [vmem:[#allocation84_spill] sm:$0xff] %v3875_v57  ;;  %v3890_v41 = vand.u32 4294901760, %v3764_v2  ;;  %vm99_vm10 = vcmp.eq.s32.totalorder %v54_v32, %v3439_v27  ;;  %v55_v63 = vadd.s32 88, %v3437_v56  ;;  %1153 = vmatpush2.msra.mxu1 %v1152_v0  ;;  %489 = vmatmul.mubr.f32.gmra.mxu0 %v488_v34  ;;  %v5879_v52 = vand.u32 4294901760, %v3830_v49 }
  0x66   :  { %v511_v29 = vsub.f32 %v3810_v40, %v5876_v54  ;;  %5877 = vst [vmem:[#allocation85_spill] sm:$0xff] %v3885_v39  ;;  %v3900_v42 = vsub.f32 %v3709_v51, %v3868_v30  ;;  %v3902_v19 = vsel %vm99_vm10, 0.0, %v163_v3  ;;  %1154 = vmatprep.subr.mxu1 %v5808_v45  ;;  %498 = vmatprep.mubr.f32.mxu0 %v497_v26  ;;  %v5881_v32 = vand.u32 4294901760, %v3842_v50  ;;  %v167_v54 = vld [vmem:[#allocation2 + $0xc0] sm:$0xff] }
  0x67   :  { %5878 = vst [vmem:[#allocation86_spill] sm:$0xff] %v3890_v41  ;;  %v517_v61 = vsub.f32 %v3830_v49, %v5879_v52  ;;  %v3910_v34 = vsub.f32 %v3319_v7, %v3875_v57  ;;  %v3913_v52 = vand.u32 4294901760, %v3327_v9  ;;  %291 = vst [vmem:[#allocation7 + $0xa0] sm:$0xff] %v3902_v19  ;;  %vm101_vm11 = vcmp.eq.s32.totalorder %v55_v63, %v3439_v27 }
  0x68   :  { %5880 = vst [vmem:[#allocation87_spill] sm:$0xff] %v3900_v42  ;;  %v526_v0 = vsub.f32 %v3842_v50, %v5881_v32  ;;  %1160 = vmatpush2.msra.mxu1 %v1159_v58  ;;  %1396 = vmatpush1.msra.mxu0 %v3204_v15  ;;  %v512_v51 = vand.u32 4294901760, %v511_v29  ;;  %v3919_v3 = vsel %vm101_vm11, 0.0, %v165_v11  ;;  %v56_v32 = vadd.s32 96, %v3437_v56 }
  0x69   :  { %5882 = vst [vmem:[#allocation88_spill] sm:$0xff] %v3910_v34  ;;  %5883 = vst [vmem:[#allocation89_spill] sm:$0xff] %v3913_v52  ;;  %1161 = vmatprep.subr.mxu1 %v5808_v45  ;;  %1397 = vmatprep.subr.mxu0 %v5808_v45  ;;  %v3926_v7 = vsub.f32 %v3764_v2, %v3890_v41  ;;  %v3929_v58 = vand.u32 4294901760, %v3791_v35  ;;  %v518_v29 = vand.u32 4294901760, %v517_v61  ;;  %v5886_v63 = vand.u32 4294901760, %v3865_v17 }
  0x6a   :  { %293 = vst [vmem:[#allocation7 + $0xb0] sm:$0xff] %v3919_v3  ;;  %1167 = vmatpush2.msra.mxu1 %v1166_v46  ;;  %504 = vmatmul.mubr.f32.gmra.mxu0 %v503_v8  ;;  %v5571_v26 = vand.u32 4294901760, %v3900_v42  ;;  %vm103_vm12 = vcmp.eq.s32.totalorder %v56_v32, %v3439_v27  ;;  %v3942_v50 = vsub.f32 %v3327_v9, %v3913_v52  ;;  %v527_v46 = vand.u32 4294901760, %v526_v0 }
  0x6b   :  { %5884 = vst [vmem:[#allocation90_spill] sm:$0xff] %v3926_v7  ;;  %5885 = vst [vmem:[#allocation91_spill] sm:$0xff] %v3929_v58  ;;  %v532_v11 = vsub.f32 %v3865_v17, %v5886_v63  ;;  %1171 = vmatmul.mubr.f32.vlgmr.msra.gmra.mxu1 %v3624_v55  ;;  %1810 = vmatprep.subr.mxu1 %v5808_v45  ;;  %v3944_v8 = vsel %vm103_vm12, 0.0, %v167_v54  ;;  %v5888_v61 = vand.u32 4294901760, %v3885_v39  ;;  %v3951_v63 = vand.u32 4294901760, %v3329_v13 }
  0x6c   :  { %5887 = vst [vmem:[#allocation92_spill] sm:$0xff] %v3942_v50  ;;  %1812 = vmatpush1.msra.mxu1 %v3190_v4  ;;  %513 = vmatprep.mubr.f32.mxu0 %v512_v51  ;;  %295 = vst [vmem:[#allocation7 + $0xc0] sm:$0xff] %v3944_v8  ;;  %v3959_v54 = vsub.f32 %v3791_v35, %v3929_v58  ;;  %v57_v0 = vadd.s32 104, %v3437_v56  ;;  %v169_v51 = vld [vmem:[#allocation2 + $0xd0] sm:$0xff]  ;;  %v547_v2 = vsub.f32 %v3900_v42, %v5571_v26  ;;  %v171_v26 = vld [vmem:[#allocation2 + $0xe0] sm:$0xff] }
  0x6d   :  { %v541_v32 = vsub.f32 %v3885_v39, %v5888_v61  ;;  %5889 = vst [vmem:[#allocation93_spill] sm:$0xff] %v3951_v63  ;;  %1176 = vmatprep.mubr.f32.mxu1 %v3636_v1  ;;  %1400 = vmatpush1.msra.mxu0 %v3207_v16  ;;  %v533_v61 = vand.u32 4294901760, %v532_v11  ;;  %v3967_v1 = vand.u32 4294901760, %v3823_v47  ;;  %v58_v9 = vadd.s32 112, %v3437_v56 }
  0x6e   :  { %5890 = vst [vmem:[#allocation94_spill] sm:$0xff] %v3959_v54  ;;  %519 = vmatmul.mubr.f32.gmra.mxu0 %v518_v29  ;;  %1813 = vmatprep.subr.mxu1 %v5808_v45  ;;  %v5892_v35 = vand.u32 4294901760, %v3910_v34  ;;  %v3977_v11 = vand.u32 4294901760, %v3343_v33  ;;  %vm105_vm13 = vcmp.eq.s32.totalorder %v57_v0, %v3439_v27  ;;  %v173_v0 = vld [vmem:[#allocation2 + $0xf0] sm:$0xff] }
  0x6f   :  { %5891 = vst [vmem:[#allocation95_spill] sm:$0xff] %v3967_v1  ;;  %1178 = vmatmul.mubr.f32.gmra.mxu1 %v3665_v23  ;;  %1401 = vmatprep.subr.mxu0 %v5808_v45  ;;  %v542_v42 = vand.u32 4294901760, %v541_v32  ;;  %v3983_v23 = vsub.f32 %v3329_v13, %v3951_v63  ;;  %v3985_v39 = vsel %vm105_vm13, 0.0, %v169_v51  ;;  %vm107_vm14 = vcmp.eq.s32.totalorder %v58_v9, %v3439_v27 }
  0x70   :  { %v556_v29 = vsub.f32 %v3910_v34, %v5892_v35  ;;  %5893 = vst [vmem:[#allocation96_spill] sm:$0xff] %v3977_v11  ;;  %1815 = vmatpush1.msra.mxu1 %v3192_v5  ;;  %528 = vmatprep.mubr.f32.mxu0 %v527_v46  ;;  %v5895_v35 = vand.u32 4294901760, %v3926_v7  ;;  %297 = vst [vmem:[#allocation7 + $0xd0] sm:$0xff] %v3985_v39  ;;  %v548_v13 = vand.u32 4294901760, %v547_v2  ;;  %v4001_v32 = vand.u32 4294901760, %v3870_v25 }
  0x71   :  { %5894 = vst [vmem:[#allocation97_spill] sm:$0xff] %v3983_v23  ;;  %1183 = vmatprep.mubr.f32.mxu1 %v3696_v43  ;;  %1404 = vmatpush1.msra.mxu0 %v3212_v18  ;;  %v3998_v46 = vsub.f32 %v3823_v47, %v3967_v1  ;;  %v4003_v51 = vsel %vm107_vm14, 0.0, %v171_v26  ;;  %v5898_v9 = vand.u32 4294901760, %v3942_v50  ;;  %v4012_v2 = vsub.f32 %v3343_v33, %v3977_v11  ;;  %v176_v33 = vld [vmem:[#allocation2 + $0x108] sm:$0xff] }
  0x72   :  { %v562_v55 = vsub.f32 %v3926_v7, %v5895_v35  ;;  %534 = vmatmul.mubr.f32.gmra.mxu0 %v533_v61  ;;  %1816 = vmatprep.subr.mxu1 %v5808_v45  ;;  %5897 = vst [vmem:[#allocation99_spill] sm:$0xff] %v4001_v32  ;;  %v557_v35 = vand.u32 4294901760, %v556_v29  ;;  %299 = vst [vmem:[#allocation7 + $0xe0] sm:$0xff] %v4003_v51  ;;  %v59_v47 = vadd.s32 120, %v3437_v56  ;;  %v4019_v29 = vand.u32 4294901760, %v3351_v37 }
  0x73   :  { %5896 = vst [vmem:[#allocation98_spill] sm:$0xff] %v3998_v46  ;;  %1185 = vmatmul.mubr.f32.gmra.mxu1 %v3725_v62  ;;  %1405 = vmatprep.subr.mxu0 %v5808_v45  ;;  %v571_v61 = vsub.f32 %v3942_v50, %v5898_v9  ;;  %5899 = vst [vmem:[#allocation100_spill] sm:$0xff] %v4012_v2  ;;  %v60_v62 = vadd.s32 128, %v3437_v56  ;;  %v4023_v9 = vadd.s32 128, %v3439_v27  ;;  %v5901_v50 = vand.u32 4294901760, %v3959_v54 }
  0x74   :  { %1818 = vmatpush1.msra.mxu1 %v3194_v6  ;;  %543 = vmatprep.mubr.f32.mxu0 %v542_v42  ;;  %5900 = vst [vmem:[#allocation101_spill] sm:$0xff] %v4019_v29  ;;  %v563_v43 = vand.u32 4294901760, %v562_v55  ;;  %v4031_v26 = vand.u32 4294901760, %v3902_v19  ;;  %vm109_vm15 = vcmp.eq.s32.totalorder %v59_v47, %v3439_v27  ;;  %v5596_v7 = vand.u32 4294901760, %v3998_v46  ;;  %v178_v47 = vld [vmem:[#allocation2 + $0x118] sm:$0xff] }
  0x75   :  { %1190 = vmatprep.mubr.f32.mxu1 %v3759_v14  ;;  %1408 = vmatpush1.msra.mxu0 %v3216_v20  ;;  %v577_v42 = vsub.f32 %v3959_v54, %v5901_v50  ;;  %v4038_v14 = vsub.f32 %v3870_v25, %v4001_v32  ;;  %v4040_v34 = vsel %vm109_vm15, 0.0, %v173_v0  ;;  %vm112_vm0 = vcmp.eq.s32.totalorder %v60_v62, %v4023_v9 }
  0x76   :  { %5902 = vst [vmem:[#allocation102_spill] sm:$0xff] %v4031_v26  ;;  %549 = vmatmul.mubr.f32.gmra.mxu0 %v548_v13  ;;  %1819 = vmatprep.subr.mxu1 %v5808_v45  ;;  %v572_v55 = vand.u32 4294901760, %v571_v61  ;;  %301 = vst [vmem:[#allocation7 + $0xf0] sm:$0xff] %v4040_v34  ;;  %v4047_v50 = vsel %vm112_vm0, 0.0, %v176_v33  ;;  %v5904_v25 = vand.u32 4294901760, %v3983_v23  ;;  %v4055_v62 = vsub.f32 %v3351_v37, %v4019_v29 }
  0x77   :  { %5903 = vst [vmem:[#allocation103_spill] sm:$0xff] %v4038_v14  ;;  %1192 = vmatmul.mubr.f32.gmra.mxu1 %v3786_v48  ;;  %1409 = vmatprep.subr.mxu0 %v5808_v45  ;;  %v4058_v13 = vand.u32 4294901760, %v3353_v38  ;;  %304 = vst [vmem:[#allocation7 + $0x108] sm:$0xff] %v4047_v50  ;;  %v61_v61 = vadd.s32 136, %v3437_v56  ;;  %v4066_v33 = vsub.f32 %v3902_v19, %v4031_v26  ;;  %v5911_v19 = vand.u32 4294901760, %v4012_v2 }
  0x78   :  { %1821 = vmatpush1.msra.mxu1 %v3196_v10  ;;  %558 = vmatprep.mubr.f32.mxu0 %v557_v35  ;;  %v586_v0 = vsub.f32 %v3983_v23, %v5904_v25  ;;  %5905 = vst [vmem:[#allocation104_spill] sm:$0xff] %v4055_v62  ;;  %v578_v35 = vand.u32 4294901760, %v577_v42  ;;  %v5908_v25 = vld [vmem:[#allocation35_spill] sm:$0xff]  ;;  %v592_v27 = vsub.f32 %v3998_v46, %v5596_v7 }
  0x79   :  { %5906 = vst [vmem:[#allocation105_spill] sm:$0xff] %v4058_v13  ;;  %1197 = vmatprep.mubr.f32.mxu1 %v3800_v24  ;;  %1412 = vmatpush1.msra.mxu0 %v3219_v21  ;;  %5907 = vst [vmem:[#allocation106_spill] sm:$0xff] %v4066_v33  ;;  %v4069_v37 = vand.u32 4294901760, %v5908_v25  ;;  %v4077_v24 = vand.u32 4294901760, %v3919_v3  ;;  %vm114_vm1 = vcmp.eq.s32.totalorder %v61_v61, %v4023_v9  ;;  %v5912_v23 = vld [vmem:[#allocation15_spill] sm:$0xff]  ;;  %v62_v61 = vadd.s32 144, %v3437_v56 }
  0x7a   :  { %564 = vmatmul.mubr.f32.gmra.mxu0 %v563_v43  ;;  %1822 = vmatprep.subr.mxu1 %v5808_v45  ;;  %v601_v43 = vsub.f32 %v4012_v2, %v5911_v19  ;;  %v4085_v42 = vsel %vm114_vm1, 0.0, %v178_v47  ;;  %v587_v7 = vand.u32 4294901760, %v586_v0  ;;  %v4091_v46 = vsub.f32 %v3353_v38, %v4058_v13  ;;  %v5914_v19 = vld [vmem:[#allocation21_spill] sm:$0xff] }
  0x7b   :  { %5909 = vst [vmem:[#allocation35_spill] sm:$0xff] %v4069_v37  ;;  %5910 = vst [vmem:[#allocation107_spill] sm:$0xff] %v4077_v24  ;;  %1199 = vmatmul.mubr.f32.gmra.mxu1 %v3833_v28  ;;  %1413 = vmatprep.subr.mxu0 %v5808_v45  ;;  %v180_v28 = vld [vmem:[#allocation2 + $0x128] sm:$0xff]  ;;  %v4103_v0 = vand.u32 4294901760, %v3944_v8  ;;  %v63_v38 = vadd.s32 152, %v3437_v56  ;;  %v593_v48 = vand.u32 4294901760, %v592_v27  ;;  %v4112_v47 = vsub.f32 %v3919_v3, %v4077_v24 }
  0x7c   :  { %1824 = vmatpush1.msra.mxu1 %v5912_v23  ;;  %573 = vmatprep.mubr.f32.mxu0 %v572_v55  ;;  %5913 = vst [vmem:[#allocation108_spill] sm:$0xff] %v4091_v46  ;;  %306 = vst [vmem:[#allocation7 + $0x118] sm:$0xff] %v4085_v42  ;;  %v4100_v55 = vsub.f32 %v5908_v25, %v4069_v37  ;;  %v5917_v2 = vand.u32 4294901760, %v4038_v14  ;;  %vm116_vm2 = vcmp.eq.s32.totalorder %v62_v61, %v4023_v9  ;;  %v182_v25 = vld [vmem:[#allocation2 + $0x138] sm:$0xff]  ;;  %v184_v61 = vld [vmem:[#allocation2 + $0x148] sm:$0xff] }
  0x7d   :  { %1204 = vmatprep.mubr.f32.mxu1 %v3855_v60  ;;  %1416 = vmatpush1.msra.mxu0 %v5914_v19  ;;  %5916 = vst [vmem:[#allocation110_spill] sm:$0xff] %v4103_v0  ;;  %5918 = vst [vmem:[#allocation111_spill] sm:$0xff] %v4112_v47  ;;  %v602_v54 = vand.u32 4294901760, %v601_v43  ;;  %v5919_v19 = vld [vmem:[#allocation16_spill] sm:$0xff]  ;;  %v5920_v27 = vand.u32 4294901760, %v4055_v62  ;;  %vm118_vm3 = vcmp.eq.s32.totalorder %v63_v38, %v4023_v9  ;;  %v5923_v43 = vand.u32 4294901760, %v4066_v33 }
  0x7e   :  { %5915 = vst [vmem:[#allocation109_spill] sm:$0xff] %v4100_v55  ;;  %579 = vmatmul.mubr.f32.gmra.mxu0 %v578_v35  ;;  %1825 = vmatprep.subr.mxu1 %v5808_v45  ;;  %v607_v60 = vsub.f32 %v4038_v14, %v5917_v2  ;;  %v4117_v35 = vsel %vm116_vm2, 0.0, %v180_v28  ;;  %v3040_v14 = vld [vmem:[#allocation7 + $0xd8] sm:$0xff]  ;;  %v5922_v28 = vld [vmem:[#allocation22_spill] sm:$0xff]  ;;  %v4138_v3 = vsel %vm118_vm3, 0.0, %v182_v25  ;;  %v5931_v10 = vand.u32 4294901760, %v4100_v55 }
  0x7f   :  { %1206 = vmatmul.mubr.f32.gmra.mxu1 %v3868_v30  ;;  %1417 = vmatprep.subr.mxu0 %v5808_v45  ;;  %v616_v2 = vsub.f32 %v4055_v62, %v5920_v27  ;;  %v4124_v23 = vand.u32 4294901760, %v3040_v14  ;;  %308 = vst [vmem:[#allocation7 + $0x128] sm:$0xff] %v4117_v35  ;;  %v4136_v27 = vsub.f32 %v3944_v8, %v4103_v0  ;;  %v4143_v30 = vand.u32 4294901760, %v3985_v39  ;;  %v3041_v8 = vld [vmem:[#allocation7 + $0xe8] sm:$0xff] }
  0x80   :  { %1827 = vmatpush1.msra.mxu1 %v5919_v19  ;;  %588 = vmatprep.mubr.f32.mxu0 %v587_v7  ;;  %v622_v7 = vsub.f32 %v4066_v33, %v5923_v43  ;;  %v608_v38 = vand.u32 4294901760, %v607_v60  ;;  %310 = vst [vmem:[#allocation7 + $0x138] sm:$0xff] %v4138_v3  ;;  %v64_v43 = vadd.s32 160, %v3437_v56  ;;  %v4149_v25 = vand.u32 4294901760, %v3041_v8  ;;  %v5927_v60 = vld [vmem:[#allocation17_spill] sm:$0xff]  ;;  %v5930_v19 = vld [vmem:[#allocation24_spill] sm:$0xff] }
  0x81   :  { %5921 = vst [vmem:[#allocation112_spill] sm:$0xff] %v4124_v23  ;;  %1211 = vmatprep.mubr.f32.mxu1 %v3875_v57  ;;  %1420 = vmatpush1.msra.mxu0 %v5922_v28  ;;  %5924 = vst [vmem:[#allocation113_spill] sm:$0xff] %v4136_v27  ;;  %v617_v57 = vand.u32 4294901760, %v616_v2  ;;  %v5928_v33 = vand.u32 4294901760, %v4091_v46  ;;  %v4157_v28 = vsub.f32 %v3040_v14, %v4124_v23  ;;  %v5932_v14 = vand.u32 4294901760, %v4112_v47 }
  0x82   :  { %594 = vmatmul.mubr.f32.gmra.mxu0 %v593_v48  ;;  %1828 = vmatprep.subr.mxu1 %v5808_v45  ;;  %5925 = vst [vmem:[#allocation114_spill] sm:$0xff] %v4143_v30  ;;  %5926 = vst [vmem:[#allocation115_spill] sm:$0xff] %v4149_v25  ;;  %v65_v48 = vadd.s32 168, %v3437_v56  ;;  %vm120_vm4 = vcmp.eq.s32.totalorder %v64_v43, %v4023_v9  ;;  %v623_v21 = vand.u32 4294901760, %v622_v7  ;;  %v4179_v7 = vand.u32 4294901760, %v4003_v51 }
  0x83   :  { %1213 = vmatmul.mubr.f32.gmra.mxu1 %v3890_v41  ;;  %1421 = vmatprep.subr.mxu0 %v5808_v45  ;;  %v631_v62 = vsub.f32 %v4091_v46, %v5928_v33  ;;  %5929 = vst [vmem:[#allocation116_spill] sm:$0xff] %v4157_v28  ;;  %v186_v41 = vld [vmem:[#allocation2 + $0x158] sm:$0xff]  ;;  %v637_v33 = vsub.f32 %v4112_v47, %v5932_v14  ;;  %v188_v47 = vld [vmem:[#allocation2 + $0x168] sm:$0xff]  ;;  %v3043_v46 = vld [vmem:[#allocation7 + $0x100] sm:$0xff] }
  0x84   :  { %1830 = vmatpush1.msra.mxu1 %v5927_v60  ;;  %603 = vmatprep.mubr.f32.mxu0 %v602_v54  ;;  %v4165_v54 = vsub.f32 %v4100_v55, %v5931_v10  ;;  %v4168_v60 = vsel %vm120_vm4, 0.0, %v184_v61  ;;  %v4176_v43 = vsub.f32 %v3985_v39, %v4143_v30  ;;  %5934 = vst [vmem:[#allocation118_spill] sm:$0xff] %v4179_v7  ;;  %v3042_v61 = vld [vmem:[#allocation7 + $0xf8] sm:$0xff]  ;;  %v5937_v39 = vld [vmem:[#allocation19_spill] sm:$0xff] }
  0x85   :  { %1218 = vmatprep.mubr.f32.mxu1 %v3913_v52  ;;  %1424 = vmatpush1.msra.mxu0 %v5930_v19  ;;  %312 = vst [vmem:[#allocation7 + $0x148] sm:$0xff] %v4168_v60  ;;  %vm122_vm5 = vcmp.eq.s32.totalorder %v65_v48, %v4023_v9  ;;  %v4186_v10 = vsub.f32 %v3041_v8, %v4149_v25  ;;  %v632_v2 = vand.u32 4294901760, %v631_v62  ;;  %v5938_v48 = vld [vmem:[#allocation26_spill] sm:$0xff]  ;;  %v5943_v62 = vld [vmem:[#allocation20_spill] sm:$0xff] }
  0x86   :  { %609 = vmatmul.mubr.f32.gmra.mxu0 %v608_v38  ;;  %1831 = vmatprep.subr.mxu1 %v5808_v45  ;;  %5933 = vst [vmem:[#allocation117_spill] sm:$0xff] %v4176_v43  ;;  %v4188_v38 = vand.u32 4294901760, %v3042_v61  ;;  %v4190_v14 = vsel %vm122_vm5, 0.0, %v186_v41  ;;  %v647_v8 = vand.u32 4294901760, %v4165_v54  ;;  %v66_v41 = vadd.s32 176, %v3437_v56  ;;  %v5971_v19 = vld [vmem:[#allocation34_spill] sm:$0xff] }
  0x87   :  { %1220 = vmatmul.mubr.f32.gmra.mxu1 %v3929_v58  ;;  %1425 = vmatprep.subr.mxu0 %v5808_v45  ;;  %5935 = vst [vmem:[#allocation119_spill] sm:$0xff] %v4186_v10  ;;  %314 = vst [vmem:[#allocation7 + $0x158] sm:$0xff] %v4190_v14  ;;  %v5939_v58 = vand.u32 4294901760, %v4136_v27  ;;  %v4206_v52 = vsub.f32 %v4003_v51, %v4179_v7  ;;  %v67_v54 = vadd.s32 184, %v3437_v56  ;;  %v5944_v51 = vand.u32 4294901760, %v4157_v28 }
  0x88   :  { %5936 = vst [vmem:[#allocation120_spill] sm:$0xff] %v4188_v38  ;;  %1833 = vmatpush1.msra.mxu1 %v5937_v39  ;;  %618 = vmatprep.mubr.f32.mxu0 %v617_v57  ;;  %v638_v57 = vand.u32 4294901760, %v637_v33  ;;  %vm124_vm6 = vcmp.eq.s32.totalorder %v66_v41, %v4023_v9  ;;  %v190_v33 = vld [vmem:[#allocation2 + $0x178] sm:$0xff]  ;;  %v5947_v41 = vld [vmem:[#allocation28_spill] sm:$0xff] }
  0x89   :  { %1225 = vmatprep.mubr.f32.mxu1 %v3951_v63  ;;  %1428 = vmatpush1.msra.mxu0 %v5938_v48  ;;  %v652_v55 = vsub.f32 %v4136_v27, %v5939_v58  ;;  %5940 = vst [vmem:[#allocation121_spill] sm:$0xff] %v4206_v52  ;;  %v4209_v63 = vand.u32 4294901760, %v4040_v34  ;;  %v661_v27 = vsub.f32 %v4157_v28, %v5944_v51  ;;  %v4226_v58 = vand.u32 4294901760, %v3043_v46  ;;  %v5952_v28 = vld [vmem:[#allocation23_spill] sm:$0xff] }
  0x8a   :  { %624 = vmatmul.mubr.f32.gmra.mxu0 %v623_v21  ;;  %1834 = vmatprep.subr.mxu1 %v5808_v45  ;;  %v4215_v21 = vsub.f32 %v3042_v61, %v4188_v38  ;;  %v4228_v61 = vsel %vm124_vm6, 0.0, %v188_v47  ;;  %vm126_vm7 = vcmp.eq.s32.totalorder %v67_v54, %v4023_v9  ;;  %v5955_v54 = vld [vmem:[#allocation30_spill] sm:$0xff] }
  0x8b   :  { %5941 = vst [vmem:[#allocation122_spill] sm:$0xff] %v4209_v63  ;;  %1227 = vmatmul.mubr.f32.gmra.mxu1 %v3967_v1  ;;  %1429 = vmatprep.subr.mxu0 %v5808_v45  ;;  %v4224_v1 = vand.u32 4294901760, %v4047_v50  ;;  %5946 = vst [vmem:[#allocation125_spill] sm:$0xff] %v4226_v58  ;;  %v653_v48 = vand.u32 4294901760, %v652_v55  ;;  %v4241_v47 = vsub.f32 %v4040_v34, %v4209_v63  ;;  %v5950_v55 = vand.u32 4294901760, %v4186_v10 }
  0x8c   :  { %5942 = vst [vmem:[#allocation123_spill] sm:$0xff] %v4215_v21  ;;  %1836 = vmatpush1.msra.mxu1 %v5943_v62  ;;  %633 = vmatprep.mubr.f32.mxu0 %v632_v2  ;;  %316 = vst [vmem:[#allocation7 + $0x168] sm:$0xff] %v4228_v61  ;;  %v5948_v2 = vand.u32 4294901760, %v4176_v43  ;;  %v662_v34 = vand.u32 4294901760, %v661_v27  ;;  %v5957_v27 = vand.u32 4294901760, %v4206_v52  ;;  %v5958_v62 = vand.u32 4294901760, %v4215_v21 }
  0x8d   :  { %5945 = vst [vmem:[#allocation124_spill] sm:$0xff] %v4224_v1  ;;  %1232 = vmatprep.mubr.f32.mxu1 %v3977_v11  ;;  %1432 = vmatpush1.msra.mxu0 %v5947_v41  ;;  %5949 = vst [vmem:[#allocation126_spill] sm:$0xff] %v4241_v47  ;;  %v4243_v11 = vsel %vm126_vm7, 0.0, %v190_v33  ;;  %v4258_v33 = vsub.f32 %v4047_v50, %v4224_v1 }
  0x8e   :  { %639 = vmatmul.mubr.f32.gmra.mxu0 %v638_v57  ;;  %1837 = vmatprep.subr.mxu1 %v5808_v45  ;;  %v667_v51 = vsub.f32 %v4176_v43, %v5948_v2  ;;  %v676_v57 = vsub.f32 %v4186_v10, %v5950_v55  ;;  %v4252_v2 = vand.u32 4294901760, %v4085_v42  ;;  %318 = vst [vmem:[#allocation7 + $0x178] sm:$0xff] %v4243_v11  ;;  %v68_v55 = vadd.s32 192, %v3437_v56  ;;  %v192_v10 = vld [vmem:[#allocation2 + $0x188] sm:$0xff]  ;;  %v3044_v43 = vld [vmem:[#allocation7 + $0x110] sm:$0xff] }
  0x8f   :  { %1234 = vmatmul.mubr.f32.gmra.mxu1 %v4001_v32  ;;  %1433 = vmatprep.subr.mxu0 %v5808_v45  ;;  %5953 = vst [vmem:[#allocation128_spill] sm:$0xff] %v4258_v33  ;;  %v4261_v32 = vsub.f32 %v3043_v46, %v4226_v58  ;;  %v4266_v41 = vand.u32 4294901760, %v3044_v43  ;;  %v682_v46 = vsub.f32 %v4206_v52, %v5957_v27  ;;  %v5960_v27 = vld [vmem:[#allocation25_spill] sm:$0xff] }
  0x90   :  { %5951 = vst [vmem:[#allocation127_spill] sm:$0xff] %v4252_v2  ;;  %1839 = vmatpush1.msra.mxu1 %v5952_v28  ;;  %648 = vmatprep.mubr.f32.mxu0 %v647_v8  ;;  %v69_v8 = vadd.s32 200, %v3437_v56  ;;  %v668_v50 = vand.u32 4294901760, %v667_v51  ;;  %vm128_vm8 = vcmp.eq.s32.totalorder %v68_v55, %v4023_v9  ;;  %v4282_v51 = vsub.f32 %v4085_v42, %v4252_v2  ;;  %v5962_v42 = vld [vmem:[#allocation32_spill] sm:$0xff] }
  0x91   :  { %5954 = vst [vmem:[#allocation129_spill] sm:$0xff] %v4261_v32  ;;  %1239 = vmatprep.mubr.f32.mxu1 %v4019_v29  ;;  %1436 = vmatpush1.msra.mxu0 %v5955_v54  ;;  %5956 = vst [vmem:[#allocation130_spill] sm:$0xff] %v4266_v41  ;;  %v194_v29 = vld [vmem:[#allocation2 + $0x198] sm:$0xff]  ;;  %v677_v54 = vand.u32 4294901760, %v676_v57  ;;  %v4284_v39 = vsel %vm128_vm8, 0.0, %v192_v10  ;;  %v4297_v10 = vsub.f32 %v3044_v43, %v4266_v41  ;;  %v683_v28 = vand.u32 4294901760, %v682_v46 }
  0x92   :  { %654 = vmatmul.mubr.f32.gmra.mxu0 %v653_v48  ;;  %1840 = vmatprep.subr.mxu1 %v5808_v45  ;;  %v691_v48 = vsub.f32 %v4215_v21, %v5958_v62  ;;  %5959 = vst [vmem:[#allocation131_spill] sm:$0xff] %v4282_v51  ;;  %320 = vst [vmem:[#allocation7 + $0x188] sm:$0xff] %v4284_v39  ;;  %vm130_vm9 = vcmp.eq.s32.totalorder %v69_v8, %v4023_v9  ;;  %v3045_v62 = vld [vmem:[#allocation7 + $0x120] sm:$0xff]  ;;  %v5965_v55 = vand.u32 4294901760, %v4241_v47  ;;  %v5967_v21 = vld [vmem:[#allocation27_spill] sm:$0xff] }
  0x93   :  { %1241 = vmatmul.mubr.f32.gmra.mxu1 %v4031_v26  ;;  %1437 = vmatprep.subr.mxu0 %v5808_v45  ;;  %v4290_v26 = vand.u32 4294901760, %v4117_v35  ;;  %5963 = vst [vmem:[#allocation133_spill] sm:$0xff] %v4297_v10  ;;  %v4299_v57 = vand.u32 4294901760, %v3045_v62  ;;  %v71_v46 = vadd.s32 216, %v3437_v56  ;;  %v5969_v52 = vand.u32 4294901760, %v4261_v32 }
  0x94   :  { %1842 = vmatpush1.msra.mxu1 %v5960_v27  ;;  %663 = vmatprep.mubr.f32.mxu0 %v662_v34  ;;  %v4301_v34 = vsel %vm130_vm9, 0.0, %v194_v29  ;;  %v697_v8 = vsub.f32 %v4241_v47, %v5965_v55  ;;  %v70_v29 = vadd.s32 208, %v3437_v56  ;;  %v692_v55 = vand.u32 4294901760, %v691_v48  ;;  %v198_v27 = vld [vmem:[#allocation2 + $0x1b8] sm:$0xff] }
  0x95   :  { %5961 = vst [vmem:[#allocation132_spill] sm:$0xff] %v4290_v26  ;;  %1246 = vmatprep.mubr.f32.mxu1 %v4058_v13  ;;  %1440 = vmatpush1.msra.mxu0 %v5962_v42  ;;  %5964 = vst [vmem:[#allocation134_spill] sm:$0xff] %v4299_v57  ;;  %v4312_v13 = vand.u32 4294901760, %v4138_v3  ;;  %v5968_v47 = vand.u32 4294901760, %v4258_v33  ;;  %v712_v43 = vsub.f32 %v4261_v32, %v5969_v52 }
  0x96   :  { %669 = vmatmul.mubr.f32.gmra.mxu0 %v668_v50  ;;  %1843 = vmatprep.subr.mxu1 %v5808_v45  ;;  %322 = vst [vmem:[#allocation7 + $0x198] sm:$0xff] %v4301_v34  ;;  %v196_v50 = vld [vmem:[#allocation2 + $0x1a8] sm:$0xff]  ;;  %v4325_v42 = vsub.f32 %v4117_v35, %v4290_v26  ;;  %v4331_v48 = vsub.f32 %v3045_v62, %v4299_v57  ;;  %v698_v52 = vand.u32 4294901760, %v697_v8  ;;  %v3046_v35 = vld [vmem:[#allocation7 + $0x130] sm:$0xff]  ;;  %v5974_v62 = vand.u32 4294901760, %v4282_v51  ;;  %v5976_v8 = vld [vmem:[#allocation29_spill] sm:$0xff] }
  0x97   :  { %1248 = vmatmul.mubr.f32.gmra.mxu1 %v4077_v24  ;;  %1441 = vmatprep.subr.mxu0 %v5808_v45  ;;  %5966 = vst [vmem:[#allocation135_spill] sm:$0xff] %v4312_v13  ;;  %v706_v24 = vsub.f32 %v4258_v33, %v5968_v47  ;;  %vm132_vm10 = vcmp.eq.s32.totalorder %v70_v29, %v4023_v9  ;;  %v4336_v47 = vand.u32 4294901760, %v3046_v35  ;;  %v3047_v33 = vld [vmem:[#allocation7 + $0x140] sm:$0xff] }
  0x98   :  { %1845 = vmatpush1.msra.mxu1 %v5967_v21  ;;  %678 = vmatprep.mubr.f32.mxu0 %v677_v54  ;;  %5970 = vst [vmem:[#allocation27_spill] sm:$0xff] %v4325_v42  ;;  %5972 = vst [vmem:[#allocation136_spill] sm:$0xff] %v4331_v48  ;;  %vm134_vm11 = vcmp.eq.s32.totalorder %v71_v46, %v4023_v9  ;;  %v4338_v32 = vsel %vm132_vm10, 0.0, %v196_v50  ;;  %v721_v54 = vsub.f32 %v4282_v51, %v5974_v62 }
  0x99   :  { %1253 = vmatprep.mubr.f32.mxu1 %v4069_v37  ;;  %1444 = vmatpush1.msra.mxu0 %v5971_v19  ;;  %5973 = vst [vmem:[#allocation137_spill] sm:$0xff] %v4336_v47  ;;  %v4347_v29 = vsub.f32 %v4138_v3, %v4312_v13  ;;  %324 = vst [vmem:[#allocation7 + $0x1a8] sm:$0xff] %v4338_v32  ;;  %v707_v50 = vand.u32 4294901760, %v706_v24  ;;  %v72_v62 = vadd.s32 224, %v3437_v56  ;;  %v200_v37 = vld [vmem:[#allocation2 + $0x1c8] sm:$0xff]  ;;  %v5978_v3 = vld [vmem:[#allocation37_spill] sm:$0xff] }
  0x9a   :  { %684 = vmatmul.mubr.f32.gmra.mxu0 %v683_v28  ;;  %1846 = vmatprep.subr.mxu1 %v5808_v45  ;;  %v4350_v28 = vsel %vm134_vm11, 0.0, %v198_v27  ;;  %v713_v27 = vand.u32 4294901760, %v712_v43  ;;  %v5979_v51 = vand.u32 4294901760, %v4297_v10  ;;  %v4367_v46 = vsub.f32 %v3046_v35, %v4336_v47  ;;  %v202_v43 = vld [vmem:[#allocation2 + $0x1d8] sm:$0xff] }
  0x9b   :  { %1255 = vmatmul.mubr.f32.gmra.mxu1 %v4103_v0  ;;  %1445 = vmatprep.subr.mxu0 %v5808_v45  ;;  %5975 = vst [vmem:[#allocation138_spill] sm:$0xff] %v4347_v29  ;;  %v4355_v0 = vand.u32 4294901760, %v4168_v60  ;;  %326 = vst [vmem:[#allocation7 + $0x1b8] sm:$0xff] %v4350_v28  ;;  %vm136_vm12 = vcmp.eq.s32.totalorder %v72_v62, %v4023_v9  ;;  %v5983_v35 = vand.u32 4294901760, %v4325_v42 }
  0x9c   :  { %1848 = vmatpush1.msra.mxu1 %v5976_v8  ;;  %693 = vmatprep.mubr.f32.mxu0 %v692_v55  ;;  %v727_v55 = vsub.f32 %v4297_v10, %v5979_v51  ;;  %5980 = vst [vmem:[#allocation140_spill] sm:$0xff] %v4367_v46  ;;  %v4369_v8 = vand.u32 4294901760, %v3047_v33  ;;  %v722_v51 = vand.u32 4294901760, %v721_v54  ;;  %v4376_v24 = vsel %vm136_vm12, 0.0, %v200_v37  ;;  %v5982_v10 = vld [vmem:[#allocation31_spill] sm:$0xff] }
  0x9d   :  { %5977 = vst [vmem:[#allocation139_spill] sm:$0xff] %v4355_v0  ;;  %1260 = vmatprep.mubr.f32.mxu1 %v4124_v23  ;;  %1448 = vmatpush1.msra.mxu0 %v5978_v3  ;;  %v73_v23 = vadd.s32 232, %v3437_v56  ;;  %v736_v3 = vsub.f32 %v4325_v42, %v5983_v35  ;;  %v4384_v62 = vsub.f32 %v4168_v60, %v4355_v0  ;;  %328 = vst [vmem:[#allocation7 + $0x1c8] sm:$0xff] %v4376_v24  ;;  %v5986_v37 = vld [vmem:[#allocation39_spill] sm:$0xff] }
  0x9e   :  { %699 = vmatmul.mubr.f32.gmra.mxu0 %v698_v52  ;;  %1849 = vmatprep.subr.mxu1 %v5808_v45  ;;  %5981 = vst [vmem:[#allocation141_spill] sm:$0xff] %v4369_v8  ;;  %v5987_v54 = vand.u32 4294901760, %v4331_v48  ;;  %v728_v60 = vand.u32 4294901760, %v727_v55  ;;  %v4401_v42 = vsub.f32 %v3047_v33, %v4369_v8  ;;  %v4412_v55 = vand.u32 4294901760, %v4228_v61  ;;  %v204_v33 = vld [vmem:[#allocation2 + $0x1e8] sm:$0xff]  ;;  %v5992_v52 = vld [vmem:[#allocation33_spill] sm:$0xff] }
  0x9f   :  { %1262 = vmatmul.mubr.f32.gmra.mxu1 %v4143_v30  ;;  %1449 = vmatprep.subr.mxu0 %v5808_v45  ;;  %5984 = vst [vmem:[#allocation142_spill] sm:$0xff] %v4384_v62  ;;  %v4387_v30 = vand.u32 4294901760, %v4190_v14  ;;  %vm138_vm13 = vcmp.eq.s32.totalorder %v73_v23, %v4023_v9  ;;  %v3048_v23 = vld [vmem:[#allocation7 + $0x150] sm:$0xff] }
  0xa0   :  { %1851 = vmatpush1.msra.mxu1 %v5982_v10  ;;  %708 = vmatprep.mubr.f32.mxu0 %v707_v50  ;;  %v742_v50 = vsub.f32 %v4331_v48, %v5987_v54  ;;  %v4396_v35 = vsel %vm138_vm13, 0.0, %v202_v43  ;;  %5988 = vst [vmem:[#allocation144_spill] sm:$0xff] %v4401_v42  ;;  %v4403_v10 = vand.u32 4294901760, %v3048_v23  ;;  %v5990_v43 = vand.u32 4294901760, %v4347_v29  ;;  %5991 = vst [vmem:[#allocation146_spill] sm:$0xff] %v4412_v55 }
  0xa1   :  { %5985 = vst [vmem:[#allocation143_spill] sm:$0xff] %v4387_v30  ;;  %1267 = vmatprep.mubr.f32.mxu1 %v4149_v25  ;;  %1452 = vmatpush1.msra.mxu0 %v5986_v37  ;;  %330 = vst [vmem:[#allocation7 + $0x1d8] sm:$0xff] %v4396_v35  ;;  %v74_v54 = vadd.s32 240, %v3437_v56  ;;  %v737_v25 = vand.u32 4294901760, %v736_v3  ;;  %v5994_v37 = vld [vmem:[#allocation41_spill] sm:$0xff]  ;;  %v5996_v3 = vand.u32 4294901760, %v4367_v46 }
  0xa2   :  { %714 = vmatmul.mubr.f32.gmra.mxu0 %v713_v27  ;;  %1852 = vmatprep.subr.mxu1 %v5808_v45  ;;  %5989 = vst [vmem:[#allocation145_spill] sm:$0xff] %v4403_v10  ;;  %v751_v27 = vsub.f32 %v4347_v29, %v5990_v43  ;;  %v743_v43 = vand.u32 4294901760, %v742_v50  ;;  %v3049_v29 = vld [vmem:[#allocation7 + $0x160] sm:$0xff]  ;;  %v4451_v48 = vand.u32 4294901760, %v4243_v11 }
  0xa3   :  { %1269 = vmatmul.mubr.f32.gmra.mxu1 %v4179_v7  ;;  %1453 = vmatprep.subr.mxu0 %v5808_v45  ;;  %v4419_v7 = vsub.f32 %v4190_v14, %v4387_v30  ;;  %v4423_v19 = vand.u32 4294901760, %v3049_v29  ;;  %vm140_vm14 = vcmp.eq.s32.totalorder %v74_v54, %v4023_v9  ;;  %v757_v14 = vsub.f32 %v4367_v46, %v5996_v3  ;;  %v5999_v54 = vld [vmem:[#allocation36_spill] sm:$0xff] }
  0xa4   :  { %1854 = vmatpush1.msra.mxu1 %v5992_v52  ;;  %723 = vmatprep.mubr.f32.mxu0 %v722_v51  ;;  %v75_v52 = vadd.s32 248, %v3437_v56  ;;  %v206_v51 = vld [vmem:[#allocation2 + $0x1f8] sm:$0xff]  ;;  %v4435_v50 = vsel %vm140_vm14, 0.0, %v204_v33  ;;  %v752_v56 = vand.u32 4294901760, %v751_v27  ;;  %6001 = vst [vmem:[#allocation36_spill] sm:$0xff] %v4451_v48  ;;  %v3050_v3 = vld [vmem:[#allocation7 + $0x170] sm:$0xff] }
  0xa5   :  { %5993 = vst [vmem:[#allocation147_spill] sm:$0xff] %v4419_v7  ;;  %1274 = vmatprep.mubr.f32.mxu1 %v4188_v38  ;;  %1456 = vmatpush1.msra.mxu0 %v5994_v37  ;;  %5995 = vst [vmem:[#allocation41_spill] sm:$0xff] %v4423_v19  ;;  %v4433_v38 = vsub.f32 %v3048_v23, %v4403_v10  ;;  %v6000_v23 = vand.u32 4294901760, %v4384_v62 }
  0xa6   :  { %729 = vmatmul.mubr.f32.gmra.mxu0 %v728_v60  ;;  %1855 = vmatprep.subr.mxu1 %v5808_v45  ;;  %v4441_v60 = vsub.f32 %v4228_v61, %v4412_v55  ;;  %332 = vst [vmem:[#allocation7 + $0x1e8] sm:$0xff] %v4435_v50  ;;  %vm142_vm15 = vcmp.eq.s32.totalorder %v75_v52, %v4023_v9  ;;  %v6002_v61 = vld [vmem:[#allocation43_spill] sm:$0xff]  ;;  %v6004_v52 = vand.u32 4294901760, %v4401_v42 }
  0xa7   :  { %5997 = vst [vmem:[#allocation148_spill] sm:$0xff] %v4433_v38  ;;  %1276 = vmatmul.mubr.f32.gmra.mxu1 %v4209_v63  ;;  %1457 = vmatprep.subr.mxu0 %v5808_v45  ;;  %v766_v33 = vsub.f32 %v4384_v62, %v6000_v23  ;;  %v4453_v27 = vsel %vm142_vm15, 0.0, %v206_v51  ;;  %v4458_v9 = vsub.f32 %v3049_v29, %v4423_v19  ;;  %v4466_v63 = vand.u32 4294901760, %v3050_v3 }
  0xa8   :  { %5998 = vst [vmem:[#allocation149_spill] sm:$0xff] %v4441_v60  ;;  %1857 = vmatpush1.msra.mxu1 %v5999_v54  ;;  %738 = vmatprep.mubr.f32.mxu0 %v737_v25  ;;  %334 = vst [vmem:[#allocation7 + $0x1f8] sm:$0xff] %v4453_v27  ;;  %v758_v25 = vand.u32 4294901760, %v757_v14  ;;  %v772_v23 = vsub.f32 %v4401_v42, %v6004_v52  ;;  %v6007_v14 = vand.u32 4294901760, %v4419_v7  ;;  %v4480_v51 = vand.u32 4294901760, %v4284_v39 }
  0xa9   :  { %1281 = vmatprep.mubr.f32.mxu1 %v4224_v1  ;;  %1460 = vmatpush2.msra.mxu0 %v6002_v61  ;;  %6003 = vst [vmem:[#allocation43_spill] sm:$0xff] %v4458_v9  ;;  %6005 = vst [vmem:[#allocation150_spill] sm:$0xff] %v4466_v63  ;;  %v6006_v1 = vld [vmem:[#allocation38_spill] sm:$0xff]  ;;  %v4477_v52 = vsub.f32 %v4243_v11, %v4451_v48  ;;  %v4490_v11 = vsub.f32 %v3050_v3, %v4466_v63  ;;  %v6014_v29 = vand.u32 4294901760, %v4441_v60 }
  0xaa   :  { %744 = vmatmul.mubr.f32.gmra.mxu0 %v743_v43  ;;  %1858 = vmatprep.subr.mxu1 %v5808_v45  ;;  %v767_v43 = vand.u32 4294901760, %v766_v33  ;;  %v781_v62 = vsub.f32 %v4419_v7, %v6007_v14  ;;  %6009 = vst [vmem:[#allocation151_spill] sm:$0xff] %v4480_v51  ;;  %v6011_v33 = vand.u32 4294901760, %v4433_v38  ;;  %v3051_v7 = vld [vmem:[#allocation7 + $0x180] sm:$0xff]  ;;  %v4503_v3 = vsub.f32 %v4284_v39, %v4480_v51 }
  0xab   :  { %1283 = vmatmul.mubr.f32.gmra.mxu1 %v4226_v58  ;;  %1461 = vmatprep.subr.mxu0 %v5808_v45  ;;  %6008 = vst [vmem:[#allocation38_spill] sm:$0xff] %v4477_v52  ;;  %v6010_v58 = vld [vmem:[#allocation45_spill] sm:$0xff]  ;;  %v4492_v42 = vand.u32 4294901760, %v3051_v7  ;;  %v6019_v46 = vand.u32 4294901760, %v4458_v9 }
  0xac   :  { %1860 = vmatpush2.msra.mxu1 %v6006_v1  ;;  %753 = vmatprep.mubr.f32.mxu0 %v752_v56  ;;  %v773_v56 = vand.u32 4294901760, %v772_v23  ;;  %v787_v14 = vsub.f32 %v4433_v38, %v6011_v33  ;;  %6012 = vst [vmem:[#allocation45_spill] sm:$0xff] %v4490_v11  ;;  %v782_v23 = vand.u32 4294901760, %v781_v62  ;;  %v4506_v38 = vand.u32 4294901760, %v4301_v34  ;;  %v3052_v33 = vld [vmem:[#allocation7 + $0x190] sm:$0xff] }
  0xad   :  { %1288 = vmatprep.mubr.f32.mxu1 %v4252_v2  ;;  %1464 = vmatpush2.msra.mxu0 %v6010_v58  ;;  %6013 = vst [vmem:[#allocation152_spill] sm:$0xff] %v4492_v42  ;;  %v6015_v2 = vld [vmem:[#allocation40_spill] sm:$0xff]  ;;  %v4516_v39 = vsub.f32 %v3051_v7, %v4492_v42 }
  0xae   :  { %759 = vmatmul.mubr.f32.gmra.mxu0 %v758_v25  ;;  %1861 = vmatprep.subr.mxu1 %v5808_v45  ;;  %v796_v25 = vsub.f32 %v4441_v60, %v6014_v29  ;;  %6016 = vst [vmem:[#allocation40_spill] sm:$0xff] %v4503_v3  ;;  %6017 = vst [vmem:[#allocation153_spill] sm:$0xff] %v4506_v38  ;;  %v802_v29 = vsub.f32 %v4458_v9, %v6019_v46  ;;  %v788_v62 = vand.u32 4294901760, %v787_v14 }
  0xaf   :  { %1290 = vmatmul.mubr.f32.gmra.mxu1 %v4266_v41  ;;  %1465 = vmatprep.subr.mxu0 %v5808_v45  ;;  %v6018_v41 = vld [vmem:[#allocation47_spill] sm:$0xff]  ;;  %6020 = vst [vmem:[#allocation154_spill] sm:$0xff] %v4516_v39  ;;  %v4518_v60 = vand.u32 4294901760, %v3052_v33  ;;  %v6023_v46 = vand.u32 4294901760, %v4477_v52  ;;  %v4529_v7 = vsub.f32 %v4301_v34, %v4506_v38 }
  0xb0   :  { %1863 = vmatpush2.msra.mxu1 %v6015_v2  ;;  %768 = vmatprep.mubr.f32.mxu0 %v767_v43  ;;  %v4532_v43 = vand.u32 4294901760, %v4338_v32 }
  0xb1   :  { %1295 = vmatprep.mubr.f32.mxu1 %v4290_v26  ;;  %1468 = vmatpush2.msra.mxu0 %v6018_v41  ;;  %6021 = vst [vmem:[#allocation155_spill] sm:$0xff] %v4518_v60  ;;  %v797_v26 = vand.u32 4294901760, %v796_v25  ;;  %v6022_v41 = vld [vmem:[#allocation42_spill] sm:$0xff]  ;;  %6024 = vst [vmem:[#allocation156_spill] sm:$0xff] %v4529_v7  ;;  %v803_v25 = vand.u32 4294901760, %v802_v29  ;;  %v4542_v34 = vsub.f32 %v3052_v33, %v4518_v60  ;;  %v4549_v29 = vand.u32 4294901760, %v4350_v28 }
  0xb2   :  { %774 = vmatmul.mubr.f32.gmra.mxu0 %v773_v56  ;;  %1864 = vmatprep.subr.mxu1 %v5808_v45  ;;  %v811_v56 = vsub.f32 %v4477_v52, %v6023_v46  ;;  %v3053_v52 = vld [vmem:[#allocation7 + $0x1a0] sm:$0xff]  ;;  %v4610_v33 = vand.u32 4294901760, %v4396_v35 }
  0xb3   :  { %1297 = vmatmul.mubr.f32.gmra.mxu1 %v4299_v57  ;;  %1469 = vmatprep.subr.mxu0 %v5808_v45  ;;  %v6025_v57 = vld [vmem:[#allocation49_spill] sm:$0xff]  ;;  %6027 = vst [vmem:[#allocation157_spill] sm:$0xff] %v4542_v34  ;;  %v4544_v9 = vand.u32 4294901760, %v3053_v52 }
  0xb4   :  { %1866 = vmatpush2.msra.mxu1 %v6022_v41  ;;  %783 = vmatprep.mubr.f32.mxu0 %v782_v23  ;;  %v6026_v23 = vand.u32 4294901760, %v4490_v11 }
  0xb5   :  { %1302 = vmatprep.mubr.f32.mxu1 %v4312_v13  ;;  %1472 = vmatpush2.msra.mxu0 %v6025_v57  ;;  %v812_v13 = vand.u32 4294901760, %v811_v56  ;;  %v3054_v57 = vld [vmem:[#allocation7 + $0x1b0] sm:$0xff]  ;;  %v6032_v56 = vand.u32 4294901760, %v4516_v39 }
  0xb6   :  { %789 = vmatmul.mubr.f32.gmra.mxu0 %v788_v62  ;;  %1867 = vmatprep.subr.mxu1 %v5808_v45  ;;  %v817_v46 = vsub.f32 %v4490_v11, %v6026_v23  ;;  %v6028_v62 = vld [vmem:[#allocation44_spill] sm:$0xff]  ;;  %v6029_v23 = vand.u32 4294901760, %v4503_v3  ;;  %v4558_v11 = vsub.f32 %v4338_v32, %v4532_v43  ;;  %v4562_v41 = vand.u32 4294901760, %v3054_v57 }
  0xb7   :  { %1304 = vmatmul.mubr.f32.gmra.mxu1 %v4336_v47  ;;  %1473 = vmatprep.subr.mxu0 %v5808_v45  ;;  %v6031_v47 = vld [vmem:[#allocation51_spill] sm:$0xff]  ;;  %v4570_v32 = vsub.f32 %v3053_v52, %v4544_v9  ;;  %v4584_v52 = vand.u32 4294901760, %v4376_v24 }
  0xb8   :  { %1869 = vmatpush2.msra.mxu1 %v6028_v62  ;;  %798 = vmatprep.mubr.f32.mxu0 %v797_v26  ;;  %v826_v14 = vsub.f32 %v4503_v3, %v6029_v23  ;;  %6030 = vst [vmem:[#allocation44_spill] sm:$0xff] %v4558_v11  ;;  %v818_v26 = vand.u32 4294901760, %v817_v46  ;;  %v832_v23 = vsub.f32 %v4516_v39, %v6032_v56  ;;  %v6036_v3 = vand.u32 4294901760, %v4529_v7 }
  0xb9   :  { %1309 = vmatprep.mubr.f32.mxu1 %v4355_v0  ;;  %1476 = vmatpush2.msra.mxu0 %v6031_v47  ;;  %6033 = vst [vmem:[#allocation51_spill] sm:$0xff] %v4570_v32  ;;  %v4576_v0 = vsub.f32 %v4350_v28, %v4549_v29  ;;  %v4589_v28 = vsub.f32 %v3054_v57, %v4562_v41 }
  0xba   :  { %804 = vmatmul.mubr.f32.gmra.mxu0 %v803_v25  ;;  %1870 = vmatprep.subr.mxu1 %v5808_v45  ;;  %v6035_v25 = vld [vmem:[#allocation46_spill] sm:$0xff]  ;;  %v827_v46 = vand.u32 4294901760, %v826_v14  ;;  %v841_v56 = vsub.f32 %v4529_v7, %v6036_v3  ;;  %v6039_v14 = vand.u32 4294901760, %v4542_v34 }
  0xbb   :  { %1311 = vmatmul.mubr.f32.gmra.mxu1 %v4369_v8  ;;  %1477 = vmatprep.subr.mxu0 %v5808_v45  ;;  %6034 = vst [vmem:[#allocation158_spill] sm:$0xff] %v4576_v0  ;;  %v6037_v8 = vld [vmem:[#allocation53_spill] sm:$0xff]  ;;  %6038 = vst [vmem:[#allocation46_spill] sm:$0xff] %v4589_v28  ;;  %v3055_v7 = vld [vmem:[#allocation7 + $0x1c0] sm:$0xff]  ;;  %v6046_v57 = vand.u32 4294901760, %v4576_v0 }
  0xbc   :  { %1872 = vmatpush2.msra.mxu1 %v6035_v25  ;;  %813 = vmatprep.mubr.f32.mxu0 %v812_v13  ;;  %v833_v13 = vand.u32 4294901760, %v832_v23  ;;  %v847_v3 = vsub.f32 %v4542_v34, %v6039_v14  ;;  %v4596_v39 = vand.u32 4294901760, %v3055_v7  ;;  %v6041_v23 = vand.u32 4294901760, %v4558_v11 }
  0xbd   :  { %1316 = vmatprep.mubr.f32.mxu1 %v4387_v30  ;;  %1480 = vmatpush2.msra.mxu0 %v6037_v8  ;;  %v6040_v30 = vld [vmem:[#allocation48_spill] sm:$0xff]  ;;  %v4607_v14 = vsub.f32 %v4376_v24, %v4584_v52 }
  0xbe   :  { %819 = vmatmul.mubr.f32.gmra.mxu0 %v818_v26  ;;  %1873 = vmatprep.subr.mxu1 %v5808_v45  ;;  %v842_v26 = vand.u32 4294901760, %v841_v56  ;;  %v856_v8 = vsub.f32 %v4558_v11, %v6041_v23  ;;  %v6044_v56 = vand.u32 4294901760, %v4570_v32  ;;  %v4620_v24 = vsub.f32 %v3055_v7, %v4596_v39  ;;  %v3056_v11 = vld [vmem:[#allocation7 + $0x1d0] sm:$0xff] }
  0xbf   :  { %1318 = vmatmul.mubr.f32.gmra.mxu1 %v4403_v10  ;;  %1481 = vmatprep.subr.mxu0 %v5808_v45  ;;  %6042 = vst [vmem:[#allocation48_spill] sm:$0xff] %v4607_v14  ;;  %v6043_v10 = vld [vmem:[#allocation55_spill] sm:$0xff]  ;;  %v4622_v34 = vand.u32 4294901760, %v3056_v11  ;;  %v4633_v7 = vsub.f32 %v4396_v35, %v4610_v33 }
  0xc0   :  { %1875 = vmatpush2.msra.mxu1 %v6040_v30  ;;  %828 = vmatprep.mubr.f32.mxu0 %v827_v46  ;;  %v848_v46 = vand.u32 4294901760, %v847_v3  ;;  %v862_v23 = vsub.f32 %v4570_v32, %v6044_v56  ;;  %6045 = vst [vmem:[#allocation159_spill] sm:$0xff] %v4620_v24  ;;  %v857_v3 = vand.u32 4294901760, %v856_v8  ;;  %v4636_v32 = vand.u32 4294901760, %v4435_v50  ;;  %v3057_v56 = vld [vmem:[#allocation7 + $0x1e0] sm:$0xff] }
  0xc1   :  { %1323 = vmatprep.mubr.f32.mxu1 %v4412_v55  ;;  %1484 = vmatpush2.msra.mxu0 %v6043_v10  ;;  %v6047_v55 = vld [vmem:[#allocation50_spill] sm:$0xff]  ;;  %v6050_v10 = vand.u32 4294901760, %v4589_v28  ;;  %v4646_v35 = vsub.f32 %v3056_v11, %v4622_v34 }
  0xc2   :  { %834 = vmatmul.mubr.f32.gmra.mxu0 %v833_v13  ;;  %1876 = vmatprep.subr.mxu1 %v5808_v45  ;;  %v871_v13 = vsub.f32 %v4576_v0, %v6046_v57  ;;  %6048 = vst [vmem:[#allocation50_spill] sm:$0xff] %v4633_v7  ;;  %v863_v8 = vand.u32 4294901760, %v862_v23  ;;  %v4648_v0 = vand.u32 4294901760, %v3057_v56  ;;  %v4659_v11 = vsub.f32 %v4435_v50, %v4636_v32 }
  0xc3   :  { %1325 = vmatmul.mubr.f32.gmra.mxu1 %v4423_v19  ;;  %1485 = vmatprep.subr.mxu0 %v5808_v45  ;;  %v6049_v19 = vld [vmem:[#allocation57_spill] sm:$0xff]  ;;  %v877_v57 = vsub.f32 %v4589_v28, %v6050_v10  ;;  %v6053_v10 = vand.u32 4294901760, %v4607_v14 }
  0xc4   :  { %1878 = vmatpush2.msra.mxu1 %v6047_v55  ;;  %843 = vmatprep.mubr.f32.mxu0 %v842_v26  ;;  %6051 = vst [vmem:[#allocation160_spill] sm:$0xff] %v4648_v0  ;;  %v4662_v26 = vand.u32 4294901760, %v4453_v27  ;;  %v4672_v50 = vsub.f32 %v3057_v56, %v4648_v0 }
  0xc5   :  { %1330 = vmatprep.mubr.f32.mxu1 %v4451_v48  ;;  %1488 = vmatpush2.msra.mxu0 %v6049_v19  ;;  %v872_v48 = vand.u32 4294901760, %v871_v13  ;;  %v6052_v19 = vld [vmem:[#allocation52_spill] sm:$0xff]  ;;  %v878_v13 = vand.u32 4294901760, %v877_v57  ;;  %v6058_v57 = vld [vmem:[#allocation54_spill] sm:$0xff] }
  0xc6   :  { %849 = vmatmul.mubr.f32.gmra.mxu0 %v848_v46  ;;  %1879 = vmatprep.subr.mxu1 %v5808_v45  ;;  %v886_v46 = vsub.f32 %v4607_v14, %v6053_v10  ;;  %6054 = vst [vmem:[#allocation52_spill] sm:$0xff] %v4662_v26  ;;  %v3058_v14 = vld [vmem:[#allocation7 + $0x1f0] sm:$0xff]  ;;  %v4685_v56 = vsub.f32 %v4453_v27, %v4662_v26 }
  0xc7   :  { %1332 = vmatmul.mubr.f32.gmra.mxu1 %v4466_v63  ;;  %1489 = vmatprep.subr.mxu0 %v5808_v45  ;;  %v6055_v63 = vld [vmem:[#allocation58_spill] sm:$0xff]  ;;  %v4674_v28 = vand.u32 4294901760, %v3058_v14  ;;  %v6062_v27 = vld [vmem:[#allocation56_spill] sm:$0xff] }
  0xc8   :  { %1881 = vmatpush2.msra.mxu1 %v6052_v19  ;;  %858 = vmatprep.mubr.f32.mxu0 %v857_v3  ;;  %v6056_v3 = vand.u32 4294901760, %v4620_v24 }
  0xc9   :  { %1337 = vmatprep.mubr.f32.mxu1 %v4480_v51  ;;  %1492 = vmatpush2.msra.mxu0 %v6055_v63  ;;  %6057 = vst [vmem:[#allocation58_spill] sm:$0xff] %v4674_v28  ;;  %v6059_v51 = vand.u32 4294901760, %v4633_v7  ;;  %v4695_v23 = vsub.f32 %v3058_v14, %v4674_v28 }
  0xca   :  { %864 = vmatmul.mubr.f32.gmra.mxu0 %v863_v8  ;;  %1882 = vmatprep.subr.mxu1 %v5808_v45  ;;  %v892_v10 = vsub.f32 %v4620_v24, %v6056_v3  ;;  %v887_v8 = vand.u32 4294901760, %v886_v46  ;;  %v6060_v24 = vld [vmem:[#allocation59_spill] sm:$0xff] }
  0xcb   :  { %1339 = vmatmul.mubr.f32.gmra.mxu1 %v4492_v42  ;;  %1493 = vmatprep.subr.mxu0 %v5808_v45  ;;  %v901_v3 = vsub.f32 %v4633_v7, %v6059_v51  ;;  %v5773_v51 = vand.u32 4294901760, %v4672_v50  ;;  %v5772_v7 = vand.u32 4294901760, %v4685_v56 }
  0xcc   :  { %1884 = vmatpush2.msra.mxu1 %v6058_v57  ;;  %873 = vmatprep.mubr.f32.mxu0 %v872_v48  ;;  %v893_v42 = vand.u32 4294901760, %v892_v10  ;;  %v6061_v48 = vand.u32 4294901760, %v4646_v35 }
  0xcd   :  { %1344 = vmatprep.mubr.f32.mxu1 %v4506_v38  ;;  %1496 = vmatpush2.msra.mxu0 %v6060_v24  ;;  %v6063_v38 = vand.u32 4294901760, %v4659_v11 }
  0xce   :  { %879 = vmatmul.mubr.f32.gmra.mxu0 %v878_v13  ;;  %1885 = vmatprep.subr.mxu1 %v5808_v45  ;;  %v907_v46 = vsub.f32 %v4646_v35, %v6061_v48  ;;  %v902_v13 = vand.u32 4294901760, %v901_v3  ;;  %v6064_v48 = vld [vmem:[#allocation61_spill] sm:$0xff] }
  0xcf   :  { %1346 = vmatmul.mubr.f32.gmra.mxu1 %v4518_v60  ;;  %1497 = vmatprep.subr.mxu0 %v5808_v45  ;;  %v916_v10 = vsub.f32 %v4659_v11, %v6063_v38  ;;  %v922_v60 = vsub.f32 %v4672_v50, %v5773_v51 }
  0xd0   :  { %1887 = vmatpush2.msra.mxu1 %v6062_v27  ;;  %888 = vmatprep.mubr.f32.mxu0 %v887_v8  ;;  %v908_v14 = vand.u32 4294901760, %v907_v46  ;;  %v5771_v8 = vand.u32 4294901760, %v4695_v23 }
  0xd1   :  { %1351 = vmatprep.mubr.f32.mxu1 %v4532_v43  ;;  %1500 = vmatpush2.msra.mxu0 %v6064_v48  ;;  %v917_v38 = vand.u32 4294901760, %v916_v10  ;;  %v923_v3 = vand.u32 4294901760, %v922_v60  ;;  %v6065_v10 = vld [vmem:[#allocation69_spill] sm:$0xff] }
  0xd2   :  { %894 = vmatmul.mubr.f32.gmra.mxu0 %v893_v42  ;;  %1888 = vmatprep.subr.mxu1 %v5808_v45  ;;  %v931_v42 = vsub.f32 %v4685_v56, %v5772_v7  ;;  %v937_v46 = vsub.f32 %v4695_v23, %v5771_v8  ;;  %v6067_v8 = vld [vmem:[#allocation73_spill] sm:$0xff]  ;;  %v6074_v7 = vld [vmem:[#allocation76_spill] sm:$0xff] }
  0xd3   :  { %1353 = vmatmul.mubr.f32.gmra.mxu1 %v4544_v9  ;;  %1501 = vmatprep.subr.mxu0 %v5808_v45 }
  0xd4   :  { %1890 = vmatpush2.msra.mxu1 %v3559_v12  ;;  %903 = vmatprep.mubr.f32.mxu0 %v902_v13  ;;  %v932_v13 = vand.u32 4294901760, %v931_v42  ;;  %v938_v60 = vand.u32 4294901760, %v937_v46  ;;  %v6069_v42 = vld [vmem:[#allocation64_spill] sm:$0xff] }
  0xd5   :  { %1358 = vmatprep.mubr.f32.mxu1 %v4549_v29  ;;  %1504 = vmatpush2.msra.mxu0 %v3633_v22  ;;  %v6071_v46 = vld [vmem:[#allocation72_spill] sm:$0xff]  ;;  %v6075_v51 = vand.u32 4294901760, %v6069_v42 }
  0xd6   :  { %909 = vmatmul.mubr.f32.gmra.mxu0 %v908_v14  ;;  %1891 = vmatprep.subr.mxu1 %v5808_v45  ;;  %v6066_v14 = vld [vmem:[#allocation62_spill] sm:$0xff] }
  0xd7   :  { %1360 = vmatmul.mubr.f32.gmra.mxu1 %v4562_v41  ;;  %1505 = vmatprep.subr.mxu0 %v5808_v45 }
  0xd8   :  { %1893 = vmatpush2.msra.mxu1 %v3582_v53  ;;  %918 = vmatprep.mubr.f32.mxu0 %v917_v38  ;;  %v6068_v38 = vld [vmem:[#allocation66_spill] sm:$0xff] }
  0xd9   :  { %1365 = vmatprep.mubr.f32.mxu1 %v4584_v52  ;;  %1508 = vmatpush2.msra.mxu0 %v6065_v10 }
  0xda   :  { %924 = vmatmul.mubr.f32.gmra.mxu0 %v923_v3  ;;  %1894 = vmatprep.subr.mxu1 %v5808_v45  ;;  %v6070_v3 = vld [vmem:[#allocation68_spill] sm:$0xff] }
  0xdb   :  { %1367 = vmatmul.mubr.f32.gmra.mxu1 %v4596_v39  ;;  %1509 = vmatprep.subr.mxu0 %v5808_v45 }
  0xdc   :  { %1896 = vmatpush2.msra.mxu1 %v6066_v14  ;;  %933 = vmatprep.mubr.f32.mxu0 %v932_v13  ;;  %v6072_v13 = vld [vmem:[#allocation70_spill] sm:$0xff] }
  0xdd   :  { %1372 = vmatprep.mubr.f32.mxu1 %v4610_v33  ;;  %1512 = vmatpush2.msra.mxu0 %v6067_v8 }
  0xde   :  { %939 = vmatmul.mubr.f32.gmra.mxu0 %v938_v60  ;;  %1513 = vmatprep.subr.mxu0 %v5808_v45  ;;  %v6073_v60 = vld [vmem:[#allocation74_spill] sm:$0xff] }
  0xdf   :  { %1374 = vmatmul.mubr.f32.gmra.mxu1 %v4622_v34  ;;  %1897 = vmatprep.subr.mxu1 %v5808_v45 }
  0xe0   :  { %1516 = vmatpush2.msra.mxu0 %v3753_v44  ;;  %1899 = vmatpush2.msra.mxu1 %v6068_v38 }
  0xe1   :  { %1517 = vmatprep.subr.mxu0 %v5808_v45  ;;  %1379 = vmatprep.mubr.f32.mxu1 %v4636_v32 }
  0xe2   :  { %1520 = vmatpush2.msra.mxu0 %v3756_v59  ;;  %1523 = vmatprep.mubr.f32.mxu0 %v6069_v42  ;;  %v6089_v42 = vand.u32 4294901760, %v3830_v49 }
  0xe3   :  { %1381 = vmatmul.mubr.f32.gmra.mxu1 %v4648_v0  ;;  %1526 = vmatmul.mubr.f32.vlgmr.msra.gmra.mxu0 %v6070_v3  ;;  %v6078_v0 = vand.u32 4294901760, %v6072_v13 }
  0xe4   :  { %1900 = vmatprep.subr.mxu1 %v5808_v45  ;;  %1386 = vmatprep.mubr.f32.mxu1 %v4662_v26  ;;  %v6076_v26 = vand.u32 4294901760, %v3204_v15  ;;  %v6080_v15 = vand.u32 4294901760, %v6073_v60 }
  0xe5   :  { %1902 = vmatpush2.msra.mxu1 %v6071_v46  ;;  %1532 = vmatprep.mubr.f32.mxu0 %v6072_v13 }
  0xe6   :  { %1903 = vmatprep.subr.mxu1 %v5808_v45  ;;  %2259 = vmatprep.subr.mxu0 %v5808_v45 }
  0xe7   :  { %1388 = vmatmul.mubr.f32.gmra.mxu1 %v4674_v28  ;;  %1535 = vmatmul.mubr.f32.gmra.mxu0 %v6073_v60  ;;  %v6077_v28 = vand.u32 4294901760, %v6070_v3  ;;  %v6096_v60 = vand.u32 4294901760, %v3865_v17 }
  0xe8   :  { %1905 = vmatpush2.msra.mxu1 %v3704_v36  ;;  %1541 = vmatprep.mubr.f32.mxu0 %v6074_v7 }
  0xe9   :  { %1909 = vmatprep.mubr.f32.mxu1 %v6075_v51  ;;  %2263 = vmatpush1.msra.mxu0 %v6076_v26  ;;  %v6079_v51 = vand.u32 4294901760, %v3207_v16  ;;  %v6084_v16 = vand.u32 4294901760, %v3772_v31  ;;  %v6086_v26 = vand.u32 4294901760, %v3810_v40 }
  0xea   :  { %2644 = vmatprep.subr.mxu1 %v5808_v45  ;;  %2264 = vmatprep.subr.mxu0 %v5808_v45 }
  0xeb   :  { %1544 = vmatmul.mubr.f32.gmra.mxu0 %v3772_v31  ;;  %1913 = vmatmul.mubr.f32.vlgmr.msra.gmra.mxu1 %v6077_v28  ;;  %v6082_v28 = vand.u32 4294901760, %v6074_v7  ;;  %v6087_v7 = vand.u32 4294901760, %v3216_v20  ;;  %v6090_v31 = vld [vmem:[#allocation14_spill] sm:$0xff] }
  0xec   :  { %2646 = vmatpush1.msra.mxu1 %v3190_v4  ;;  %1550 = vmatprep.mubr.f32.mxu0 %v3810_v40  ;;  %v6081_v4 = vld [vmem:[#allocation81_spill] sm:$0xff]  ;;  %v6093_v40 = vld [vmem:[#allocation18_spill] sm:$0xff] }
  0xed   :  { %1920 = vmatprep.mubr.f32.mxu1 %v6078_v0  ;;  %2268 = vmatpush1.msra.mxu0 %v6079_v51  ;;  %v6083_v0 = vand.u32 4294901760, %v3212_v18  ;;  %v6088_v18 = vld [vmem:[#allocation87_spill] sm:$0xff]  ;;  %v6092_v3 = vand.u32 4294901760, %v6081_v4  ;;  %v6094_v13 = vand.u32 4294901760, %v6093_v40  ;;  %v6095_v20 = vld [vmem:[#allocation90_spill] sm:$0xff]  ;;  %v6098_v51 = vld [vmem:[#allocation92_spill] sm:$0xff] }
  0xee   :  { %2647 = vmatprep.subr.mxu1 %v5808_v45  ;;  %2269 = vmatprep.subr.mxu0 %v5808_v45  ;;  %v6112_v40 = vld [vmem:[#allocation100_spill] sm:$0xff] }
  0xef   :  { %1553 = vmatmul.mubr.f32.gmra.mxu0 %v3830_v49  ;;  %1924 = vmatmul.mubr.f32.gmra.mxu1 %v6080_v15  ;;  %v6097_v49 = vld [vmem:[#allocation15_spill] sm:$0xff] }
  0xf0   :  { %2649 = vmatpush1.msra.mxu1 %v3192_v5  ;;  %1559 = vmatprep.mubr.f32.mxu0 %v6081_v4  ;;  %v6085_v5 = vld [vmem:[#allocation85_spill] sm:$0xff] }
  0xf1   :  { %1931 = vmatprep.mubr.f32.mxu1 %v6082_v28  ;;  %2273 = vmatpush1.msra.mxu0 %v6083_v0  ;;  %v6099_v15 = vand.u32 4294901760, %v6085_v5  ;;  %v6100_v4 = vld [vmem:[#allocation21_spill] sm:$0xff]  ;;  %v6102_v0 = vld [vmem:[#allocation94_spill] sm:$0xff] }
  0xf2   :  { %2650 = vmatprep.subr.mxu1 %v5808_v45  ;;  %2274 = vmatprep.subr.mxu0 %v5808_v45  ;;  %v6101_v28 = vand.u32 4294901760, %v6100_v4  ;;  %v6119_v4 = vld [vmem:[#allocation104_spill] sm:$0xff] }
  0xf3   :  { %1562 = vmatmul.mubr.f32.gmra.mxu0 %v3865_v17  ;;  %1935 = vmatmul.mubr.f32.gmra.mxu1 %v6084_v16  ;;  %v6103_v16 = vand.u32 4294901760, %v6088_v18  ;;  %v6104_v17 = vld [vmem:[#allocation16_spill] sm:$0xff] }
  0xf4   :  { %2652 = vmatpush1.msra.mxu1 %v3194_v6  ;;  %1568 = vmatprep.mubr.f32.mxu0 %v6085_v5  ;;  %v6091_v6 = vld [vmem:[#allocation88_spill] sm:$0xff]  ;;  %v6107_v5 = vld [vmem:[#allocation22_spill] sm:$0xff] }
  0xf5   :  { %1942 = vmatprep.mubr.f32.mxu1 %v6086_v26  ;;  %2278 = vmatpush1.msra.mxu0 %v6087_v7  ;;  %v6105_v26 = vld [vmem:[#allocation97_spill] sm:$0xff]  ;;  %v6106_v7 = vand.u32 4294901760, %v6091_v6 }
  0xf6   :  { %2653 = vmatprep.subr.mxu1 %v5808_v45  ;;  %2279 = vmatprep.subr.mxu0 %v5808_v45 }
  0xf7   :  { %1571 = vmatmul.mubr.f32.gmra.mxu0 %v6088_v18  ;;  %1946 = vmatmul.mubr.f32.gmra.mxu1 %v6089_v42  ;;  %v6108_v42 = vand.u32 4294901760, %v6107_v5  ;;  %v6111_v18 = vld [vmem:[#allocation17_spill] sm:$0xff]  ;;  %v6126_v5 = vld [vmem:[#allocation108_spill] sm:$0xff] }
  0xf8   :  { %2655 = vmatpush1.msra.mxu1 %v6090_v31  ;;  %1577 = vmatprep.mubr.f32.mxu0 %v6091_v6  ;;  %v6109_v31 = vld [vmem:[#allocation98_spill] sm:$0xff]  ;;  %v6114_v6 = vld [vmem:[#allocation24_spill] sm:$0xff] }
  0xf9   :  { %1953 = vmatprep.mubr.f32.mxu1 %v6092_v3  ;;  %2283 = vmatpush1.msra.mxu0 %v6094_v13  ;;  %v6110_v3 = vand.u32 4294901760, %v6095_v20  ;;  %v6113_v13 = vand.u32 4294901760, %v6098_v51 }
  0xfa   :  { %2656 = vmatprep.subr.mxu1 %v5808_v45  ;;  %2284 = vmatprep.subr.mxu0 %v5808_v45 }
  0xfb   :  { %1580 = vmatmul.mubr.f32.gmra.mxu0 %v6095_v20  ;;  %1957 = vmatmul.mubr.f32.gmra.mxu1 %v6096_v60  ;;  %v6115_v60 = vand.u32 4294901760, %v6114_v6  ;;  %v6118_v20 = vld [vmem:[#allocation19_spill] sm:$0xff]  ;;  %v6133_v6 = vld [vmem:[#allocation109_spill] sm:$0xff] }
  0xfc   :  { %2658 = vmatpush1.msra.mxu1 %v6097_v49  ;;  %1586 = vmatprep.mubr.f32.mxu0 %v6098_v51  ;;  %v6116_v49 = vld [vmem:[#allocation103_spill] sm:$0xff]  ;;  %v6121_v51 = vld [vmem:[#allocation26_spill] sm:$0xff] }
  0xfd   :  { %1964 = vmatprep.mubr.f32.mxu1 %v6099_v15  ;;  %2288 = vmatpush1.msra.mxu0 %v6101_v28  ;;  %v6117_v15 = vand.u32 4294901760, %v6102_v0  ;;  %v6120_v28 = vand.u32 4294901760, %v6105_v26 }
  0xfe   :  { %2659 = vmatprep.subr.mxu1 %v5808_v45  ;;  %2289 = vmatprep.subr.mxu0 %v5808_v45 }
  0xff   :  { %1589 = vmatmul.mubr.f32.gmra.mxu0 %v6102_v0  ;;  %1968 = vmatmul.mubr.f32.gmra.mxu1 %v6103_v16  ;;  %v6122_v16 = vand.u32 4294901760, %v6121_v51  ;;  %v6125_v0 = vld [vmem:[#allocation20_spill] sm:$0xff] }
 0x100   :  { %2661 = vmatpush1.msra.mxu1 %v6104_v17  ;;  %1595 = vmatprep.mubr.f32.mxu0 %v6105_v26  ;;  %v6123_v17 = vld [vmem:[#allocation106_spill] sm:$0xff]  ;;  %v6128_v26 = vld [vmem:[#allocation28_spill] sm:$0xff] }
 0x101   :  { %1975 = vmatprep.mubr.f32.mxu1 %v6106_v7  ;;  %2293 = vmatpush1.msra.mxu0 %v6108_v42  ;;  %v6124_v7 = vand.u32 4294901760, %v6109_v31  ;;  %v6127_v42 = vand.u32 4294901760, %v6112_v40  ;;  %v6140_v51 = vld [vmem:[#allocation116_spill] sm:$0xff] }
 0x102   :  { %2662 = vmatprep.subr.mxu1 %v5808_v45  ;;  %2294 = vmatprep.subr.mxu0 %v5808_v45 }
 0x103   :  { %1598 = vmatmul.mubr.f32.gmra.mxu0 %v6109_v31  ;;  %1979 = vmatmul.mubr.f32.gmra.mxu1 %v6110_v3  ;;  %v6129_v3 = vand.u32 4294901760, %v6128_v26  ;;  %v6132_v31 = vld [vmem:[#allocation23_spill] sm:$0xff]  ;;  %v6147_v26 = vand.u32 4294901760, %v6133_v6 }
 0x104   :  { %2664 = vmatpush1.msra.mxu1 %v6111_v18  ;;  %1604 = vmatprep.mubr.f32.mxu0 %v6112_v40  ;;  %v6130_v18 = vld [vmem:[#allocation111_spill] sm:$0xff]  ;;  %v6135_v40 = vld [vmem:[#allocation30_spill] sm:$0xff] }
 0x105   :  { %1986 = vmatprep.mubr.f32.mxu1 %v6113_v13  ;;  %2298 = vmatpush1.msra.mxu0 %v6115_v60  ;;  %v6131_v13 = vand.u32 4294901760, %v6116_v49  ;;  %v6134_v60 = vand.u32 4294901760, %v6119_v4 }
 0x106   :  { %2665 = vmatprep.subr.mxu1 %v5808_v45  ;;  %2299 = vmatprep.subr.mxu0 %v5808_v45 }
 0x107   :  { %1607 = vmatmul.mubr.f32.gmra.mxu0 %v6116_v49  ;;  %1990 = vmatmul.mubr.f32.gmra.mxu1 %v6117_v15  ;;  %v6136_v15 = vand.u32 4294901760, %v6135_v40  ;;  %v6139_v49 = vld [vmem:[#allocation25_spill] sm:$0xff] }
 0x108   :  { %2667 = vmatpush1.msra.mxu1 %v6118_v20  ;;  %1613 = vmatprep.mubr.f32.mxu0 %v6119_v4  ;;  %v6137_v20 = vld [vmem:[#allocation113_spill] sm:$0xff]  ;;  %v6142_v4 = vld [vmem:[#allocation32_spill] sm:$0xff] }
 0x109   :  { %1997 = vmatprep.mubr.f32.mxu1 %v6120_v28  ;;  %2303 = vmatpush1.msra.mxu0 %v6122_v16  ;;  %v6138_v28 = vand.u32 4294901760, %v6123_v17  ;;  %v6141_v16 = vand.u32 4294901760, %v6126_v5 }
 0x10a   :  { %2668 = vmatprep.subr.mxu1 %v5808_v45  ;;  %2304 = vmatprep.subr.mxu0 %v5808_v45 }
 0x10b   :  { %1616 = vmatmul.mubr.f32.gmra.mxu0 %v6123_v17  ;;  %2001 = vmatmul.mubr.f32.gmra.mxu1 %v6124_v7  ;;  %v6143_v7 = vand.u32 4294901760, %v6142_v4  ;;  %v6146_v17 = vld [vmem:[#allocation119_spill] sm:$0xff] }
 0x10c   :  { %2670 = vmatpush1.msra.mxu1 %v6125_v0  ;;  %1622 = vmatprep.mubr.f32.mxu0 %v6126_v5  ;;  %v6144_v0 = vld [vmem:[#allocation117_spill] sm:$0xff]  ;;  %v6148_v5 = vld [vmem:[#allocation34_spill] sm:$0xff] }
 0x10d   :  { %2008 = vmatprep.mubr.f32.mxu1 %v6127_v42  ;;  %2308 = vmatpush1.msra.mxu0 %v6129_v3  ;;  %v6145_v42 = vand.u32 4294901760, %v6130_v18  ;;  %v6149_v3 = vand.u32 4294901760, %v6148_v5 }
 0x10e   :  { %2671 = vmatprep.subr.mxu1 %v5808_v45  ;;  %2309 = vmatprep.subr.mxu0 %v5808_v45 }
 0x10f   :  { %1625 = vmatmul.mubr.f32.gmra.mxu0 %v6130_v18  ;;  %2012 = vmatmul.mubr.f32.gmra.mxu1 %v6131_v13  ;;  %v6150_v13 = vld [vmem:[#allocation121_spill] sm:$0xff] }
 0x110   :  { %2673 = vmatpush1.msra.mxu1 %v6132_v31  ;;  %1631 = vmatprep.mubr.f32.mxu0 %v6133_v6  ;;  %v6151_v31 = vand.u32 4294901760, %v6137_v20  ;;  %v6152_v18 = vld [vmem:[#allocation29_spill] sm:$0xff] }
 0x111   :  { %2019 = vmatprep.mubr.f32.mxu1 %v6134_v60  ;;  %2313 = vmatpush1.msra.mxu0 %v6136_v15  ;;  %v6154_v60 = vand.u32 4294901760, %v6140_v51  ;;  %v6155_v6 = vld [vmem:[#allocation37_spill] sm:$0xff]  ;;  %v6157_v15 = vld [vmem:[#allocation126_spill] sm:$0xff] }
 0x112   :  { %2674 = vmatprep.subr.mxu1 %v5808_v45  ;;  %2314 = vmatprep.subr.mxu0 %v5808_v45  ;;  %v6156_v40 = vand.u32 4294901760, %v6155_v6 }
 0x113   :  { %1634 = vmatmul.mubr.f32.gmra.mxu0 %v6137_v20  ;;  %2023 = vmatmul.mubr.f32.gmra.mxu1 %v6138_v28  ;;  %v6158_v28 = vand.u32 4294901760, %v6144_v0  ;;  %v6159_v20 = vld [vmem:[#allocation31_spill] sm:$0xff] }
 0x114   :  { %2676 = vmatpush1.msra.mxu1 %v6139_v49  ;;  %1640 = vmatprep.mubr.f32.mxu0 %v6140_v51  ;;  %v6160_v49 = vld [vmem:[#allocation128_spill] sm:$0xff]  ;;  %v6162_v51 = vld [vmem:[#allocation39_spill] sm:$0xff] }
 0x115   :  { %2030 = vmatprep.mubr.f32.mxu1 %v6141_v16  ;;  %2318 = vmatpush1.msra.mxu0 %v6143_v7  ;;  %v6161_v16 = vand.u32 4294901760, %v6146_v17  ;;  %v6163_v4 = vand.u32 4294901760, %v6162_v51  ;;  %v6177_v51 = vld [vmem:[#allocation138_spill] sm:$0xff] }
 0x116   :  { %2677 = vmatprep.subr.mxu1 %v5808_v45  ;;  %2319 = vmatprep.subr.mxu0 %v5808_v45 }
 0x117   :  { %1643 = vmatmul.mubr.f32.gmra.mxu0 %v6144_v0  ;;  %2034 = vmatmul.mubr.f32.gmra.mxu1 %v6145_v42  ;;  %v6164_v42 = vld [vmem:[#allocation129_spill] sm:$0xff]  ;;  %v6165_v0 = vand.u32 4294901760, %v6150_v13 }
 0x118   :  { %2679 = vmatpush1.msra.mxu1 %v5967_v21  ;;  %1649 = vmatprep.mubr.f32.mxu0 %v6146_v17  ;;  %v6153_v21 = vld [vmem:[#allocation123_spill] sm:$0xff] }
 0x119   :  { %2041 = vmatprep.mubr.f32.mxu1 %v6147_v26  ;;  %2323 = vmatpush1.msra.mxu0 %v6149_v3  ;;  %v6166_v26 = vld [vmem:[#allocation33_spill] sm:$0xff]  ;;  %v6167_v3 = vld [vmem:[#allocation131_spill] sm:$0xff]  ;;  %v6168_v17 = vand.u32 4294901760, %v6153_v21 }
 0x11a   :  { %2680 = vmatprep.subr.mxu1 %v5808_v45  ;;  %2324 = vmatprep.subr.mxu0 %v5808_v45 }
 0x11b   :  { %1652 = vmatmul.mubr.f32.gmra.mxu0 %v6150_v13  ;;  %2045 = vmatmul.mubr.f32.gmra.mxu1 %v6151_v31  ;;  %v6169_v31 = vand.u32 4294901760, %v5994_v37  ;;  %v6171_v13 = vand.u32 4294901760, %v6157_v15  ;;  %v6174_v37 = vand.u32 4294901760, %v6002_v61 }
 0x11c   :  { %2682 = vmatpush1.msra.mxu1 %v6152_v18  ;;  %1658 = vmatprep.mubr.f32.mxu0 %v6153_v21  ;;  %v6173_v21 = vand.u32 4294901760, %v6160_v49 }
 0x11d   :  { %2052 = vmatprep.mubr.f32.mxu1 %v6154_v60  ;;  %2328 = vmatpush1.msra.mxu0 %v6156_v40  ;;  %v6170_v60 = vld [vmem:[#allocation133_spill] sm:$0xff]  ;;  %v6172_v40 = vld [vmem:[#allocation27_spill] sm:$0xff] }
 0x11e   :  { %2683 = vmatprep.subr.mxu1 %v5808_v45  ;;  %2329 = vmatprep.subr.mxu0 %v5808_v45 }
 0x11f   :  { %1661 = vmatmul.mubr.f32.gmra.mxu0 %v6157_v15  ;;  %2056 = vmatmul.mubr.f32.gmra.mxu1 %v6158_v28  ;;  %v6176_v15 = vand.u32 4294901760, %v6164_v42 }
 0x120   :  { %2685 = vmatpush1.msra.mxu1 %v6159_v20  ;;  %1667 = vmatprep.mubr.f32.mxu0 %v6160_v49 }
 0x121   :  { %2063 = vmatprep.mubr.f32.mxu1 %v6161_v16  ;;  %2333 = vmatpush1.msra.mxu0 %v6163_v4  ;;  %v475_v7 = vpop.f32.mrf.mxu0  ;;  %v6175_v16 = vld [vmem:[#allocation136_spill] sm:$0xff]  ;;  %v6178_v4 = vand.u32 4294901760, %v6167_v3 }
 0x122   :  { %2686 = vmatprep.subr.mxu1 %v5808_v45  ;;  %2334 = vmatprep.subr.mxu0 %v5808_v45 }
 0x123   :  { %1670 = vmatmul.mubr.f32.gmra.mxu0 %v6164_v42  ;;  %2067 = vmatmul.mubr.f32.gmra.mxu1 %v6165_v0  ;;  %v477_v5 = vpop.f32.mrf.mxu0  ;;  %v6179_v0 = vand.u32 4294901760, %v6010_v58 }
 0x124   :  { %2688 = vmatpush1.msra.mxu1 %v6166_v26  ;;  %1676 = vmatprep.mubr.f32.mxu0 %v6167_v3 }
 0x125   :  { %2074 = vmatprep.mubr.f32.mxu1 %v6168_v17  ;;  %2338 = vmatpush1.msra.mxu0 %v6169_v31  ;;  %v490_v18 = vpop.f32.mrf.mxu0  ;;  %v6182_v17 = vld [vmem:[#allocation142_spill] sm:$0xff]  ;;  %v6183_v31 = vand.u32 4294901760, %v6172_v40 }
 0x126   :  { %2689 = vmatprep.subr.mxu1 %v5808_v45  ;;  %2339 = vmatprep.subr.mxu0 %v5808_v45 }
 0x127   :  { %1679 = vmatmul.mubr.f32.gmra.mxu0 %v6170_v60  ;;  %2078 = vmatmul.mubr.f32.gmra.mxu1 %v6171_v13  ;;  %v492_v6 = vpop.f32.mrf.mxu0  ;;  %v6184_v13 = vld [vmem:[#allocation47_spill] sm:$0xff] }
 0x128   :  { %2691 = vmatpush1.msra.mxu1 %v5999_v54  ;;  %1685 = vmatprep.mubr.f32.mxu0 %v6172_v40  ;;  %v6185_v6 = vand.u32 4294901760, %v6184_v13  ;;  %v6196_v13 = vand.u32 4294901760, %v6182_v17 }
 0x129   :  { %2085 = vmatprep.mubr.f32.mxu1 %v6173_v21  ;;  %2343 = vmatpush2.msra.mxu0 %v6174_v37 }
 0x12a   :  { %v505_v28 = vpop.f32.mrf.mxu0  ;;  %2692 = vmatprep.subr.mxu1 %v5808_v45  ;;  %2344 = vmatprep.subr.mxu0 %v5808_v45 }
 0x12b   :  { %v1172_v20 = vpop.f32.mrf.mxu1  ;;  %1688 = vmatmul.mubr.f32.gmra.mxu0 %v6175_v16  ;;  %2089 = vmatmul.mubr.f32.gmra.mxu1 %v6176_v15  ;;  %v6189_v15 = vld [vmem:[#allocation147_spill] sm:$0xff] }
 0x12c   :  { %v4940_v54 = vadd.f32 %v1172_v20, %v475_v7  ;;  %2694 = vmatpush2.msra.mxu1 %v6006_v1  ;;  %v507_v49 = vpop.f32.mrf.mxu0  ;;  %1694 = vmatprep.mubr.f32.mxu0 %v6177_v51  ;;  %v6180_v7 = vld [vmem:[#allocation140_spill] sm:$0xff]  ;;  %v6181_v1 = vand.u32 4294901760, %v6170_v60  ;;  %v6188_v20 = vld [vmem:[#allocation42_spill] sm:$0xff] }
 0x12d   :  { %v1174_v61 = vpop.f32.mrf.mxu1  ;;  %2096 = vmatprep.mubr.f32.mxu1 %v6178_v4  ;;  %2348 = vmatpush2.msra.mxu0 %v6179_v0  ;;  %v6191_v4 = vld [vmem:[#allocation49_spill] sm:$0xff] }
 0x12e   :  { %v520_v26 = vpop.f32.mrf.mxu0  ;;  %2695 = vmatprep.subr.mxu1 %v5808_v45  ;;  %2349 = vmatprep.subr.mxu0 %v5808_v45  ;;  %v6190_v61 = vand.u32 4294901760, %v6177_v51  ;;  %v6192_v0 = vand.u32 4294901760, %v6191_v4 }
 0x12f   :  { %v1179_v42 = vpop.f32.mrf.mxu1  ;;  %1697 = vmatmul.mubr.f32.gmra.mxu0 %v6180_v7  ;;  %2100 = vmatmul.mubr.f32.gmra.mxu1 %v6181_v1  ;;  %v6194_v1 = vand.u32 4294901760, %v6180_v7 }
 0x130   :  { %v4953_v5 = vadd.f32 %v1179_v42, %v490_v18  ;;  %2697 = vmatpush2.msra.mxu1 %v6015_v2  ;;  %v522_v3 = vpop.f32.mrf.mxu0  ;;  %1703 = vmatprep.mubr.f32.mxu0 %v6182_v17  ;;  %v6186_v18 = vld [vmem:[#allocation144_spill] sm:$0xff]  ;;  %v6187_v2 = vand.u32 4294901760, %v6175_v16 }
 0x131   :  { %v1181_v58 = vpop.f32.mrf.mxu1  ;;  %2107 = vmatprep.mubr.f32.mxu1 %v6183_v31  ;;  %2353 = vmatpush2.msra.mxu0 %v6185_v6  ;;  %v6197_v6 = vand.u32 4294901760, %v6031_v47 }
 0x132   :  { %v535_v21 = vpop.f32.mrf.mxu0  ;;  %2698 = vmatprep.subr.mxu1 %v5808_v45  ;;  %2354 = vmatprep.subr.mxu0 %v5808_v45  ;;  %v6195_v58 = vld [vmem:[#allocation149_spill] sm:$0xff] }
 0x133   :  { %v1186_v60 = vpop.f32.mrf.mxu1  ;;  %1706 = vmatmul.mubr.f32.gmra.mxu0 %v6186_v18  ;;  %2111 = vmatmul.mubr.f32.gmra.mxu1 %v6187_v2 }
 0x134   :  { %v4966_v37 = vadd.f32 %v1186_v60, %v505_v28  ;;  %2700 = vmatpush2.msra.mxu1 %v6188_v20  ;;  %v537_v40 = vpop.f32.mrf.mxu0  ;;  %1712 = vmatprep.mubr.f32.mxu0 %v6189_v15  ;;  %v6193_v28 = vld [vmem:[#allocation148_spill] sm:$0xff]  ;;  %v6200_v20 = vld [vmem:[#allocation38_spill] sm:$0xff] }
 0x135   :  { %v1188_v49 = vpop.f32.mrf.mxu1  ;;  %2118 = vmatprep.mubr.f32.mxu1 %v6190_v61  ;;  %2358 = vmatpush2.msra.mxu0 %v6192_v0  ;;  %v6201_v40 = vand.u32 4294901760, %v6189_v15 }
 0x136   :  { %v550_v42 = vpop.f32.mrf.mxu0  ;;  %2701 = vmatprep.subr.mxu1 %v5808_v45  ;;  %2359 = vmatprep.subr.mxu0 %v5808_v45  ;;  %v6202_v49 = vld [vmem:[#allocation53_spill] sm:$0xff] }
 0x137   :  { %v1193_v16 = vpop.f32.mrf.mxu1  ;;  %1715 = vmatmul.mubr.f32.gmra.mxu0 %v6193_v28  ;;  %2122 = vmatmul.mubr.f32.gmra.mxu1 %v6194_v1  ;;  %v6203_v61 = vand.u32 4294901760, %v6202_v49 }
 0x138   :  { %v4979_v3 = vadd.f32 %v1193_v16, %v520_v26  ;;  %2703 = vmatpush2.msra.mxu1 %v6028_v62  ;;  %v552_v51 = vpop.f32.mrf.mxu0  ;;  %1721 = vmatprep.mubr.f32.mxu0 %v6195_v58  ;;  %v6198_v26 = vld [vmem:[#allocation43_spill] sm:$0xff]  ;;  %v6199_v62 = vand.u32 4294901760, %v6186_v18  ;;  %v6206_v16 = vld [vmem:[#allocation40_spill] sm:$0xff] }
 0x139   :  { %v1195_v31 = vpop.f32.mrf.mxu1  ;;  %2129 = vmatprep.mubr.f32.mxu1 %v6196_v13  ;;  %2363 = vmatpush2.msra.mxu0 %v6197_v6  ;;  %v6207_v51 = vand.u32 4294901760, %v6195_v58 }
 0x13a   :  { %v565_v60 = vpop.f32.mrf.mxu0  ;;  %2704 = vmatprep.subr.mxu1 %v5808_v45  ;;  %2364 = vmatprep.subr.mxu0 %v5808_v45  ;;  %v6208_v31 = vld [vmem:[#allocation55_spill] sm:$0xff] }
 0x13b   :  { %v1200_v7 = vpop.f32.mrf.mxu1  ;;  %1724 = vmatmul.mubr.f32.gmra.mxu0 %v6198_v26  ;;  %2133 = vmatmul.mubr.f32.gmra.mxu1 %v6199_v62  ;;  %v6209_v13 = vand.u32 4294901760, %v6208_v31  ;;  %v6212_v62 = vld [vmem:[#allocation156_spill] sm:$0xff] }
 0x13c   :  { %v4992_v2 = vadd.f32 %v1200_v7, %v535_v21  ;;  %2706 = vmatpush2.msra.mxu1 %v6035_v25  ;;  %v567_v17 = vpop.f32.mrf.mxu0  ;;  %1730 = vmatprep.mubr.f32.mxu0 %v6200_v20  ;;  %v6204_v21 = vld [vmem:[#allocation45_spill] sm:$0xff]  ;;  %v6205_v25 = vand.u32 4294901760, %v6193_v28 }
 0x13d   :  { %v1202_v47 = vpop.f32.mrf.mxu1  ;;  %2140 = vmatprep.mubr.f32.mxu1 %v6201_v40  ;;  %2368 = vmatpush2.msra.mxu0 %v6203_v61  ;;  %v6214_v40 = vld [vmem:[#allocation57_spill] sm:$0xff] }
 0x13e   :  { %v580_v4 = vpop.f32.mrf.mxu0  ;;  %2707 = vmatprep.subr.mxu1 %v5808_v45  ;;  %2369 = vmatprep.subr.mxu0 %v5808_v45  ;;  %v6213_v47 = vand.u32 4294901760, %v6200_v20  ;;  %v6215_v49 = vand.u32 4294901760, %v6214_v40  ;;  %v6228_v40 = vld [vmem:[#allocation48_spill] sm:$0xff] }
 0x13f   :  { %v1207_v18 = vpop.f32.mrf.mxu1  ;;  %1733 = vmatmul.mubr.f32.gmra.mxu0 %v6204_v21  ;;  %2144 = vmatmul.mubr.f32.gmra.mxu1 %v6205_v25  ;;  %v6218_v25 = vld [vmem:[#allocation44_spill] sm:$0xff] }
 0x140   :  { %v5005_v0 = vadd.f32 %v1207_v18, %v550_v42  ;;  %2709 = vmatpush2.msra.mxu1 %v6040_v30  ;;  %v582_v15 = vpop.f32.mrf.mxu0  ;;  %1739 = vmatprep.mubr.f32.mxu0 %v6206_v16  ;;  %v6210_v42 = vld [vmem:[#allocation154_spill] sm:$0xff]  ;;  %v6211_v30 = vand.u32 4294901760, %v6198_v26 }
 0x141   :  { %v1209_v1 = vpop.f32.mrf.mxu1  ;;  %2151 = vmatprep.mubr.f32.mxu1 %v6207_v51  ;;  %2373 = vmatpush2.msra.mxu0 %v6209_v13  ;;  %v6220_v51 = vand.u32 4294901760, %v6055_v63 }
 0x142   :  { %v595_v6 = vpop.f32.mrf.mxu0  ;;  %2710 = vmatprep.subr.mxu1 %v5808_v45  ;;  %2374 = vmatprep.subr.mxu0 %v5808_v45  ;;  %v6219_v1 = vand.u32 4294901760, %v6206_v16 }
 0x143   :  { %v1214_v28 = vpop.f32.mrf.mxu1  ;;  %1742 = vmatmul.mubr.f32.gmra.mxu0 %v6210_v42  ;;  %2155 = vmatmul.mubr.f32.gmra.mxu1 %v6211_v30  ;;  %v6224_v30 = vand.u32 4294901760, %v6212_v62 }
 0x144   :  { %v5018_v7 = vadd.f32 %v1214_v28, %v565_v60  ;;  %2712 = vmatpush2.msra.mxu1 %v6047_v55  ;;  %v597_v58 = vpop.f32.mrf.mxu0  ;;  %1748 = vmatprep.mubr.f32.mxu0 %v6212_v62  ;;  %v6216_v60 = vld [vmem:[#allocation157_spill] sm:$0xff]  ;;  %v6217_v55 = vand.u32 4294901760, %v6204_v21  ;;  %v6223_v28 = vld [vmem:[#allocation158_spill] sm:$0xff] }
 0x145   :  { %v1216_v17 = vpop.f32.mrf.mxu1  ;;  %2162 = vmatprep.mubr.f32.mxu1 %v6213_v47  ;;  %2378 = vmatpush2.msra.mxu0 %v6215_v49  ;;  %v6225_v58 = vand.u32 4294901760, %v6060_v24  ;;  %v6229_v49 = vand.u32 4294901760, %v6218_v25 }
 0x146   :  { %v610_v61 = vpop.f32.mrf.mxu0  ;;  %2713 = vmatprep.subr.mxu1 %v5808_v45  ;;  %2379 = vmatprep.subr.mxu0 %v5808_v45 }
 0x147   :  { %v1221_v26 = vpop.f32.mrf.mxu1  ;;  %1751 = vmatmul.mubr.f32.gmra.mxu0 %v6216_v60  ;;  %2166 = vmatmul.mubr.f32.gmra.mxu1 %v6217_v55 }
 0x148   :  { %v5031_v18 = vadd.f32 %v1221_v26, %v580_v4  ;;  %2715 = vmatpush2.msra.mxu1 %v6052_v19  ;;  %v612_v20 = vpop.f32.mrf.mxu0  ;;  %1757 = vmatprep.mubr.f32.mxu0 %v6218_v25  ;;  %v6221_v4 = vld [vmem:[#allocation51_spill] sm:$0xff]  ;;  %v6222_v19 = vand.u32 4294901760, %v6210_v42  ;;  %v6230_v26 = vand.u32 4294901760, %v6064_v48 }
 0x149   :  { %v1223_v15 = vpop.f32.mrf.mxu1  ;;  %2173 = vmatprep.mubr.f32.mxu1 %v6219_v1  ;;  %2383 = vmatpush2.msra.mxu0 %v6220_v51  ;;  %v6234_v1 = vand.u32 4294901760, %v6223_v28  ;;  %v6235_v51 = vand.u32 4294901760, %v3633_v22 }
 0x14a   :  { %v625_v31 = vpop.f32.mrf.mxu0  ;;  %2716 = vmatprep.subr.mxu1 %v5808_v45  ;;  %2384 = vmatprep.subr.mxu0 %v5808_v45  ;;  %v6233_v15 = vld [vmem:[#allocation50_spill] sm:$0xff] }
 0x14b   :  { %v1228_v21 = vpop.f32.mrf.mxu1  ;;  %1760 = vmatmul.mubr.f32.gmra.mxu0 %v6221_v4  ;;  %2177 = vmatmul.mubr.f32.gmra.mxu1 %v6222_v19 }
 0x14c   :  { %v5044_v13 = vadd.f32 %v1228_v21, %v595_v6  ;;  %2718 = vmatpush2.msra.mxu1 %v6058_v57  ;;  %v627_v16 = vpop.f32.mrf.mxu0  ;;  %1766 = vmatprep.mubr.f32.mxu0 %v6223_v28  ;;  %v6226_v6 = vld [vmem:[#allocation46_spill] sm:$0xff]  ;;  %v6227_v57 = vand.u32 4294901760, %v6216_v60  ;;  %v6238_v28 = vand.u32 4294901760, %v6065_v10 }
 0x14d   :  { %v1230_v63 = vpop.f32.mrf.mxu1  ;;  %2184 = vmatprep.mubr.f32.mxu1 %v6224_v30  ;;  %2388 = vmatpush2.msra.mxu0 %v6225_v58  ;;  %v6237_v16 = vand.u32 4294901760, %v6228_v40 }
 0x14e   :  { %v640_v17 = vpop.f32.mrf.mxu0  ;;  %2719 = vmatprep.subr.mxu1 %v5808_v45  ;;  %2389 = vmatprep.subr.mxu0 %v5808_v45 }
 0x14f   :  { %v1235_v42 = vpop.f32.mrf.mxu1  ;;  %1769 = vmatmul.mubr.f32.gmra.mxu0 %v6226_v6  ;;  %2188 = vmatmul.mubr.f32.gmra.mxu1 %v6227_v57 }
 0x150   :  { %v5057_v47 = vadd.f32 %v1235_v42, %v610_v61  ;;  %2721 = vmatpush2.msra.mxu1 %v6062_v27  ;;  %v642_v62 = vpop.f32.mrf.mxu0  ;;  %1775 = vmatprep.mubr.f32.mxu0 %v6228_v40  ;;  %v6231_v61 = vld [vmem:[#allocation159_spill] sm:$0xff]  ;;  %v6232_v27 = vand.u32 4294901760, %v6221_v4  ;;  %v6240_v42 = vand.u32 4294901760, %v6233_v15 }
 0x151   :  { %v1237_v24 = vpop.f32.mrf.mxu1  ;;  %2195 = vmatprep.mubr.f32.mxu1 %v6229_v49  ;;  %2393 = vmatpush2.msra.mxu0 %v6230_v26  ;;  %v6244_v26 = vand.u32 4294901760, %v4659_v11 }
 0x152   :  { %v655_v55 = vpop.f32.mrf.mxu0  ;;  %2722 = vmatprep.subr.mxu1 %v5808_v45  ;;  %2394 = vmatprep.subr.mxu0 %v5808_v45  ;;  %v6243_v24 = vand.u32 4294901760, %v3753_v44  ;;  %v6248_v44 = vld [vmem:[#allocation63_spill] sm:$0xff] }
 0x153   :  { %v1242_v60 = vpop.f32.mrf.mxu1  ;;  %1778 = vmatmul.mubr.f32.gmra.mxu0 %v6231_v61  ;;  %2199 = vmatmul.mubr.f32.gmra.mxu1 %v6232_v27  ;;  %v6247_v27 = vand.u32 4294901760, %v4672_v50 }
 0x154   :  { %v5070_v20 = vadd.f32 %v1242_v60, %v625_v31  ;;  %2724 = vmatpush2.msra.mxu1 %v3559_v12  ;;  %v657_v25 = vpop.f32.mrf.mxu0  ;;  %1784 = vmatprep.mubr.f32.mxu0 %v6233_v15  ;;  %v6236_v12 = vand.u32 4294901760, %v6226_v6  ;;  %v6241_v6 = vand.u32 4294901760, %v6067_v8  ;;  %v6246_v60 = vld [vmem:[#allocation60_spill] sm:$0xff]  ;;  %v6250_v15 = vld [vmem:[#allocation65_spill] sm:$0xff] }
 0x155   :  { %v1244_v48 = vpop.f32.mrf.mxu1  ;;  %2206 = vmatprep.mubr.f32.mxu1 %v6234_v1  ;;  %2398 = vmatpush2.msra.mxu0 %v6235_v51  ;;  %v6251_v1 = vand.u32 4294901760, %v4695_v23  ;;  %v6252_v51 = vld [vmem:[#allocation67_spill] sm:$0xff] }
 0x156   :  { %v670_v21 = vpop.f32.mrf.mxu0  ;;  %2725 = vmatprep.subr.mxu1 %v5808_v45  ;;  %2399 = vmatprep.subr.mxu0 %v5808_v45 }
 0x157   :  { %v1249_v4 = vpop.f32.mrf.mxu1  ;;  %1787 = vmatmul.mubr.f32.gmra.mxu0 %v4646_v35  ;;  %2210 = vmatmul.mubr.f32.gmra.mxu1 %v6236_v12 }
 0x158   :  { %v5083_v31 = vadd.f32 %v1249_v4, %v640_v17  ;;  %2727 = vmatpush2.msra.mxu1 %v3582_v53  ;;  %v672_v19 = vpop.f32.mrf.mxu0  ;;  %1793 = vmatprep.mubr.f32.mxu0 %v4659_v11  ;;  %v6239_v53 = vand.u32 4294901760, %v6231_v61  ;;  %v6249_v11 = vand.u32 4294901760, %v4685_v56  ;;  %v6253_v4 = vld [vmem:[#allocation71_spill] sm:$0xff] }
 0x159   :  { %v1251_v22 = vpop.f32.mrf.mxu1  ;;  %2217 = vmatprep.mubr.f32.mxu1 %v6237_v16  ;;  %2403 = vmatpush2.msra.mxu0 %v6238_v28  ;;  %v6255_v16 = vld [vmem:[#allocation77_spill] sm:$0xff] }
 0x15a   :  { %v685_v63 = vpop.f32.mrf.mxu0  ;;  %2728 = vmatprep.subr.mxu1 %v5808_v45  ;;  %2404 = vmatprep.subr.mxu0 %v5808_v45  ;;  %v6254_v22 = vld [vmem:[#allocation75_spill] sm:$0xff] }
 0x15b   :  { %v1256_v30 = vpop.f32.mrf.mxu1  ;;  %1796 = vmatmul.mubr.f32.gmra.mxu0 %v4672_v50  ;;  %2221 = vmatmul.mubr.f32.gmra.mxu1 %v6239_v53 }
 0x15c   :  { %v5096_v58 = vadd.f32 %v1256_v30, %v655_v55  ;;  %2730 = vmatpush2.msra.mxu1 %v6066_v14  ;;  %v687_v17 = vpop.f32.mrf.mxu0  ;;  %1802 = vmatprep.mubr.f32.mxu0 %v4685_v56  ;;  %v6242_v14 = vand.u32 4294901760, %v4646_v35  ;;  %v6245_v55 = vand.u32 4294901760, %v3756_v59  ;;  %v6256_v30 = vld [vmem:[#allocation78_spill] sm:$0xff] }
 0x15d   :  { %v1258_v10 = vpop.f32.mrf.mxu1  ;;  %2228 = vmatprep.mubr.f32.mxu1 %v6240_v42  ;;  %2408 = vmatpush2.msra.mxu0 %v6241_v6 }
 0x15e   :  { %v700_v57 = vpop.f32.mrf.mxu0  ;;  %2409 = vmatprep.subr.mxu0 %v5808_v45  ;;  %2731 = vmatprep.subr.mxu1 %v5808_v45  ;;  %v6257_v10 = vld [vmem:[#allocation79_spill] sm:$0xff] }
 0x15f   :  { %v1263_v62 = vpop.f32.mrf.mxu1  ;;  %1805 = vmatmul.mubr.f32.gmra.mxu0 %v4695_v23  ;;  %2232 = vmatmul.mubr.f32.gmra.mxu1 %v6242_v14 }
 0x160   :  { %v5109_v40 = vadd.f32 %v1263_v62, %v670_v21  ;;  %2413 = vmatpush2.msra.mxu0 %v6243_v24  ;;  %2733 = vmatpush2.msra.mxu1 %v6068_v38  ;;  %v702_v8 = vpop.f32.mrf.mxu0  ;;  %v6258_v62 = vld [vmem:[#allocation80_spill] sm:$0xff] }
 0x161   :  { %v1265_v49 = vpop.f32.mrf.mxu1  ;;  %2414 = vmatprep.subr.mxu0 %v5808_v45  ;;  %2239 = vmatprep.mubr.f32.mxu1 %v6244_v26  ;;  %v6259_v8 = vld [vmem:[#allocation82_spill] sm:$0xff] }
 0x162   :  { %2418 = vmatpush2.msra.mxu0 %v6245_v55  ;;  %2420 = vmatprep.mubr.f32.mxu0 %v6246_v60  ;;  %v715_v35 = vpop.f32.mrf.mxu0 }
 0x163   :  { %v1270_v61 = vpop.f32.mrf.mxu1  ;;  %2243 = vmatmul.mubr.f32.gmra.mxu1 %v6247_v27  ;;  %2422 = vmatmul.mubr.f32.vlgmr.msra.gmra.mxu0 %v6248_v44  ;;  %v6261_v27 = vld [vmem:[#allocation84_spill] sm:$0xff] }
 0x164   :  { %v5123_v38 = vadd.f32 %v1270_v61, %v685_v63  ;;  %2734 = vmatprep.subr.mxu1 %v5808_v45  ;;  %v717_v25 = vpop.f32.mrf.mxu0  ;;  %2250 = vmatprep.mubr.f32.mxu1 %v6249_v11 }
 0x165   :  { %2736 = vmatpush2.msra.mxu1 %v6071_v46  ;;  %v1272_v59 = vpop.f32.mrf.mxu1  ;;  %2427 = vmatprep.mubr.f32.mxu0 %v6250_v15 }
 0x166   :  { %v730_v48 = vpop.f32.mrf.mxu0  ;;  %2737 = vmatprep.subr.mxu1 %v5808_v45  ;;  %v6262_v59 = vld [vmem:[#allocation86_spill] sm:$0xff] }
 0x167   :  { %v1277_v50 = vpop.f32.mrf.mxu1  ;;  %2254 = vmatmul.mubr.f32.gmra.mxu1 %v6251_v1  ;;  %2429 = vmatmul.mubr.f32.gmra.mxu0 %v6252_v51 }
 0x168   :  { %v5134_v21 = vadd.f32 %v1277_v50, %v700_v57  ;;  %2739 = vmatpush2.msra.mxu1 %v3704_v36  ;;  %v732_v56 = vpop.f32.mrf.mxu0  ;;  %2434 = vmatprep.mubr.f32.mxu0 %v6253_v4  ;;  %v6263_v50 = vld [vmem:[#allocation89_spill] sm:$0xff] }
 0x169   :  { %v1279_v46 = vpop.f32.mrf.mxu1  ;;  %2741 = vmatprep.mubr.f32.mxu1 %v6246_v60  ;;  %v6260_v60 = vld [vmem:[#allocation83_spill] sm:$0xff] }
 0x16a   :  { %v745_v12 = vpop.f32.mrf.mxu0 }
 0x16b   :  { %v1284_v19 = vpop.f32.mrf.mxu1  ;;  %2436 = vmatmul.mubr.f32.gmra.mxu0 %v6254_v22  ;;  %2743 = vmatmul.mubr.f32.vlgmr.msra.gmra.mxu1 %v6248_v44 }
 0x16c   :  { %v5141_v45 = vadd.f32 %v1284_v19, %v715_v35  ;;  %v747_v23 = vpop.f32.mrf.mxu0  ;;  %2441 = vmatprep.mubr.f32.mxu0 %v6255_v16  ;;  %2748 = vmatprep.mubr.f32.mxu1 %v6250_v15  ;;  %v6265_v19 = vld [vmem:[#allocation93_spill] sm:$0xff] }
 0x16d   :  { %v1286_v36 = vpop.f32.mrf.mxu1 }
 0x16e   :  { %v760_v28 = vpop.f32.mrf.mxu0  ;;  %v6266_v36 = vld [vmem:[#allocation95_spill] sm:$0xff] }
 0x16f   :  { %v1291_v63 = vpop.f32.mrf.mxu1  ;;  %2443 = vmatmul.mubr.f32.gmra.mxu0 %v6256_v30  ;;  %2750 = vmatmul.mubr.f32.gmra.mxu1 %v6252_v51 }
 0x170   :  { %v5147_v53 = vadd.f32 %v1291_v63, %v730_v48  ;;  %v762_v17 = vpop.f32.mrf.mxu0  ;;  %2448 = vmatprep.mubr.f32.mxu0 %v6257_v10  ;;  %2755 = vmatprep.mubr.f32.mxu1 %v6253_v4  ;;  %v6264_v4 = vld [vmem:[#allocation91_spill] sm:$0xff] }
 0x171   :  { %v1293_v42 = vpop.f32.mrf.mxu1 }
 0x172   :  { %v775_v6 = vpop.f32.mrf.mxu0 }
 0x173   :  { %v1298_v57 = vpop.f32.mrf.mxu1  ;;  %2450 = vmatmul.mubr.f32.gmra.mxu0 %v6258_v62  ;;  %2757 = vmatmul.mubr.f32.gmra.mxu1 %v6254_v22 }
 0x174   :  { %v5153_v14 = vadd.f32 %v1298_v57, %v745_v12  ;;  %v777_v24 = vpop.f32.mrf.mxu0  ;;  %2455 = vmatprep.mubr.f32.mxu0 %v6259_v8  ;;  %2762 = vmatprep.mubr.f32.mxu1 %v6255_v16 }
 0x175   :  { %v1300_v49 = vpop.f32.mrf.mxu1  ;;  %v6269_v24 = vld [vmem:[#allocation101_spill] sm:$0xff] }
 0x176   :  { %v790_v26 = vpop.f32.mrf.mxu0 }
 0x177   :  { %v1305_v55 = vpop.f32.mrf.mxu1  ;;  %2457 = vmatmul.mubr.f32.gmra.mxu0 %v6260_v60  ;;  %2764 = vmatmul.mubr.f32.gmra.mxu1 %v6256_v30  ;;  %v6267_v30 = vld [vmem:[#allocation96_spill] sm:$0xff] }
 0x178   :  { %v5159_v35 = vadd.f32 %v1305_v55, %v760_v28  ;;  %v792_v61 = vpop.f32.mrf.mxu0  ;;  %2462 = vmatprep.mubr.f32.mxu0 %v6261_v27  ;;  %2769 = vmatprep.mubr.f32.mxu1 %v6257_v10  ;;  %v6270_v55 = vld [vmem:[#allocation102_spill] sm:$0xff] }
 0x179   :  { %v1307_v44 = vpop.f32.mrf.mxu1 }
 0x17a   :  { %v805_v25 = vpop.f32.mrf.mxu0 }
 0x17b   :  { %v1312_v11 = vpop.f32.mrf.mxu1  ;;  %2464 = vmatmul.mubr.f32.gmra.mxu0 %v6262_v59  ;;  %2771 = vmatmul.mubr.f32.gmra.mxu1 %v6258_v62 }
 0x17c   :  { %v5165_v15 = vadd.f32 %v1312_v11, %v775_v6  ;;  %v807_v48 = vpop.f32.mrf.mxu0  ;;  %2469 = vmatprep.mubr.f32.mxu0 %v6263_v50  ;;  %2776 = vmatprep.mubr.f32.mxu1 %v6259_v8  ;;  %v6268_v6 = vld [vmem:[#allocation99_spill] sm:$0xff] }
 0x17d   :  { %v1314_v1 = vpop.f32.mrf.mxu1 }
 0x17e   :  { %v820_v51 = vpop.f32.mrf.mxu0  ;;  %v6273_v1 = vld [vmem:[#allocation35_spill] sm:$0xff] }
 0x17f   :  { %v1319_v56 = vpop.f32.mrf.mxu1  ;;  %2471 = vmatmul.mubr.f32.gmra.mxu0 %v6264_v4  ;;  %2778 = vmatmul.mubr.f32.gmra.mxu1 %v6260_v60 }
 0x180   :  { %v5171_v46 = vadd.f32 %v1319_v56, %v790_v26  ;;  %v822_v12 = vpop.f32.mrf.mxu0  ;;  %2476 = vmatprep.mubr.f32.mxu0 %v6265_v19  ;;  %2783 = vmatprep.mubr.f32.mxu1 %v6261_v27  ;;  %v6271_v27 = vld [vmem:[#allocation105_spill] sm:$0xff] }
 0x181   :  { %v1321_v22 = vpop.f32.mrf.mxu1  ;;  %v6274_v12 = vld [vmem:[#allocation110_spill] sm:$0xff] }
 0x182   :  { %v835_v23 = vpop.f32.mrf.mxu0 }
 0x183   :  { %v1326_v16 = vpop.f32.mrf.mxu1  ;;  %2478 = vmatmul.mubr.f32.gmra.mxu0 %v6266_v36  ;;  %2785 = vmatmul.mubr.f32.gmra.mxu1 %v6262_v59  ;;  %v6272_v59 = vld [vmem:[#allocation107_spill] sm:$0xff] }
 0x184   :  { %v5177_v28 = vadd.f32 %v1326_v16, %v805_v25  ;;  %v837_v63 = vpop.f32.mrf.mxu0  ;;  %2483 = vmatprep.mubr.f32.mxu0 %v6267_v30  ;;  %2790 = vmatprep.mubr.f32.mxu1 %v6263_v50 }
 0x185   :  { %v1328_v17 = vpop.f32.mrf.mxu1 }
 0x186   :  { %v850_v10 = vpop.f32.mrf.mxu0 }
 0x187   :  { %v1333_v42 = vpop.f32.mrf.mxu1  ;;  %2485 = vmatmul.mubr.f32.gmra.mxu0 %v6268_v6  ;;  %2792 = vmatmul.mubr.f32.gmra.mxu1 %v6264_v4 }
 0x188   :  { %v5183_v57 = vadd.f32 %v1333_v42, %v820_v51  ;;  %v852_v62 = vpop.f32.mrf.mxu0  ;;  %2490 = vmatprep.mubr.f32.mxu0 %v6269_v24  ;;  %2797 = vmatprep.mubr.f32.mxu1 %v6265_v19  ;;  %v6277_v42 = vld [vmem:[#allocation115_spill] sm:$0xff] }
 0x189   :  { %v1335_v8 = vpop.f32.mrf.mxu1 }
 0x18a   :  { %v865_v49 = vpop.f32.mrf.mxu0  ;;  %v6278_v8 = vld [vmem:[#allocation118_spill] sm:$0xff] }
 0x18b   :  { %v1340_v26 = vpop.f32.mrf.mxu1  ;;  %2492 = vmatmul.mubr.f32.gmra.mxu0 %v6270_v55  ;;  %2799 = vmatmul.mubr.f32.gmra.mxu1 %v6266_v36 }
 0x18c   :  { %v5189_v60 = vadd.f32 %v1340_v26, %v835_v23  ;;  %v867_v61 = vpop.f32.mrf.mxu0  ;;  %2497 = vmatprep.mubr.f32.mxu0 %v6271_v27  ;;  %2804 = vmatprep.mubr.f32.mxu1 %v6267_v30  ;;  %v6275_v23 = vld [vmem:[#allocation112_spill] sm:$0xff]  ;;  %v6276_v30 = vld [vmem:[#allocation114_spill] sm:$0xff] }
 0x18d   :  { %v1342_v44 = vpop.f32.mrf.mxu1 }
 0x18e   :  { %v880_v25 = vpop.f32.mrf.mxu0 }
 0x18f   :  { %v1347_v11 = vpop.f32.mrf.mxu1  ;;  %2499 = vmatmul.mubr.f32.gmra.mxu0 %v6272_v59  ;;  %2806 = vmatmul.mubr.f32.gmra.mxu1 %v6268_v6 }
 0x190   :  { %v5195_v48 = vadd.f32 %v1347_v11, %v850_v10  ;;  %v882_v50 = vpop.f32.mrf.mxu0  ;;  %2504 = vmatprep.mubr.f32.mxu0 %v6273_v1  ;;  %2811 = vmatprep.mubr.f32.mxu1 %v6269_v24 }
 0x191   :  { %v1349_v51 = vpop.f32.mrf.mxu1  ;;  %v6281_v50 = vld [vmem:[#allocation124_spill] sm:$0xff] }
 0x192   :  { %v895_v56 = vpop.f32.mrf.mxu0 }
 0x193   :  { %v1354_v4 = vpop.f32.mrf.mxu1  ;;  %2506 = vmatmul.mubr.f32.gmra.mxu0 %v6274_v12  ;;  %2813 = vmatmul.mubr.f32.gmra.mxu1 %v6270_v55  ;;  %v6279_v55 = vld [vmem:[#allocation120_spill] sm:$0xff] }
 0x194   :  { %v5201_v19 = vadd.f32 %v1354_v4, %v865_v49  ;;  %v897_v22 = vpop.f32.mrf.mxu0  ;;  %2511 = vmatprep.mubr.f32.mxu0 %v6275_v23  ;;  %2818 = vmatprep.mubr.f32.mxu1 %v6271_v27  ;;  %v6282_v4 = vld [vmem:[#allocation125_spill] sm:$0xff] }
 0x195   :  { %v1356_v16 = vpop.f32.mrf.mxu1 }
 0x196   :  { %v910_v36 = vpop.f32.mrf.mxu0 }
 0x197   :  { %v1361_v63 = vpop.f32.mrf.mxu1  ;;  %2513 = vmatmul.mubr.f32.gmra.mxu0 %v6276_v30  ;;  %2820 = vmatmul.mubr.f32.gmra.mxu1 %v6272_v59 }
 0x198   :  { %v5207_v17 = vadd.f32 %v1361_v63, %v880_v25  ;;  %v912_v10 = vpop.f32.mrf.mxu0  ;;  %2518 = vmatprep.mubr.f32.mxu0 %v6277_v42  ;;  %2825 = vmatprep.mubr.f32.mxu1 %v6273_v1  ;;  %v6280_v25 = vld [vmem:[#allocation122_spill] sm:$0xff] }
 0x199   :  { %v1363_v6 = vpop.f32.mrf.mxu1  ;;  %v6284_v10 = vld [vmem:[#allocation130_spill] sm:$0xff] }
 0x19a   :  { %v925_v62 = vpop.f32.mrf.mxu0 }
 0x19b   :  { %v1368_v24 = vpop.f32.mrf.mxu1  ;;  %2520 = vmatmul.mubr.f32.gmra.mxu0 %v6278_v8  ;;  %2827 = vmatmul.mubr.f32.gmra.mxu1 %v6274_v12 }
 0x19c   :  { %v5213_v49 = vadd.f32 %v1368_v24, %v895_v56  ;;  %v927_v26 = vpop.f32.mrf.mxu0  ;;  %2525 = vmatprep.mubr.f32.mxu0 %v6279_v55  ;;  %2832 = vmatprep.mubr.f32.mxu1 %v6275_v23  ;;  %v6283_v23 = vld [vmem:[#allocation127_spill] sm:$0xff] }
 0x19d   :  { %v1370_v61 = vpop.f32.mrf.mxu1 }
 0x19e   :  { %v940_v27 = vpop.f32.mrf.mxu0 }
 0x19f   :  { %v1375_v44 = vpop.f32.mrf.mxu1  ;;  %2527 = vmatmul.mubr.f32.gmra.mxu0 %v6280_v25  ;;  %2834 = vmatmul.mubr.f32.gmra.mxu1 %v6276_v30 }
 0x1a0   :  { %v5219_v11 = vadd.f32 %v1375_v44, %v910_v36  ;;  %v942_v59 = vpop.f32.mrf.mxu0  ;;  %2532 = vmatprep.mubr.f32.mxu0 %v6281_v50  ;;  %2839 = vmatprep.mubr.f32.mxu1 %v6277_v42 }
 0x1a1   :  { %v1377_v1 = vpop.f32.mrf.mxu1 }
 0x1a2   :  { %v6288_v1 = vld [vmem:[#allocation137_spill] sm:$0xff] }
 0x1a3   :  { %v1382_v51 = vpop.f32.mrf.mxu1  ;;  %v1527_v56 = vpop.f32.mrf.mxu0  ;;  %2534 = vmatmul.mubr.f32.gmra.mxu0 %v6282_v4  ;;  %2841 = vmatmul.mubr.f32.gmra.mxu1 %v6278_v8 }
 0x1a4   :  { %v5225_v12 = vadd.f32 %v1382_v51, %v925_v62  ;;  %v1528_v22 = vadd.f32 %v1527_v56, %v4940_v54  ;;  %2539 = vmatprep.mubr.f32.mxu0 %v6283_v23  ;;  %2846 = vmatprep.mubr.f32.mxu1 %v6279_v55  ;;  %v6285_v62 = vld [vmem:[#allocation132_spill] sm:$0xff]  ;;  %v6286_v55 = vld [vmem:[#allocation134_spill] sm:$0xff] }
 0x1a5   :  { %v1384_v16 = vpop.f32.mrf.mxu1  ;;  %v1529_v36 = vpop.f32.mrf.mxu0 }
 0x1a6   :  { %v6290_v36 = vld [vmem:[#allocation141_spill] sm:$0xff] }
 0x1a7   :  { %v1389_v63 = vpop.f32.mrf.mxu1  ;;  %v1536_v30 = vpop.f32.mrf.mxu0  ;;  %2541 = vmatmul.mubr.f32.gmra.mxu0 %v6284_v10  ;;  %2848 = vmatmul.mubr.f32.gmra.mxu1 %v6280_v25 }
 0x1a8   :  { %v5232_v42 = vadd.f32 %v1389_v63, %v940_v27  ;;  %v1537_v6 = vadd.f32 %v1536_v30, %v4953_v5  ;;  %2546 = vmatprep.mubr.f32.mxu0 %v6285_v62  ;;  %2853 = vmatprep.mubr.f32.mxu1 %v6281_v50  ;;  %v6287_v27 = vld [vmem:[#allocation135_spill] sm:$0xff] }
 0x1a9   :  { %v1391_v54 = vpop.f32.mrf.mxu1  ;;  %v1538_v24 = vpop.f32.mrf.mxu0 }
 0x1aa   :  { %v6292_v24 = vld [vmem:[#allocation145_spill] sm:$0xff] }
 0x1ab   :  { %v1545_v8 = vpop.f32.mrf.mxu0  ;;  %v1914_v26 = vpop.f32.mrf.mxu1  ;;  %2548 = vmatmul.mubr.f32.gmra.mxu0 %v6286_v55  ;;  %2855 = vmatmul.mubr.f32.gmra.mxu1 %v6282_v4  ;;  %v6289_v4 = vld [vmem:[#allocation139_spill] sm:$0xff] }
 0x1ac   :  { %v1546_v61 = vadd.f32 %v1545_v8, %v4966_v37  ;;  %v5240_v44 = vadd.f32 %v1914_v26, %v1528_v22  ;;  %2553 = vmatprep.mubr.f32.mxu0 %v6287_v27  ;;  %2860 = vmatprep.mubr.f32.mxu1 %v6283_v23 }
 0x1ad   :  { %v1547_v5 = vpop.f32.mrf.mxu0  ;;  %v1916_v25 = vpop.f32.mrf.mxu1 }
 0x1ae   :  { %v6294_v25 = vld [vmem:[#allocation41_spill] sm:$0xff] }
 0x1af   :  { %v1554_v59 = vpop.f32.mrf.mxu0  ;;  %v1925_v50 = vpop.f32.mrf.mxu1  ;;  %2555 = vmatmul.mubr.f32.gmra.mxu0 %v6288_v1  ;;  %2862 = vmatmul.mubr.f32.gmra.mxu1 %v6284_v10  ;;  %v6291_v10 = vld [vmem:[#allocation143_spill] sm:$0xff] }
 0x1b0   :  { %v1555_v51 = vadd.f32 %v1554_v59, %v4979_v3  ;;  %v5247_v56 = vadd.f32 %v1925_v50, %v1537_v6  ;;  %2560 = vmatprep.mubr.f32.mxu0 %v6289_v4  ;;  %2867 = vmatprep.mubr.f32.mxu1 %v6285_v62 }
 0x1b1   :  { %v1556_v37 = vpop.f32.mrf.mxu0  ;;  %v1927_v22 = vpop.f32.mrf.mxu1 }
 0x1b2   :  { %v6296_v22 = vld [vmem:[#allocation150_spill] sm:$0xff] }
 0x1b3   :  { %v1563_v16 = vpop.f32.mrf.mxu0  ;;  %v1936_v23 = vpop.f32.mrf.mxu1  ;;  %2562 = vmatmul.mubr.f32.gmra.mxu0 %v6290_v36  ;;  %2869 = vmatmul.mubr.f32.gmra.mxu1 %v6286_v55  ;;  %v6293_v55 = vld [vmem:[#allocation146_spill] sm:$0xff] }
 0x1b4   :  { %v1564_v63 = vadd.f32 %v1563_v16, %v4992_v2  ;;  %v5254_v30 = vadd.f32 %v1936_v23, %v1546_v61  ;;  %2567 = vmatprep.mubr.f32.mxu0 %v6291_v10  ;;  %2874 = vmatprep.mubr.f32.mxu1 %v6287_v27 }
 0x1b5   :  { %v1565_v3 = vpop.f32.mrf.mxu0  ;;  %v1938_v6 = vpop.f32.mrf.mxu1 }
 0x1b6   :  { %v6298_v6 = vld [vmem:[#allocation152_spill] sm:$0xff] }
 0x1b7   :  { %v1572_v54 = vpop.f32.mrf.mxu0  ;;  %v1947_v62 = vpop.f32.mrf.mxu1  ;;  %2569 = vmatmul.mubr.f32.gmra.mxu0 %v6292_v24  ;;  %2876 = vmatmul.mubr.f32.gmra.mxu1 %v6288_v1  ;;  %v6295_v1 = vld [vmem:[#allocation36_spill] sm:$0xff] }
 0x1b8   :  { %v1573_v8 = vadd.f32 %v1572_v54, %v5005_v0  ;;  %v5261_v26 = vadd.f32 %v1947_v62, %v1555_v51  ;;  %2574 = vmatprep.mubr.f32.mxu0 %v6293_v55  ;;  %2881 = vmatprep.mubr.f32.mxu1 %v6289_v4 }
 0x1b9   :  { %v1574_v2 = vpop.f32.mrf.mxu0  ;;  %v1949_v61 = vpop.f32.mrf.mxu1 }
 0x1ba   :  { %v6300_v61 = vld [vmem:[#allocation155_spill] sm:$0xff] }
 0x1bb   :  { %v1581_v5 = vpop.f32.mrf.mxu0  ;;  %v1958_v27 = vpop.f32.mrf.mxu1  ;;  %2576 = vmatmul.mubr.f32.gmra.mxu0 %v6294_v25  ;;  %2883 = vmatmul.mubr.f32.gmra.mxu1 %v6290_v36  ;;  %v6297_v36 = vld [vmem:[#allocation151_spill] sm:$0xff] }
 0x1bc   :  { %v1582_v59 = vadd.f32 %v1581_v5, %v5018_v7  ;;  %v5268_v50 = vadd.f32 %v1958_v27, %v1564_v63  ;;  %2581 = vmatprep.mubr.f32.mxu0 %v6295_v1  ;;  %2888 = vmatprep.mubr.f32.mxu1 %v6291_v10 }
 0x1bd   :  { %v1583_v0 = vpop.f32.mrf.mxu0  ;;  %v1960_v51 = vpop.f32.mrf.mxu1 }
 0x1bf   :  { %v1590_v37 = vpop.f32.mrf.mxu0  ;;  %v1969_v4 = vpop.f32.mrf.mxu1  ;;  %2583 = vmatmul.mubr.f32.gmra.mxu0 %v6296_v22  ;;  %2890 = vmatmul.mubr.f32.gmra.mxu1 %v6292_v24  ;;  %v6299_v24 = vld [vmem:[#allocation153_spill] sm:$0xff] }
 0x1c0   :  { %v1591_v16 = vadd.f32 %v1590_v37, %v5031_v18  ;;  %v5275_v23 = vadd.f32 %v1969_v4, %v1573_v8  ;;  %2588 = vmatprep.mubr.f32.mxu0 %v6297_v36  ;;  %2895 = vmatprep.mubr.f32.mxu1 %v6293_v55 }
 0x1c1   :  { %v1592_v7 = vpop.f32.mrf.mxu0  ;;  %v1971_v63 = vpop.f32.mrf.mxu1 }
 0x1c3   :  { %v1599_v3 = vpop.f32.mrf.mxu0  ;;  %v1980_v10 = vpop.f32.mrf.mxu1  ;;  %2590 = vmatmul.mubr.f32.gmra.mxu0 %v6298_v6  ;;  %2897 = vmatmul.mubr.f32.gmra.mxu1 %v6294_v25 }
 0x1c4   :  { %v1600_v54 = vadd.f32 %v1599_v3, %v5044_v13  ;;  %v5282_v62 = vadd.f32 %v1980_v10, %v1582_v59  ;;  %2595 = vmatprep.mubr.f32.mxu0 %v6299_v24  ;;  %2902 = vmatprep.mubr.f32.mxu1 %v6295_v1 }
 0x1c5   :  { %v1601_v18 = vpop.f32.mrf.mxu0  ;;  %v1982_v8 = vpop.f32.mrf.mxu1 }
 0x1c7   :  { %v1608_v2 = vpop.f32.mrf.mxu0  ;;  %v1991_v55 = vpop.f32.mrf.mxu1  ;;  %2597 = vmatmul.mubr.f32.gmra.mxu0 %v6300_v61  ;;  %2904 = vmatmul.mubr.f32.gmra.mxu1 %v6296_v22 }
 0x1c8   :  { %v1609_v5 = vadd.f32 %v1608_v2, %v5057_v47  ;;  %v5289_v27 = vadd.f32 %v1991_v55, %v1591_v16  ;;  %2602 = vmatprep.mubr.f32.mxu0 %v4532_v43  ;;  %2909 = vmatprep.mubr.f32.mxu1 %v6297_v36  ;;  %v6301_v55 = vld [vmem:[#allocation160_spill] sm:$0xff] }
 0x1c9   :  { %v1610_v13 = vpop.f32.mrf.mxu0  ;;  %v1993_v25 = vpop.f32.mrf.mxu1 }
 0x1cb   :  { %v1617_v59 = vpop.f32.mrf.mxu0  ;;  %v2002_v1 = vpop.f32.mrf.mxu1  ;;  %2604 = vmatmul.mubr.f32.gmra.mxu0 %v4544_v9  ;;  %2911 = vmatmul.mubr.f32.gmra.mxu1 %v6298_v6 }
 0x1cc   :  { %v1618_v0 = vadd.f32 %v1617_v59, %v5070_v20  ;;  %v5296_v51 = vadd.f32 %v2002_v1, %v1600_v54  ;;  %2609 = vmatprep.mubr.f32.mxu0 %v4549_v29  ;;  %2916 = vmatprep.mubr.f32.mxu1 %v6299_v24  ;;  %v6303_v59 = vld [vmem:[#allocation58_spill] sm:$0xff] }
 0x1cd   :  { %v1619_v47 = vpop.f32.mrf.mxu0  ;;  %v2004_v37 = vpop.f32.mrf.mxu1 }
 0x1cf   :  { %v1626_v4 = vpop.f32.mrf.mxu0  ;;  %v2013_v22 = vpop.f32.mrf.mxu1  ;;  %2611 = vmatmul.mubr.f32.gmra.mxu0 %v4562_v41  ;;  %2918 = vmatmul.mubr.f32.gmra.mxu1 %v6300_v61 }
 0x1d0   :  { %v1627_v16 = vadd.f32 %v1626_v4, %v5083_v31  ;;  %v5303_v36 = vadd.f32 %v2013_v22, %v1609_v5  ;;  %2616 = vmatprep.mubr.f32.mxu0 %v4584_v52  ;;  %2923 = vmatprep.mubr.f32.mxu1 %v4532_v43 }
 0x1d1   :  { %v1628_v20 = vpop.f32.mrf.mxu0  ;;  %v2015_v7 = vpop.f32.mrf.mxu1 }
 0x1d3   :  { %v1635_v63 = vpop.f32.mrf.mxu0  ;;  %v2024_v3 = vpop.f32.mrf.mxu1  ;;  %2618 = vmatmul.mubr.f32.gmra.mxu0 %v4596_v39  ;;  %2925 = vmatmul.mubr.f32.gmra.mxu1 %v4544_v9 }
 0x1d4   :  { %v1636_v10 = vadd.f32 %v1635_v63, %v5096_v58  ;;  %v5310_v6 = vadd.f32 %v2024_v3, %v1618_v0  ;;  %2623 = vmatprep.mubr.f32.mxu0 %v4610_v33  ;;  %2930 = vmatprep.mubr.f32.mxu1 %v4549_v29 }
 0x1d5   :  { %v1637_v31 = vpop.f32.mrf.mxu0  ;;  %v2026_v54 = vpop.f32.mrf.mxu1 }
 0x1d7   :  { %v1644_v24 = vpop.f32.mrf.mxu0  ;;  %v2035_v43 = vpop.f32.mrf.mxu1  ;;  %2625 = vmatmul.mubr.f32.gmra.mxu0 %v4622_v34  ;;  %2932 = vmatmul.mubr.f32.gmra.mxu1 %v4562_v41  ;;  %v6302_v41 = vld [vmem:[#allocation52_spill] sm:$0xff] }
 0x1d8   :  { %v1645_v18 = vadd.f32 %v1644_v24, %v5109_v40  ;;  %v5317_v8 = vadd.f32 %v2035_v43, %v1627_v16  ;;  %2630 = vmatprep.mubr.f32.mxu0 %v4636_v32  ;;  %2937 = vmatprep.mubr.f32.mxu1 %v4584_v52 }
 0x1d9   :  { %v1646_v9 = vpop.f32.mrf.mxu0  ;;  %v2037_v58 = vpop.f32.mrf.mxu1 }
 0x1db   :  { %v1653_v2 = vpop.f32.mrf.mxu0  ;;  %v2046_v29 = vpop.f32.mrf.mxu1  ;;  %2632 = vmatmul.mubr.f32.gmra.mxu0 %v6301_v55  ;;  %2939 = vmatmul.mubr.f32.gmra.mxu1 %v4596_v39 }
 0x1dc   :  { %v1654_v61 = vadd.f32 %v1653_v2, %v5123_v38  ;;  %v5324_v5 = vadd.f32 %v2046_v29, %v1636_v10  ;;  %2637 = vmatprep.mubr.f32.mxu0 %v6302_v41  ;;  %2944 = vmatprep.mubr.f32.mxu1 %v4610_v33 }
 0x1dd   :  { %v1655_v40 = vpop.f32.mrf.mxu0  ;;  %v2048_v13 = vpop.f32.mrf.mxu1 }
 0x1df   :  { %v1662_v25 = vpop.f32.mrf.mxu0  ;;  %v2057_v52 = vpop.f32.mrf.mxu1  ;;  %2639 = vmatmul.mubr.f32.gmra.mxu0 %v6303_v59  ;;  %2946 = vmatmul.mubr.f32.gmra.mxu1 %v4622_v34 }
 0x1e0   :  { %v1663_v1 = vadd.f32 %v1662_v25, %v5134_v21  ;;  %v5331_v0 = vadd.f32 %v2057_v52, %v1645_v18  ;;  %2951 = vmatprep.mubr.f32.mxu1 %v4636_v32 }
 0x1e1   :  { %v1664_v39 = vpop.f32.mrf.mxu0  ;;  %v2059_v38 = vpop.f32.mrf.mxu1 }
 0x1e3   :  { %v1671_v47 = vpop.f32.mrf.mxu0  ;;  %v2068_v37 = vpop.f32.mrf.mxu1  ;;  %2953 = vmatmul.mubr.f32.gmra.mxu1 %v6301_v55 }
 0x1e4   :  { %v1672_v33 = vadd.f32 %v1671_v47, %v5141_v45  ;;  %v5336_v4 = vadd.f32 %v2068_v37, %v1654_v61  ;;  %2958 = vmatprep.mubr.f32.mxu1 %v6302_v41 }
 0x1e5   :  { %v1673_v22 = vpop.f32.mrf.mxu0  ;;  %v2070_v34 = vpop.f32.mrf.mxu1 }
 0x1e7   :  { %v1680_v16 = vpop.f32.mrf.mxu0  ;;  %v2079_v21 = vpop.f32.mrf.mxu1  ;;  %2960 = vmatmul.mubr.f32.gmra.mxu1 %v6303_v59 }
 0x1e8   :  { %v1681_v32 = vadd.f32 %v1680_v16, %v5147_v53  ;;  %v5341_v20 = vadd.f32 %v2079_v21, %v1663_v1 }
 0x1e9   :  { %v1682_v7 = vpop.f32.mrf.mxu0  ;;  %v2081_v63 = vpop.f32.mrf.mxu1 }
 0x1eb   :  { %v1689_v3 = vpop.f32.mrf.mxu0  ;;  %v2090_v10 = vpop.f32.mrf.mxu1 }
 0x1ec   :  { %v1690_v45 = vadd.f32 %v1689_v3, %v5153_v14  ;;  %v5344_v31 = vadd.f32 %v2090_v10, %v1672_v33 }
 0x1ed   :  { %v1691_v54 = vpop.f32.mrf.mxu0  ;;  %v2092_v24 = vpop.f32.mrf.mxu1 }
 0x1ef   :  { %v1698_v43 = vpop.f32.mrf.mxu0  ;;  %v2101_v18 = vpop.f32.mrf.mxu1 }
 0x1f0   :  { %v1699_v9 = vadd.f32 %v1698_v43, %v5159_v35  ;;  %v5347_v58 = vadd.f32 %v2101_v18, %v1681_v32 }
 0x1f1   :  { %v1700_v2 = vpop.f32.mrf.mxu0  ;;  %v2103_v53 = vpop.f32.mrf.mxu1 }
 0x1f3   :  { %v1707_v29 = vpop.f32.mrf.mxu0  ;;  %v2112_v55 = vpop.f32.mrf.mxu1 }
 0x1f4   :  { %v1708_v61 = vadd.f32 %v1707_v29, %v5165_v15  ;;  %v5350_v41 = vadd.f32 %v2112_v55, %v1690_v45 }
 0x1f5   :  { %v1709_v40 = vpop.f32.mrf.mxu0  ;;  %v2114_v14 = vpop.f32.mrf.mxu1 }
 0x1f7   :  { %v1716_v13 = vpop.f32.mrf.mxu0  ;;  %v2123_v25 = vpop.f32.mrf.mxu1 }
 0x1f8   :  { %v1717_v52 = vadd.f32 %v1716_v13, %v5171_v46  ;;  %v5353_v59 = vadd.f32 %v2123_v25, %v1699_v9 }
 0x1f9   :  { %v1718_v1 = vpop.f32.mrf.mxu0  ;;  %v2125_v35 = vpop.f32.mrf.mxu1 }
 0x1fb   :  { %v1725_v39 = vpop.f32.mrf.mxu0  ;;  %v2134_v38 = vpop.f32.mrf.mxu1 }
 0x1fc   :  { %v1726_v47 = vadd.f32 %v1725_v39, %v5177_v28  ;;  %v5356_v37 = vadd.f32 %v2134_v38, %v1708_v61 }
 0x1fd   :  { %v1727_v33 = vpop.f32.mrf.mxu0  ;;  %v2136_v15 = vpop.f32.mrf.mxu1 }
 0x1ff   :  { %v1734_v22 = vpop.f32.mrf.mxu0  ;;  %v2145_v34 = vpop.f32.mrf.mxu1 }
 0x200   :  { %v1735_v16 = vadd.f32 %v1734_v22, %v5183_v57  ;;  %v5359_v21 = vadd.f32 %v2145_v34, %v1717_v52 }
 0x201   :  { %v1736_v32 = vpop.f32.mrf.mxu0  ;;  %v2147_v46 = vpop.f32.mrf.mxu1 }
 0x203   :  { %v1743_v7 = vpop.f32.mrf.mxu0  ;;  %v2156_v63 = vpop.f32.mrf.mxu1 }
 0x204   :  { %v1744_v3 = vadd.f32 %v1743_v7, %v5189_v60  ;;  %v5362_v10 = vadd.f32 %v2156_v63, %v1726_v47 }
 0x205   :  { %v1745_v45 = vpop.f32.mrf.mxu0  ;;  %v2158_v28 = vpop.f32.mrf.mxu1 }
 0x207   :  { %v1752_v54 = vpop.f32.mrf.mxu0  ;;  %v2167_v24 = vpop.f32.mrf.mxu1 }
 0x208   :  { %v1753_v43 = vadd.f32 %v1752_v54, %v5195_v48  ;;  %v5365_v18 = vadd.f32 %v2167_v24, %v1735_v16 }
 0x209   :  { %v1754_v9 = vpop.f32.mrf.mxu0  ;;  %v2169_v57 = vpop.f32.mrf.mxu1 }
 0x20b   :  { %v1761_v2 = vpop.f32.mrf.mxu0  ;;  %v2178_v53 = vpop.f32.mrf.mxu1 }
 0x20c   :  { %v1762_v29 = vadd.f32 %v1761_v2, %v5201_v19  ;;  %v5368_v55 = vadd.f32 %v2178_v53, %v1744_v3 }
 0x20d   :  { %v1763_v61 = vpop.f32.mrf.mxu0  ;;  %v2180_v60 = vpop.f32.mrf.mxu1 }
 0x20f   :  { %v1770_v40 = vpop.f32.mrf.mxu0  ;;  %v2189_v14 = vpop.f32.mrf.mxu1 }
 0x210   :  { %v1771_v13 = vadd.f32 %v1770_v40, %v5207_v17  ;;  %v5371_v25 = vadd.f32 %v2189_v14, %v1753_v43 }
 0x211   :  { %v1772_v52 = vpop.f32.mrf.mxu0  ;;  %v2191_v48 = vpop.f32.mrf.mxu1 }
 0x213   :  { %v1779_v1 = vpop.f32.mrf.mxu0  ;;  %v2200_v35 = vpop.f32.mrf.mxu1 }
 0x214   :  { %v1780_v39 = vadd.f32 %v1779_v1, %v5213_v49  ;;  %v5374_v38 = vadd.f32 %v2200_v35, %v1762_v29 }
 0x215   :  { %v1781_v47 = vpop.f32.mrf.mxu0  ;;  %v2202_v19 = vpop.f32.mrf.mxu1 }
 0x217   :  { %v1788_v33 = vpop.f32.mrf.mxu0  ;;  %v2211_v15 = vpop.f32.mrf.mxu1 }
 0x218   :  { %v1789_v22 = vadd.f32 %v1788_v33, %v5219_v11  ;;  %v5377_v34 = vadd.f32 %v2211_v15, %v1771_v13 }
 0x219   :  { %v1790_v16 = vpop.f32.mrf.mxu0  ;;  %v2213_v17 = vpop.f32.mrf.mxu1 }
 0x21b   :  { %v1797_v32 = vpop.f32.mrf.mxu0  ;;  %v2222_v46 = vpop.f32.mrf.mxu1 }
 0x21c   :  { %v1798_v7 = vadd.f32 %v1797_v32, %v5225_v12  ;;  %v5380_v63 = vadd.f32 %v2222_v46, %v1780_v39 }
 0x21d   :  { %v1799_v3 = vpop.f32.mrf.mxu0  ;;  %v2224_v49 = vpop.f32.mrf.mxu1 }
 0x21f   :  { %v1806_v45 = vpop.f32.mrf.mxu0  ;;  %v2233_v28 = vpop.f32.mrf.mxu1 }
 0x220   :  { %v1807_v54 = vadd.f32 %v1806_v45, %v5232_v42  ;;  %v5383_v24 = vadd.f32 %v2233_v28, %v1789_v22 }
 0x221   :  { %v1808_v43 = vpop.f32.mrf.mxu0  ;;  %v2235_v11 = vpop.f32.mrf.mxu1 }
 0x223   :  { %v2244_v9 = vpop.f32.mrf.mxu1  ;;  %v2423_v57 = vpop.f32.mrf.mxu0 }
 0x224   :  { %v5385_v2 = vadd.f32 %v2244_v9, %v1798_v7  ;;  %v2424_v42 = vadd.f32 %v2423_v57, %v5240_v44 }
 0x225   :  { %v2246_v53 = vpop.f32.mrf.mxu1  ;;  %v2425_v29 = vpop.f32.mrf.mxu0 }
 0x227   :  { %v2255_v61 = vpop.f32.mrf.mxu1  ;;  %v2430_v12 = vpop.f32.mrf.mxu0 }
 0x228   :  { %v5387_v60 = vadd.f32 %v2255_v61, %v1807_v54 }
 0x229   :  { %v2257_v40 = vpop.f32.mrf.mxu1  ;;  %v2432_v14 = vpop.f32.mrf.mxu0 }
 0x22b   :  { %v2437_v13 = vpop.f32.mrf.mxu0  ;;  %v2744_v52 = vpop.f32.mrf.mxu1 }
 0x22c   :  { %3110 = shalt.err (!%p3107_p0)
}
 0x22d   :  { %3008 = dma.vmem_to_hbm [thread:$0]  %s3003_s1, 8192, %s5435_s2, [#allocation4], %s3148_s15, %s3148_s15, %s3149_s16   ;;  %v2745_v48 = vadd.f32 %v2744_v52, %v2424_v42  ;;  %v2439_v1 = vpop.f32.mrf.mxu0  ;;  %v2746_v44 = vpop.f32.mrf.mxu1  ;;  %v2431_v35 = vadd.f32 %v2430_v12, %v5247_v56  ;;  %v2438_v22 = vadd.f32 %v2437_v13, %v5254_v30 }
 0x22e   :  { %s3155_s2 = smov [#allocation8]  }
 0x22f   :  { %2965 = vst [vmem:[#allocation8] sm:$0xff] %v2745_v48  ;;  %v2444_v39 = vpop.f32.mrf.mxu0  ;;  %v2751_v47 = vpop.f32.mrf.mxu1  ;;  %s3014_s29 = sshll.u32 %s3155_s2, 4  ;;  %s3015_s29 = int_to_ptr.vmem [resolvable:$true] %s3014_s29 }
 0x230   :  { %v2752_v19 = vadd.f32 %v2751_v47, %v2431_v35  ;;  %v2445_v3 = vadd.f32 %v2444_v39, %v5261_v26  ;;  %s3119_s30 = scalar_lea.vmem %s3015_s29, 4096  ;;  %p3124_p2 = scmp.lt.s32.totalorder %s3015_s29, %s3015_s29 }
 0x231   :  { %v2446_v33 = vpop.f32.mrf.mxu0  ;;  %v2753_v15 = vpop.f32.mrf.mxu1  ;;  %p3120_p1 = scmp.ne.s32.totalorder %s3015_s29, %s3119_s30  ;;  %p3125_p3 = scmp.lt.s32.totalorder %s3119_s30, %s3119_s30 }
 0x232   :  { %2966 = vst [vmem:[#allocation8 + $0x8] sm:$0xff] %v2752_v19 }
 0x233   :  { %v2451_v16 = vpop.f32.mrf.mxu0  ;;  %v2758_v17 = vpop.f32.mrf.mxu1  ;;  %p3126_p4 = por %p3125_p3, %p3124_p2 }
 0x234   :  { %v2759_v32 = vadd.f32 %v2758_v17, %v2438_v22  ;;  %v2452_v43 = vadd.f32 %v2451_v16, %v5268_v50 }
 0x235   :  { %v2453_v46 = vpop.f32.mrf.mxu0  ;;  %v2760_v7 = vpop.f32.mrf.mxu1  ;;  %p3127_p5 = pnand %p3126_p4, %p3120_p1 }
 0x236   :  { %2967 = vst [vmem:[#allocation8 + $0x10] sm:$0xff] %v2759_v32 }
 0x237   :  { %v2458_v49 = vpop.f32.mrf.mxu0  ;;  %v2765_v45 = vpop.f32.mrf.mxu1 }
 0x238   :  { %v2766_v56 = vadd.f32 %v2765_v45, %v2445_v3  ;;  %v2459_v29 = vadd.f32 %v2458_v49, %v5275_v23 }
 0x239   :  { %v2460_v28 = vpop.f32.mrf.mxu0  ;;  %v2767_v54 = vpop.f32.mrf.mxu1 }
 0x23a   :  { %2968 = vst [vmem:[#allocation8 + $0x18] sm:$0xff] %v2766_v56 }
 0x23b   :  { %v2465_v11 = vpop.f32.mrf.mxu0  ;;  %v2772_v9 = vpop.f32.mrf.mxu1 }
 0x23c   :  { %v2773_v30 = vadd.f32 %v2772_v9, %v2452_v43  ;;  %v2466_v42 = vadd.f32 %v2465_v11, %v5282_v62 }
 0x23d   :  { %v2467_v57 = vpop.f32.mrf.mxu0  ;;  %v2774_v53 = vpop.f32.mrf.mxu1 }
 0x23e   :  { %2969 = vst [vmem:[#allocation8 + $0x20] sm:$0xff] %v2773_v30 }
 0x23f   :  { %v2472_v61 = vpop.f32.mrf.mxu0  ;;  %v2779_v12 = vpop.f32.mrf.mxu1 }
 0x240   :  { %v2780_v26 = vadd.f32 %v2779_v12, %v2459_v29  ;;  %v2473_v44 = vadd.f32 %v2472_v61, %v5289_v27 }
 0x241   :  { %v2474_v40 = vpop.f32.mrf.mxu0  ;;  %v2781_v14 = vpop.f32.mrf.mxu1 }
 0x242   :  { %2970 = vst [vmem:[#allocation8 + $0x28] sm:$0xff] %v2780_v26 }
 0x243   :  { %v2479_v13 = vpop.f32.mrf.mxu0  ;;  %v2786_v52 = vpop.f32.mrf.mxu1 }
 0x244   :  { %v2787_v50 = vadd.f32 %v2786_v52, %v2466_v42  ;;  %v2480_v33 = vadd.f32 %v2479_v13, %v5296_v51 }
 0x245   :  { %v2481_v48 = vpop.f32.mrf.mxu0  ;;  %v2788_v1 = vpop.f32.mrf.mxu1 }
 0x246   :  { %2971 = vst [vmem:[#allocation8 + $0x30] sm:$0xff] %v2787_v50 }
 0x247   :  { %v2486_v35 = vpop.f32.mrf.mxu0  ;;  %v2793_v39 = vpop.f32.mrf.mxu1 }
 0x248   :  { %v2794_v23 = vadd.f32 %v2793_v39, %v2473_v44  ;;  %v2487_v32 = vadd.f32 %v2486_v35, %v5303_v36 }
 0x249   :  { %v2488_v47 = vpop.f32.mrf.mxu0  ;;  %v2795_v19 = vpop.f32.mrf.mxu1 }
 0x24a   :  { %2972 = vst [vmem:[#allocation8 + $0x38] sm:$0xff] %v2794_v23 }
 0x24b   :  { %v2493_v15 = vpop.f32.mrf.mxu0  ;;  %v2800_v22 = vpop.f32.mrf.mxu1 }
 0x24c   :  { %v2801_v62 = vadd.f32 %v2800_v22, %v2480_v33  ;;  %v2494_v45 = vadd.f32 %v2493_v15, %v5310_v6 }
 0x24d   :  { %v2495_v16 = vpop.f32.mrf.mxu0  ;;  %v2802_v17 = vpop.f32.mrf.mxu1 }
 0x24e   :  { %2973 = vst [vmem:[#allocation8 + $0x40] sm:$0xff] %v2801_v62 }
 0x24f   :  { %v2500_v46 = vpop.f32.mrf.mxu0  ;;  %v2807_v7 = vpop.f32.mrf.mxu1 }
 0x250   :  { %v2808_v27 = vadd.f32 %v2807_v7, %v2487_v32  ;;  %v2501_v11 = vadd.f32 %v2500_v46, %v5317_v8 }
 0x251   :  { %v2502_v3 = vpop.f32.mrf.mxu0  ;;  %v2809_v49 = vpop.f32.mrf.mxu1 }
 0x252   :  { %2974 = vst [vmem:[#allocation8 + $0x48] sm:$0xff] %v2808_v27 }
 0x253   :  { %v2507_v56 = vpop.f32.mrf.mxu0  ;;  %v2814_v28 = vpop.f32.mrf.mxu1 }
 0x254   :  { %v2815_v51 = vadd.f32 %v2814_v28, %v2494_v45  ;;  %v2508_v29 = vadd.f32 %v2507_v56, %v5324_v5 }
 0x255   :  { %v2509_v54 = vpop.f32.mrf.mxu0  ;;  %v2816_v43 = vpop.f32.mrf.mxu1 }
 0x256   :  { %2975 = vst [vmem:[#allocation8 + $0x50] sm:$0xff] %v2815_v51 }
 0x257   :  { %v2514_v9 = vpop.f32.mrf.mxu0  ;;  %v2821_v30 = vpop.f32.mrf.mxu1 }
 0x258   :  { %v2822_v36 = vadd.f32 %v2821_v30, %v2501_v11  ;;  %v2515_v14 = vadd.f32 %v2514_v9, %v5331_v0 }
 0x259   :  { %v2516_v57 = vpop.f32.mrf.mxu0  ;;  %v2823_v53 = vpop.f32.mrf.mxu1 }
 0x25a   :  { %2976 = vst [vmem:[#allocation8 + $0x58] sm:$0xff] %v2822_v36 }
 0x25b   :  { %v2521_v61 = vpop.f32.mrf.mxu0  ;;  %v2828_v12 = vpop.f32.mrf.mxu1 }
 0x25c   :  { %v2829_v6 = vadd.f32 %v2828_v12, %v2508_v29  ;;  %v2522_v48 = vadd.f32 %v2521_v61, %v5336_v4 }
 0x25d   :  { %v2523_v26 = vpop.f32.mrf.mxu0  ;;  %v2830_v40 = vpop.f32.mrf.mxu1 }
 0x25e   :  { %2977 = vst [vmem:[#allocation8 + $0x60] sm:$0xff] %v2829_v6 }
 0x25f   :  { %v2528_v42 = vpop.f32.mrf.mxu0  ;;  %v2835_v13 = vpop.f32.mrf.mxu1 }
 0x260   :  { %v2836_v8 = vadd.f32 %v2835_v13, %v2515_v14  ;;  %v2529_v23 = vadd.f32 %v2528_v42, %v5341_v20 }
 0x261   :  { %v2530_v52 = vpop.f32.mrf.mxu0  ;;  %v2837_v50 = vpop.f32.mrf.mxu1 }
 0x262   :  { %2978 = vst [vmem:[#allocation8 + $0x68] sm:$0xff] %v2836_v8 }
 0x263   :  { %v2535_v1 = vpop.f32.mrf.mxu0  ;;  %v2842_v44 = vpop.f32.mrf.mxu1 }
 0x264   :  { %v2843_v5 = vadd.f32 %v2842_v44, %v2522_v48  ;;  %v2536_v22 = vadd.f32 %v2535_v1, %v5344_v31 }
 0x265   :  { %v2537_v35 = vpop.f32.mrf.mxu0  ;;  %v2844_v39 = vpop.f32.mrf.mxu1 }
 0x266   :  { %2979 = vst [vmem:[#allocation8 + $0x70] sm:$0xff] %v2843_v5 }
 0x267   :  { %v2542_v47 = vpop.f32.mrf.mxu0  ;;  %v2849_v19 = vpop.f32.mrf.mxu1 }
 0x268   :  { %v2850_v0 = vadd.f32 %v2849_v19, %v2529_v23  ;;  %v2543_v46 = vadd.f32 %v2542_v47, %v5347_v58 }
 0x269   :  { %v2544_v33 = vpop.f32.mrf.mxu0  ;;  %v2851_v15 = vpop.f32.mrf.mxu1 }
 0x26a   :  { %2980 = vst [vmem:[#allocation8 + $0x78] sm:$0xff] %v2850_v0 }
 0x26b   :  { %v2549_v62 = vpop.f32.mrf.mxu0  ;;  %v2856_v16 = vpop.f32.mrf.mxu1 }
 0x26c   :  { %v2857_v4 = vadd.f32 %v2856_v16, %v2536_v22  ;;  %v2550_v45 = vadd.f32 %v2549_v62, %v5350_v41 }
 0x26d   :  { %v2551_v17 = vpop.f32.mrf.mxu0  ;;  %v2858_v32 = vpop.f32.mrf.mxu1 }
 0x26e   :  { %2981 = vst [vmem:[#allocation8 + $0x80] sm:$0xff] %v2857_v4 }
 0x26f   :  { %v2556_v7 = vpop.f32.mrf.mxu0  ;;  %v2863_v27 = vpop.f32.mrf.mxu1 }
 0x270   :  { %v2864_v20 = vadd.f32 %v2863_v27, %v2543_v46  ;;  %v2557_v43 = vadd.f32 %v2556_v7, %v5353_v59 }
 0x271   :  { %v2558_v3 = vpop.f32.mrf.mxu0  ;;  %v2865_v49 = vpop.f32.mrf.mxu1 }
 0x272   :  { %2982 = vst [vmem:[#allocation8 + $0x88] sm:$0xff] %v2864_v20 }
 0x273   :  { %v2563_v56 = vpop.f32.mrf.mxu0  ;;  %v2870_v28 = vpop.f32.mrf.mxu1 }
 0x274   :  { %v2871_v31 = vadd.f32 %v2870_v28, %v2550_v45  ;;  %v2564_v57 = vadd.f32 %v2563_v56, %v5356_v37 }
 0x275   :  { %v2565_v51 = vpop.f32.mrf.mxu0  ;;  %v2872_v54 = vpop.f32.mrf.mxu1 }
 0x276   :  { %2983 = vst [vmem:[#allocation8 + $0x90] sm:$0xff] %v2871_v31 }
 0x277   :  { %v2570_v11 = vpop.f32.mrf.mxu0  ;;  %v2877_v9 = vpop.f32.mrf.mxu1 }
 0x278   :  { %v2878_v58 = vadd.f32 %v2877_v9, %v2557_v43  ;;  %v2571_v6 = vadd.f32 %v2570_v11, %v5359_v21 }
 0x279   :  { %v2572_v30 = vpop.f32.mrf.mxu0  ;;  %v2879_v36 = vpop.f32.mrf.mxu1 }
 0x27a   :  { %2984 = vst [vmem:[#allocation8 + $0x98] sm:$0xff] %v2878_v58 }
 0x27b   :  { %v2577_v53 = vpop.f32.mrf.mxu0  ;;  %v2884_v29 = vpop.f32.mrf.mxu1 }
 0x27c   :  { %v2885_v41 = vadd.f32 %v2884_v29, %v2564_v57  ;;  %v2578_v13 = vadd.f32 %v2577_v53, %v5362_v10 }
 0x27d   :  { %v2579_v61 = vpop.f32.mrf.mxu0  ;;  %v2886_v12 = vpop.f32.mrf.mxu1 }
 0x27e   :  { %2985 = vst [vmem:[#allocation8 + $0xa0] sm:$0xff] %v2885_v41 }
 0x27f   :  { %v2584_v26 = vpop.f32.mrf.mxu0  ;;  %v2891_v40 = vpop.f32.mrf.mxu1 }
 0x280   :  { %v2892_v59 = vadd.f32 %v2891_v40, %v2571_v6  ;;  %v2585_v1 = vadd.f32 %v2584_v26, %v5365_v18 }
 0x281   :  { %v2586_v14 = vpop.f32.mrf.mxu0  ;;  %v2893_v42 = vpop.f32.mrf.mxu1 }
 0x282   :  { %2986 = vst [vmem:[#allocation8 + $0xa8] sm:$0xff] %v2892_v59 }
 0x283   :  { %v2591_v8 = vpop.f32.mrf.mxu0  ;;  %v2898_v52 = vpop.f32.mrf.mxu1 }
 0x284   :  { %v2899_v37 = vadd.f32 %v2898_v52, %v2578_v13  ;;  %v2592_v23 = vadd.f32 %v2591_v8, %v5368_v55 }
 0x285   :  { %v2593_v50 = vpop.f32.mrf.mxu0  ;;  %v2900_v48 = vpop.f32.mrf.mxu1 }
 0x286   :  { %2987 = vst [vmem:[#allocation8 + $0xb0] sm:$0xff] %v2899_v37 }
 0x287   :  { %v2598_v44 = vpop.f32.mrf.mxu0  ;;  %v2905_v5 = vpop.f32.mrf.mxu1 }
 0x288   :  { %v2906_v21 = vadd.f32 %v2905_v5, %v2585_v1  ;;  %v2599_v15 = vadd.f32 %v2598_v44, %v5371_v25 }
 0x289   :  { %v2600_v35 = vpop.f32.mrf.mxu0  ;;  %v2907_v39 = vpop.f32.mrf.mxu1 }
 0x28a   :  { %2988 = vst [vmem:[#allocation8 + $0xb8] sm:$0xff] %v2906_v21 }
 0x28b   :  { %v2605_v47 = vpop.f32.mrf.mxu0  ;;  %v2912_v19 = vpop.f32.mrf.mxu1 }
 0x28c   :  { %v2913_v10 = vadd.f32 %v2912_v19, %v2592_v23  ;;  %v2606_v17 = vadd.f32 %v2605_v47, %v5374_v38 }
 0x28d   :  { %v2607_v0 = vpop.f32.mrf.mxu0  ;;  %v2914_v33 = vpop.f32.mrf.mxu1 }
 0x28e   :  { %2989 = vst [vmem:[#allocation8 + $0xc0] sm:$0xff] %v2913_v10 }
 0x28f   :  { %v2612_v22 = vpop.f32.mrf.mxu0  ;;  %v2919_v62 = vpop.f32.mrf.mxu1 }
 0x290   :  { %v2920_v18 = vadd.f32 %v2919_v62, %v2599_v15  ;;  %v2613_v20 = vadd.f32 %v2612_v22, %v5377_v34 }
 0x291   :  { %v2614_v16 = vpop.f32.mrf.mxu0  ;;  %v2921_v4 = vpop.f32.mrf.mxu1 }
 0x292   :  { %2990 = vst [vmem:[#allocation8 + $0xc8] sm:$0xff] %v2920_v18 }
 0x293   :  { %v2619_v32 = vpop.f32.mrf.mxu0  ;;  %v2926_v46 = vpop.f32.mrf.mxu1 }
 0x294   :  { %v2927_v55 = vadd.f32 %v2926_v46, %v2606_v17  ;;  %v2620_v28 = vadd.f32 %v2619_v32, %v5380_v63 }
 0x295   :  { %v2621_v7 = vpop.f32.mrf.mxu0  ;;  %v2928_v27 = vpop.f32.mrf.mxu1 }
 0x296   :  { %2991 = vst [vmem:[#allocation8 + $0xd0] sm:$0xff] %v2927_v55 }
 0x297   :  { %v2626_v3 = vpop.f32.mrf.mxu0  ;;  %v2933_v49 = vpop.f32.mrf.mxu1 }
 0x298   :  { %v2934_v25 = vadd.f32 %v2933_v49, %v2613_v20  ;;  %v2627_v11 = vadd.f32 %v2626_v3, %v5383_v24 }
 0x299   :  { %v2628_v45 = vpop.f32.mrf.mxu0  ;;  %v2935_v56 = vpop.f32.mrf.mxu1 }
 0x29a   :  { %2992 = vst [vmem:[#allocation8 + $0xd8] sm:$0xff] %v2934_v25 }
 0x29b   :  { %v2633_v31 = vpop.f32.mrf.mxu0  ;;  %v2940_v51 = vpop.f32.mrf.mxu1 }
 0x29c   :  { %v2941_v38 = vadd.f32 %v2940_v51, %v2620_v28  ;;  %v2634_v57 = vadd.f32 %v2633_v31, %v5385_v2 }
 0x29d   :  { %v2635_v54 = vpop.f32.mrf.mxu0  ;;  %v2942_v43 = vpop.f32.mrf.mxu1 }
 0x29e   :  { %2993 = vst [vmem:[#allocation8 + $0xe0] sm:$0xff] %v2941_v38 }
 0x29f   :  { %v2640_v9 = vpop.f32.mrf.mxu0  ;;  %v2947_v58 = vpop.f32.mrf.mxu1 }
 0x2a0   :  { %v2948_v34 = vadd.f32 %v2947_v58, %v2627_v11  ;;  %v2641_v41 = vadd.f32 %v2640_v9, %v5387_v60 }
 0x2a1   :  { %v2949_v30 = vpop.f32.mrf.mxu1  ;;  %v2642_v36 = vpop.f32.mrf.mxu0 }
 0x2a2   :  { %2994 = vst [vmem:[#allocation8 + $0xe8] sm:$0xff] %v2948_v34 }
 0x2a3   :  { %v2954_v53 = vpop.f32.mrf.mxu1 }
 0x2a4   :  { %v2955_v29 = vadd.f32 %v2954_v53, %v2634_v57 }
 0x2a5   :  { %v2956_v63 = vpop.f32.mrf.mxu1 }
 0x2a6   :  { %2995 = vst [vmem:[#allocation8 + $0xf0] sm:$0xff] %v2955_v29 }
 0x2a7   :  { %v2961_v61 = vpop.f32.mrf.mxu1 }
 0x2a8   :  { %v2962_v12 = vadd.f32 %v2961_v61, %v2641_v41 }
 0x2a9   :  { %v2963_v24 = vpop.f32.mrf.mxu1 }
 0x2aa   :  { %2996 = vst [vmem:[#allocation8 + $0xf8] sm:$0xff] %v2962_v12 }
 0x2ab   :  { %3130 = shalt.err (!%p3127_p5)
}
 0x2ac   :  { %3020 = dma.vmem_to_hbm [thread:$0]  %s3015_s29, 4096, %s5436_s3, [#allocation9], %s3151_s22, %s3151_s22, %s3152_s23  }
 0x2ad   :  { %3143 = dma.done.wait [#allocation4], 8192  }
 0x2ae   :  { %3144 = vsyncadd [#allocation4], 4294959104 }
 0x2af   :  { %3145 = dma.done.wait [#allocation9], 4096  }
 0x2b0   :  { %3146 = vsyncadd [#allocation9], 4294963200 }
 0x2b1   :  { %3027 = vsyncpa [#allocation3], 1 }
 0x2b2   :  { %3028 = vsyncpa [#allocation6], 1 }
 0x2b3   :  { %3029 = vsyncpa [#allocation4], 1 }
 0x2b4   :  { %3030 = vsyncpa [#allocation9], 1 }

</bundles_post_ra>
